<compile_context>
chip_gen: v5e
topology: v5e:2x2
jax: 0.10.0
libtpu: 0.0.40
codegen_flags: <defaults>
</compile_context>

<pallas_src>
import functools

import jax
import jax.numpy as jnp
from jax.experimental import pallas as pl
from jax.experimental.pallas import tpu as pltpu

GRID_SIZE = 5      # B-spline grid size
SPLINE_ORDER = 3   # B-spline order (cubic)
N_BASIS = GRID_SIZE + SPLINE_ORDER          # basis functions per element
N_FEAT_PER_ELEM = 1 + N_BASIS               # [SiLU(x), B_0(x), ..., B_{N-1}(x)]


def _round_up(x, m):
    return (x + m - 1) // m * m


# ----------------------------------------------------------------------------
# B-spline basis (plain JAX, elementwise)
# ----------------------------------------------------------------------------
def _bspline_knots():
    h = 2.0 / GRID_SIZE
    return (-1.0 - SPLINE_ORDER * h
            + h * jnp.arange(GRID_SIZE + 2 * SPLINE_ORDER + 1, dtype=jnp.float32))


def _bspline_basis(x):
    """Cox-de Boor B-spline basis. x: [...], returns [..., N_BASIS]."""
    t = _bspline_knots()
    x = x[..., None]
    bases = ((x >= t[:-1]) & (x < t[1:])).astype(jnp.float32)
    for p in range(1, SPLINE_ORDER + 1):
        left = (x - t[: -(p + 1)]) / (t[p:-1] - t[: -(p + 1)]) * bases[..., :-1]
        right = (t[p + 1:] - x) / (t[p + 1:] - t[1:-p]) * bases[..., 1:]
        bases = left + right
    return bases  # [..., N_BASIS]


# ----------------------------------------------------------------------------
# Feature-window construction (plain JAX glue, 9x expansion only, bf16)
# ----------------------------------------------------------------------------
def _build_feature_blocks(x_nhwc, th):
    """Padded per-pixel KAN features, split into row blocks with halos.

    Returns (N * H//th, (th+3)*(W+2), C_in*9) bf16 where rows are padded pixels
    in row-major order, so the feature row needed by output pixel (i, j) of a
    block for tap (ky, kx) is  i*(W+2) + j + ky*(W+2) + kx  (a static offset).
    The extra bottom halo rows only feed the discarded padded output columns.
    """
    n, h, w, c = x_nhwc.shape
    wp = w + 2
    kc = c * N_FEAT_PER_ELEM
    xp = jnp.pad(x_nhwc.astype(jnp.float32),
                 ((0, 0), (1, 2), (1, 1), (0, 0)))      # extra bottom row = tap spill
    silu = xp * jax.nn.sigmoid(xp)
    basis = _bspline_basis(xp)                           # (n, h+3, wp, c, NB)
    feat = jnp.concatenate([silu[..., None], basis], axis=-1)   # (..., c, 1+NB)
    feat = feat.reshape(n, h + 3, wp, kc).astype(jnp.bfloat16)
    nhb = h // th
    blocks = jnp.stack([feat[:, b * th: b * th + th + 3] for b in range(nhb)],
                       axis=1)                           # (n, nhb, th+3, wp, kc)
    return blocks.reshape(n * nhb, (th + 3) * wp, kc)


def _pick_row_tile(h, wp, kc, cop):
    """Largest th dividing h with tm = th*(W+2) <= ~1024 rows and modest VMEM."""
    budget = 24 * 1024 * 1024
    best = 1
    for th in range(1, h + 1):
        if h % th:
            continue
        tm = th * wp
        vmem = (2 * (th + 3) * wp * kc * 2      # double-buffered bf16 feature window
                + 9 * kc * cop * 2              # resident per-tap weights
                + 3 * tm * cop * 4)             # out (x2) + f32 accumulator bound
        if tm <= 1024 and vmem <= budget:
            best = th
    return best


# ----------------------------------------------------------------------------
# Pallas kernel: fused 9-tap shifted-window matmul + accumulate + ReLU
# ----------------------------------------------------------------------------
def _kan_conv_relu_kernel(f_ref, w_ref, o_ref, acc_ref, *, wp, tm):
    # f_ref: (1, R, Kc)  bf16 flattened feature window (R >= tm + 2*wp + 2)
    # w_ref: (9, Kc, Cop) bf16 per-tap weights (resident across the grid)
    # o_ref: (1, tm, Cop) output block ; acc_ref: (tm, Cop) f32 VMEM scratch
    for t in range(9):
        off = (t // 3) * wp + (t % 3)            # static shifted-window offset
        contrib = jnp.dot(f_ref[0, off:off + tm, :], w_ref[t],
                          preferred_element_type=jnp.float32)
        if t == 0:
            acc_ref[...] = contrib
        else:
            acc_ref[...] += contrib
    o_ref[0] = jnp.maximum(acc_ref[...], 0.0).astype(o_ref.dtype)


def kan_conv2d_relu(x_nhwc, weight, *, out_dtype):
    """ReLU(KANConv2D_3x3_pad1(x)).  x: (N,H,W,Cin); weight: (Cout,9,Cin,1+NB)."""
    n, h, w, c = x_nhwc.shape
    c_out = weight.shape[0]
    kc = c * N_FEAT_PER_ELEM
    cop = _round_up(c_out, 128)                  # lane-dense output stores
    wp = w + 2

    # Weight -> (9 taps, Kc, Cop) bf16 with zero-padded output channels.
    w_mat = jnp.transpose(weight, (1, 2, 3, 0)).reshape(9, kc, c_out)
    w_mat = jnp.pad(w_mat, ((0, 0), (0, 0), (0, cop - c_out))).astype(jnp.bfloat16)

    th = _pick_row_tile(h, wp, kc, cop)
    nhb = h // th
    tm = th * wp                                 # output rows per grid step
    fb = _build_feature_blocks(x_nhwc, th)       # (N*nhb, (th+3)*wp, kc) bf16
    nblocks, r, _ = fb.shape

    out_item = jnp.dtype(out_dtype).itemsize
    est = 2 * r * kc * 2 + 9 * kc * cop * 2 + 2 * tm * cop * out_item + tm * cop * 4
    vmem_limit = int(min(max(2 * est, 32 * 1024 * 1024), 48 * 1024 * 1024))

    out = pl.pallas_call(
        functools.partial(_kan_conv_relu_kernel, wp=wp, tm=tm),
        out_shape=jax.ShapeDtypeStruct((nblocks, tm, cop), out_dtype),
        grid_spec=pltpu.PrefetchScalarGridSpec(
            num_scalar_prefetch=0,
            grid=(nblocks,),
            in_specs=[
                pl.BlockSpec((1, r, kc), lambda i: (i, 0, 0)),     # feature window
                pl.BlockSpec((9, kc, cop), lambda i: (0, 0, 0)),   # weights (resident)
            ],
            out_specs=pl.BlockSpec((1, tm, cop), lambda i: (i, 0, 0)),
            scratch_shapes=[pltpu.VMEM((tm, cop), jnp.float32)],
        ),
        compiler_params=pltpu.CompilerParams(
            dimension_semantics=("parallel",),
            vmem_limit_bytes=vmem_limit,
        ),
    )(fb, w_mat)

    # (N*nhb, th*wp, Cop) -> (N, H, W+2, Cop) -> drop padded cols / padded channels.
    y = out.reshape(n, h, wp, cop)
    return y[:, :, :w, :c_out]


# ----------------------------------------------------------------------------
# DobleConv (BN=False default path)
# ----------------------------------------------------------------------------
def init_doble_conv_params(key, in_channels, mid_channels, out_channels):
    k1, k2 = jax.random.split(key)

    def init_w(k, c_out, c_in):
        fan_in = 9 * c_in * N_FEAT_PER_ELEM
        return (jax.random.normal(k, (c_out, 9, c_in, N_FEAT_PER_ELEM),
                                  dtype=jnp.float32)
                * (1.0 / jnp.sqrt(jnp.float32(fan_in))))

    return {"w1": init_w(k1, mid_channels, in_channels),
            "w2": init_w(k2, out_channels, mid_channels)}


@jax.jit
def doble_conv_forward(params, x_nchw):
    x = jnp.transpose(x_nchw, (0, 2, 3, 1))                        # NCHW->NHWC once
    x = kan_conv2d_relu(x, params["w1"], out_dtype=jnp.bfloat16)   # conv1 -> ReLU
    x = kan_conv2d_relu(x, params["w2"], out_dtype=jnp.float32)    # conv2 -> ReLU
    return jnp.transpose(x, (0, 3, 1, 2))                          # NHWC->NCHW once


# ----------------------------------------------------------------------------
# Pure-JAX reference (f32) for a correctness cross-check
# ----------------------------------------------------------------------------
def _kan_conv2d_relu_ref(x_nhwc, weight):
    n, h, w, c = x_nhwc.shape
    xp = jnp.pad(x_nhwc, ((0, 0), (1, 1), (1, 1), (0, 0)))
    feat = jnp.concatenate([(xp * jax.nn.sigmoid(xp))[..., None],
                            _bspline_basis(xp)], axis=-1)           # (n,h+2,w+2,c,9)
    out = jnp.zeros((n, h, w, weight.shape[0]), jnp.float32)
    for ky in range(3):
        for kx in range(3):
            out = out + jnp.einsum('nhwcf,ocf->nhwo',
                                   feat[:, ky:ky + h, kx:kx + w],
                                   weight[:, 3 * ky + kx])
    return jnp.maximum(out, 0.0)


@jax.jit
def _doble_conv_reference(params, x_nchw):
    x = jnp.transpose(x_nchw, (0, 2, 3, 1))
    x = _kan_conv2d_relu_ref(x, params["w1"])
    x = _kan_conv2d_relu_ref(x, params["w2"])
    return jnp.transpose(x, (0, 3, 1, 2))


if __name__ == "__main__":
    key = jax.random.PRNGKey(0)
    k_param, k_x = jax.random.split(key)

    batch, in_ch, mid_ch, out_ch, hw = 2, 4, 8, 4, 16
    x = jax.random.normal(k_x, (batch, in_ch, hw, hw), dtype=jnp.float32)
    params = init_doble_conv_params(k_param, in_ch, mid_ch, out_ch)

    y = jax.block_until_ready(doble_conv_forward(params, x))
    assert y.shape == (batch, out_ch, hw, hw), y.shape
    assert bool(jnp.all(y >= 0.0))                      # ReLU output

    y_ref = jax.block_until_ready(_doble_conv_reference(params, x))
    max_err = float(jnp.max(jnp.abs(y - y_ref)))
    assert max_err < 0.1, f"mismatch vs reference: {max_err}"

    print("KERNEL_OK")
</pallas_src>

<mosaic_0001>
module attributes {stable_mosaic.version = 11 : i64} {
  func.func @_kan_conv_relu_kernel(%arg0: i32, %arg1: memref<1x342x36xbf16, #tpu.memory_space<vmem>>, %arg2: memref<9x36x128xbf16, #tpu.memory_space<vmem>>, %arg3: memref<1x288x128xbf16, #tpu.memory_space<vmem>>, %arg4: memref<288x128xf32, #tpu.memory_space<vmem>>) attributes {dimension_semantics = [#tpu.dimension_semantics<parallel>], iteration_bounds = array<i64: 2>, scalar_prefetch = 0 : i64, scratch_operands = 1 : i64, tpu.core_type = #tpu.core_type<tc>, window_params = [{transform_indices = @transform_0, window_bounds = array<i64: 1, 342, 36>}, {pipeline_mode = #tpu.pipeline_mode<synchronous>, transform_indices = @transform_1, window_bounds = array<i64: 9, 36, 128>}, {transform_indices = @transform_2, window_bounds = array<i64: 1, 288, 128>}]} {
    %c0 = arith.constant 0 : index
    %c0_0 = arith.constant 0 : index
    %c0_1 = arith.constant 0 : index
    %0 = vector.load %arg1[%c0, %c0_0, %c0_1] : memref<1x342x36xbf16, #tpu.memory_space<vmem>>, vector<1x288x36xbf16>
    %1 = vector.shape_cast %0 : vector<1x288x36xbf16> to vector<288x36xbf16>
    %c0_2 = arith.constant 0 : index
    %c0_3 = arith.constant 0 : index
    %c0_4 = arith.constant 0 : index
    %2 = vector.load %arg2[%c0_2, %c0_3, %c0_4] : memref<9x36x128xbf16, #tpu.memory_space<vmem>>, vector<1x36x128xbf16>
    %3 = vector.shape_cast %2 : vector<1x36x128xbf16> to vector<36x128xbf16>
    %cst = arith.constant dense<0.000000e+00> : vector<288x128xf32>
    %4 = tpu.matmul %1, %3, %cst {dimension_numbers = #tpu.dot_dimension_numbers<[1], [0], [0], [1], [0, 0, 1, 1], [], []>} : vector<288x36xbf16>, vector<36x128xbf16>, vector<288x128xf32> -> vector<288x128xf32>
    %c0_5 = arith.constant 0 : index
    %c0_6 = arith.constant 0 : index
    %5 = vector.load %arg4[%c0_5, %c0_6] : memref<288x128xf32, #tpu.memory_space<vmem>>, vector<288x128xf32>
    tpu.vector_store %arg4[%c0_5, %c0_6], %4 {strides = array<i32>} : memref<288x128xf32, #tpu.memory_space<vmem>>, vector<288x128xf32>,
    %c0_7 = arith.constant 0 : index
    %c1 = arith.constant 1 : index
    %c0_8 = arith.constant 0 : index
    %6 = vector.load %arg1[%c0_7, %c1, %c0_8] : memref<1x342x36xbf16, #tpu.memory_space<vmem>>, vector<1x288x36xbf16>
    %7 = vector.shape_cast %6 : vector<1x288x36xbf16> to vector<288x36xbf16>
    %c1_9 = arith.constant 1 : index
    %c0_10 = arith.constant 0 : index
    %c0_11 = arith.constant 0 : index
    %8 = vector.load %arg2[%c1_9, %c0_10, %c0_11] : memref<9x36x128xbf16, #tpu.memory_space<vmem>>, vector<1x36x128xbf16>
    %9 = vector.shape_cast %8 : vector<1x36x128xbf16> to vector<36x128xbf16>
    %cst_12 = arith.constant dense<0.000000e+00> : vector<288x128xf32>
    %10 = tpu.matmul %7, %9, %cst_12 {dimension_numbers = #tpu.dot_dimension_numbers<[1], [0], [0], [1], [0, 0, 1, 1], [], []>} : vector<288x36xbf16>, vector<36x128xbf16>, vector<288x128xf32> -> vector<288x128xf32>
    %c0_13 = arith.constant 0 : index
    %c0_14 = arith.constant 0 : index
    %11 = vector.load %arg4[%c0_13, %c0_14] : memref<288x128xf32, #tpu.memory_space<vmem>>, vector<288x128xf32>
    %12 = arith.addf %11, %10 : vector<288x128xf32>
    %c0_15 = arith.constant 0 : index
    %c0_16 = arith.constant 0 : index
    %13 = vector.load %arg4[%c0_15, %c0_16] : memref<288x128xf32, #tpu.memory_space<vmem>>, vector<288x128xf32>
    tpu.vector_store %arg4[%c0_15, %c0_16], %12 {strides = array<i32>} : memref<288x128xf32, #tpu.memory_space<vmem>>, vector<288x128xf32>,
    %c0_17 = arith.constant 0 : index
    %c2 = arith.constant 2 : index
    %c0_18 = arith.constant 0 : index
    %14 = vector.load %arg1[%c0_17, %c2, %c0_18] : memref<1x342x36xbf16, #tpu.memory_space<vmem>>, vector<1x288x36xbf16>
    %15 = vector.shape_cast %14 : vector<1x288x36xbf16> to vector<288x36xbf16>
    %c2_19 = arith.constant 2 : index
    %c0_20 = arith.constant 0 : index
    %c0_21 = arith.constant 0 : index
    %16 = vector.load %arg2[%c2_19, %c0_20, %c0_21] : memref<9x36x128xbf16, #tpu.memory_space<vmem>>, vector<1x36x128xbf16>
    %17 = vector.shape_cast %16 : vector<1x36x128xbf16> to vector<36x128xbf16>
    %cst_22 = arith.constant dense<0.000000e+00> : vector<288x128xf32>
    %18 = tpu.matmul %15, %17, %cst_22 {dimension_numbers = #tpu.dot_dimension_numbers<[1], [0], [0], [1], [0, 0, 1, 1], [], []>} : vector<288x36xbf16>, vector<36x128xbf16>, vector<288x128xf32> -> vector<288x128xf32>
    %c0_23 = arith.constant 0 : index
    %c0_24 = arith.constant 0 : index
    %19 = vector.load %arg4[%c0_23, %c0_24] : memref<288x128xf32, #tpu.memory_space<vmem>>, vector<288x128xf32>
    %20 = arith.addf %19, %18 : vector<288x128xf32>
    %c0_25 = arith.constant 0 : index
    %c0_26 = arith.constant 0 : index
    %21 = vector.load %arg4[%c0_25, %c0_26] : memref<288x128xf32, #tpu.memory_space<vmem>>, vector<288x128xf32>
    tpu.vector_store %arg4[%c0_25, %c0_26], %20 {strides = array<i32>} : memref<288x128xf32, #tpu.memory_space<vmem>>, vector<288x128xf32>,
    %c0_27 = arith.constant 0 : index
    %c18 = arith.constant 18 : index
    %c0_28 = arith.constant 0 : index
    %22 = vector.load %arg1[%c0_27, %c18, %c0_28] : memref<1x342x36xbf16, #tpu.memory_space<vmem>>, vector<1x288x36xbf16>
    %23 = vector.shape_cast %22 : vector<1x288x36xbf16> to vector<288x36xbf16>
    %c3 = arith.constant 3 : index
    %c0_29 = arith.constant 0 : index
    %c0_30 = arith.constant 0 : index
    %24 = vector.load %arg2[%c3, %c0_29, %c0_30] : memref<9x36x128xbf16, #tpu.memory_space<vmem>>, vector<1x36x128xbf16>
    %25 = vector.shape_cast %24 : vector<1x36x128xbf16> to vector<36x128xbf16>
    %cst_31 = arith.constant dense<0.000000e+00> : vector<288x128xf32>
    %26 = tpu.matmul %23, %25, %cst_31 {dimension_numbers = #tpu.dot_dimension_numbers<[1], [0], [0], [1], [0, 0, 1, 1], [], []>} : vector<288x36xbf16>, vector<36x128xbf16>, vector<288x128xf32> -> vector<288x128xf32>
    %c0_32 = arith.constant 0 : index
    %c0_33 = arith.constant 0 : index
    %27 = vector.load %arg4[%c0_32, %c0_33] : memref<288x128xf32, #tpu.memory_space<vmem>>, vector<288x128xf32>
    %28 = arith.addf %27, %26 : vector<288x128xf32>
    %c0_34 = arith.constant 0 : index
    %c0_35 = arith.constant 0 : index
    %29 = vector.load %arg4[%c0_34, %c0_35] : memref<288x128xf32, #tpu.memory_space<vmem>>, vector<288x128xf32>
    tpu.vector_store %arg4[%c0_34, %c0_35], %28 {strides = array<i32>} : memref<288x128xf32, #tpu.memory_space<vmem>>, vector<288x128xf32>,
    %c0_36 = arith.constant 0 : index
    %c19 = arith.constant 19 : index
    %c0_37 = arith.constant 0 : index
    %30 = vector.load %arg1[%c0_36, %c19, %c0_37] : memref<1x342x36xbf16, #tpu.memory_space<vmem>>, vector<1x288x36xbf16>
    %31 = vector.shape_cast %30 : vector<1x288x36xbf16> to vector<288x36xbf16>
    %c4 = arith.constant 4 : index
    %c0_38 = arith.constant 0 : index
    %c0_39 = arith.constant 0 : index
    %32 = vector.load %arg2[%c4, %c0_38, %c0_39] : memref<9x36x128xbf16, #tpu.memory_space<vmem>>, vector<1x36x128xbf16>
    %33 = vector.shape_cast %32 : vector<1x36x128xbf16> to vector<36x128xbf16>
    %cst_40 = arith.constant dense<0.000000e+00> : vector<288x128xf32>
    %34 = tpu.matmul %31, %33, %cst_40 {dimension_numbers = #tpu.dot_dimension_numbers<[1], [0], [0], [1], [0, 0, 1, 1], [], []>} : vector<288x36xbf16>, vector<36x128xbf16>, vector<288x128xf32> -> vector<288x128xf32>
    %c0_41 = arith.constant 0 : index
    %c0_42 = arith.constant 0 : index
    %35 = vector.load %arg4[%c0_41, %c0_42] : memref<288x128xf32, #tpu.memory_space<vmem>>, vector<288x128xf32>
    %36 = arith.addf %35, %34 : vector<288x128xf32>
    %c0_43 = arith.constant 0 : index
    %c0_44 = arith.constant 0 : index
    %37 = vector.load %arg4[%c0_43, %c0_44] : memref<288x128xf32, #tpu.memory_space<vmem>>, vector<288x128xf32>
    tpu.vector_store %arg4[%c0_43, %c0_44], %36 {strides = array<i32>} : memref<288x128xf32, #tpu.memory_space<vmem>>, vector<288x128xf32>,
    %c0_45 = arith.constant 0 : index
    %c20 = arith.constant 20 : index
    %c0_46 = arith.constant 0 : index
    %38 = vector.load %arg1[%c0_45, %c20, %c0_46] : memref<1x342x36xbf16, #tpu.memory_space<vmem>>, vector<1x288x36xbf16>
    %39 = vector.shape_cast %38 : vector<1x288x36xbf16> to vector<288x36xbf16>
    %c5 = arith.constant 5 : index
    %c0_47 = arith.constant 0 : index
    %c0_48 = arith.constant 0 : index
    %40 = vector.load %arg2[%c5, %c0_47, %c0_48] : memref<9x36x128xbf16, #tpu.memory_space<vmem>>, vector<1x36x128xbf16>
    %41 = vector.shape_cast %40 : vector<1x36x128xbf16> to vector<36x128xbf16>
    %cst_49 = arith.constant dense<0.000000e+00> : vector<288x128xf32>
    %42 = tpu.matmul %39, %41, %cst_49 {dimension_numbers = #tpu.dot_dimension_numbers<[1], [0], [0], [1], [0, 0, 1, 1], [], []>} : vector<288x36xbf16>, vector<36x128xbf16>, vector<288x128xf32> -> vector<288x128xf32>
    %c0_50 = arith.constant 0 : index
    %c0_51 = arith.constant 0 : index
    %43 = vector.load %arg4[%c0_50, %c0_51] : memref<288x128xf32, #tpu.memory_space<vmem>>, vector<288x128xf32>
    %44 = arith.addf %43, %42 : vector<288x128xf32>
    %c0_52 = arith.constant 0 : index
    %c0_53 = arith.constant 0 : index
    %45 = vector.load %arg4[%c0_52, %c0_53] : memref<288x128xf32, #tpu.memory_space<vmem>>, vector<288x128xf32>
    tpu.vector_store %arg4[%c0_52, %c0_53], %44 {strides = array<i32>} : memref<288x128xf32, #tpu.memory_space<vmem>>, vector<288x128xf32>,
    %c0_54 = arith.constant 0 : index
    %c36 = arith.constant 36 : index
    %c0_55 = arith.constant 0 : index
    %46 = vector.load %arg1[%c0_54, %c36, %c0_55] : memref<1x342x36xbf16, #tpu.memory_space<vmem>>, vector<1x288x36xbf16>
    %47 = vector.shape_cast %46 : vector<1x288x36xbf16> to vector<288x36xbf16>
    %c6 = arith.constant 6 : index
    %c0_56 = arith.constant 0 : index
    %c0_57 = arith.constant 0 : index
    %48 = vector.load %arg2[%c6, %c0_56, %c0_57] : memref<9x36x128xbf16, #tpu.memory_space<vmem>>, vector<1x36x128xbf16>
    %49 = vector.shape_cast %48 : vector<1x36x128xbf16> to vector<36x128xbf16>
    %cst_58 = arith.constant dense<0.000000e+00> : vector<288x128xf32>
    %50 = tpu.matmul %47, %49, %cst_58 {dimension_numbers = #tpu.dot_dimension_numbers<[1], [0], [0], [1], [0, 0, 1, 1], [], []>} : vector<288x36xbf16>, vector<36x128xbf16>, vector<288x128xf32> -> vector<288x128xf32>
    %c0_59 = arith.constant 0 : index
    %c0_60 = arith.constant 0 : index
    %51 = vector.load %arg4[%c0_59, %c0_60] : memref<288x128xf32, #tpu.memory_space<vmem>>, vector<288x128xf32>
    %52 = arith.addf %51, %50 : vector<288x128xf32>
    %c0_61 = arith.constant 0 : index
    %c0_62 = arith.constant 0 : index
    %53 = vector.load %arg4[%c0_61, %c0_62] : memref<288x128xf32, #tpu.memory_space<vmem>>, vector<288x128xf32>
    tpu.vector_store %arg4[%c0_61, %c0_62], %52 {strides = array<i32>} : memref<288x128xf32, #tpu.memory_space<vmem>>, vector<288x128xf32>,
    %c0_63 = arith.constant 0 : index
    %c37 = arith.constant 37 : index
    %c0_64 = arith.constant 0 : index
    %54 = vector.load %arg1[%c0_63, %c37, %c0_64] : memref<1x342x36xbf16, #tpu.memory_space<vmem>>, vector<1x288x36xbf16>
    %55 = vector.shape_cast %54 : vector<1x288x36xbf16> to vector<288x36xbf16>
    %c7 = arith.constant 7 : index
    %c0_65 = arith.constant 0 : index
    %c0_66 = arith.constant 0 : index
    %56 = vector.load %arg2[%c7, %c0_65, %c0_66] : memref<9x36x128xbf16, #tpu.memory_space<vmem>>, vector<1x36x128xbf16>
    %57 = vector.shape_cast %56 : vector<1x36x128xbf16> to vector<36x128xbf16>
    %cst_67 = arith.constant dense<0.000000e+00> : vector<288x128xf32>
    %58 = tpu.matmul %55, %57, %cst_67 {dimension_numbers = #tpu.dot_dimension_numbers<[1], [0], [0], [1], [0, 0, 1, 1], [], []>} : vector<288x36xbf16>, vector<36x128xbf16>, vector<288x128xf32> -> vector<288x128xf32>
    %c0_68 = arith.constant 0 : index
    %c0_69 = arith.constant 0 : index
    %59 = vector.load %arg4[%c0_68, %c0_69] : memref<288x128xf32, #tpu.memory_space<vmem>>, vector<288x128xf32>
    %60 = arith.addf %59, %58 : vector<288x128xf32>
    %c0_70 = arith.constant 0 : index
    %c0_71 = arith.constant 0 : index
    %61 = vector.load %arg4[%c0_70, %c0_71] : memref<288x128xf32, #tpu.memory_space<vmem>>, vector<288x128xf32>
    tpu.vector_store %arg4[%c0_70, %c0_71], %60 {strides = array<i32>} : memref<288x128xf32, #tpu.memory_space<vmem>>, vector<288x128xf32>,
    %c0_72 = arith.constant 0 : index
    %c38 = arith.constant 38 : index
    %c0_73 = arith.constant 0 : index
    %62 = vector.load %arg1[%c0_72, %c38, %c0_73] : memref<1x342x36xbf16, #tpu.memory_space<vmem>>, vector<1x288x36xbf16>
    %63 = vector.shape_cast %62 : vector<1x288x36xbf16> to vector<288x36xbf16>
    %c8 = arith.constant 8 : index
    %c0_74 = arith.constant 0 : index
    %c0_75 = arith.constant 0 : index
    %64 = vector.load %arg2[%c8, %c0_74, %c0_75] : memref<9x36x128xbf16, #tpu.memory_space<vmem>>, vector<1x36x128xbf16>
    %65 = vector.shape_cast %64 : vector<1x36x128xbf16> to vector<36x128xbf16>
    %cst_76 = arith.constant dense<0.000000e+00> : vector<288x128xf32>
    %66 = tpu.matmul %63, %65, %cst_76 {dimension_numbers = #tpu.dot_dimension_numbers<[1], [0], [0], [1], [0, 0, 1, 1], [], []>} : vector<288x36xbf16>, vector<36x128xbf16>, vector<288x128xf32> -> vector<288x128xf32>
    %c0_77 = arith.constant 0 : index
    %c0_78 = arith.constant 0 : index
    %67 = vector.load %arg4[%c0_77, %c0_78] : memref<288x128xf32, #tpu.memory_space<vmem>>, vector<288x128xf32>
    %68 = arith.addf %67, %66 : vector<288x128xf32>
    %c0_79 = arith.constant 0 : index
    %c0_80 = arith.constant 0 : index
    %69 = vector.load %arg4[%c0_79, %c0_80] : memref<288x128xf32, #tpu.memory_space<vmem>>, vector<288x128xf32>
    tpu.vector_store %arg4[%c0_79, %c0_80], %68 {strides = array<i32>} : memref<288x128xf32, #tpu.memory_space<vmem>>, vector<288x128xf32>,
    %c0_81 = arith.constant 0 : index
    %c0_82 = arith.constant 0 : index
    %70 = vector.load %arg4[%c0_81, %c0_82] : memref<288x128xf32, #tpu.memory_space<vmem>>, vector<288x128xf32>
    %cst_83 = arith.constant 0.000000e+00 : f32
    %71 = vector.broadcast %cst_83 : f32 to vector<288x128xf32>
    %72 = arith.maximumf %70, %71 : vector<288x128xf32>
    %73 = arith.truncf %72 : vector<288x128xf32> to vector<288x128xbf16>
    %c0_84 = arith.constant 0 : index
    %c0_85 = arith.constant 0 : index
    %c0_86 = arith.constant 0 : index
    %74 = vector.load %arg3[%c0_84, %c0_85, %c0_86] : memref<1x288x128xbf16, #tpu.memory_space<vmem>>, vector<1x288x128xbf16>
    %75 = vector.shape_cast %74 : vector<1x288x128xbf16> to vector<288x128xbf16>
    %76 = vector.shape_cast %73 : vector<288x128xbf16> to vector<1x288x128xbf16>
    tpu.vector_store %arg3[%c0_84, %c0_85, %c0_86], %76 {strides = array<i32>} : memref<1x288x128xbf16, #tpu.memory_space<vmem>>, vector<1x288x128xbf16>,
    return
  }
  func.func @transform_0(%arg0: i32) -> (i32, i32, i32) {
    %c0_i32 = arith.constant 0 : i32
    %c0_i32_0 = arith.constant 0 : i32
    %c0_i32_1 = arith.constant 0 : i32
    return %arg0, %c0_i32, %c0_i32_0 : i32, i32, i32
  }
  func.func @transform_1(%arg0: i32) -> (i32, i32, i32) {
    %c0_i32 = arith.constant 0 : i32
    %c0_i32_0 = arith.constant 0 : i32
    %c0_i32_1 = arith.constant 0 : i32
    %c0_i32_2 = arith.constant 0 : i32
    return %c0_i32, %c0_i32_0, %c0_i32_1 : i32, i32, i32
  }
  func.func @transform_2(%arg0: i32) -> (i32, i32, i32) {
    %c0_i32 = arith.constant 0 : i32
    %c0_i32_0 = arith.constant 0 : i32
    %c0_i32_1 = arith.constant 0 : i32
    return %arg0, %c0_i32, %c0_i32_0 : i32, i32, i32
  }
}

module attributes {stable_mosaic.version = 11 : i64} {
  func.func @_kan_conv_relu_kernel(%arg0: i32, %arg1: memref<1x342x72xbf16, #tpu.memory_space<vmem>>, %arg2: memref<9x72x128xbf16, #tpu.memory_space<vmem>>, %arg3: memref<1x288x128xf32, #tpu.memory_space<vmem>>, %arg4: memref<288x128xf32, #tpu.memory_space<vmem>>) attributes {dimension_semantics = [#tpu.dimension_semantics<parallel>], iteration_bounds = array<i64: 2>, scalar_prefetch = 0 : i64, scratch_operands = 1 : i64, tpu.core_type = #tpu.core_type<tc>, window_params = [{transform_indices = @transform_0, window_bounds = array<i64: 1, 342, 72>}, {pipeline_mode = #tpu.pipeline_mode<synchronous>, transform_indices = @transform_1, window_bounds = array<i64: 9, 72, 128>}, {transform_indices = @transform_2, window_bounds = array<i64: 1, 288, 128>}]} {
    %c0 = arith.constant 0 : index
    %c0_0 = arith.constant 0 : index
    %c0_1 = arith.constant 0 : index
    %0 = vector.load %arg1[%c0, %c0_0, %c0_1] : memref<1x342x72xbf16, #tpu.memory_space<vmem>>, vector<1x288x72xbf16>
    %1 = vector.shape_cast %0 : vector<1x288x72xbf16> to vector<288x72xbf16>
    %c0_2 = arith.constant 0 : index
    %c0_3 = arith.constant 0 : index
    %c0_4 = arith.constant 0 : index
    %2 = vector.load %arg2[%c0_2, %c0_3, %c0_4] : memref<9x72x128xbf16, #tpu.memory_space<vmem>>, vector<1x72x128xbf16>
    %3 = vector.shape_cast %2 : vector<1x72x128xbf16> to vector<72x128xbf16>
    %cst = arith.constant dense<0.000000e+00> : vector<288x128xf32>
    %4 = tpu.matmul %1, %3, %cst {dimension_numbers = #tpu.dot_dimension_numbers<[1], [0], [0], [1], [0, 0, 1, 1], [], []>} : vector<288x72xbf16>, vector<72x128xbf16>, vector<288x128xf32> -> vector<288x128xf32>
    %c0_5 = arith.constant 0 : index
    %c0_6 = arith.constant 0 : index
    %5 = vector.load %arg4[%c0_5, %c0_6] : memref<288x128xf32, #tpu.memory_space<vmem>>, vector<288x128xf32>
    tpu.vector_store %arg4[%c0_5, %c0_6], %4 {strides = array<i32>} : memref<288x128xf32, #tpu.memory_space<vmem>>, vector<288x128xf32>,
    %c0_7 = arith.constant 0 : index
    %c1 = arith.constant 1 : index
    %c0_8 = arith.constant 0 : index
    %6 = vector.load %arg1[%c0_7, %c1, %c0_8] : memref<1x342x72xbf16, #tpu.memory_space<vmem>>, vector<1x288x72xbf16>
    %7 = vector.shape_cast %6 : vector<1x288x72xbf16> to vector<288x72xbf16>
    %c1_9 = arith.constant 1 : index
    %c0_10 = arith.constant 0 : index
    %c0_11 = arith.constant 0 : index
    %8 = vector.load %arg2[%c1_9, %c0_10, %c0_11] : memref<9x72x128xbf16, #tpu.memory_space<vmem>>, vector<1x72x128xbf16>
    %9 = vector.shape_cast %8 : vector<1x72x128xbf16> to vector<72x128xbf16>
    %cst_12 = arith.constant dense<0.000000e+00> : vector<288x128xf32>
    %10 = tpu.matmul %7, %9, %cst_12 {dimension_numbers = #tpu.dot_dimension_numbers<[1], [0], [0], [1], [0, 0, 1, 1], [], []>} : vector<288x72xbf16>, vector<72x128xbf16>, vector<288x128xf32> -> vector<288x128xf32>
    %c0_13 = arith.constant 0 : index
    %c0_14 = arith.constant 0 : index
    %11 = vector.load %arg4[%c0_13, %c0_14] : memref<288x128xf32, #tpu.memory_space<vmem>>, vector<288x128xf32>
    %12 = arith.addf %11, %10 : vector<288x128xf32>
    %c0_15 = arith.constant 0 : index
    %c0_16 = arith.constant 0 : index
    %13 = vector.load %arg4[%c0_15, %c0_16] : memref<288x128xf32, #tpu.memory_space<vmem>>, vector<288x128xf32>
    tpu.vector_store %arg4[%c0_15, %c0_16], %12 {strides = array<i32>} : memref<288x128xf32, #tpu.memory_space<vmem>>, vector<288x128xf32>,
    %c0_17 = arith.constant 0 : index
    %c2 = arith.constant 2 : index
    %c0_18 = arith.constant 0 : index
    %14 = vector.load %arg1[%c0_17, %c2, %c0_18] : memref<1x342x72xbf16, #tpu.memory_space<vmem>>, vector<1x288x72xbf16>
    %15 = vector.shape_cast %14 : vector<1x288x72xbf16> to vector<288x72xbf16>
    %c2_19 = arith.constant 2 : index
    %c0_20 = arith.constant 0 : index
    %c0_21 = arith.constant 0 : index
    %16 = vector.load %arg2[%c2_19, %c0_20, %c0_21] : memref<9x72x128xbf16, #tpu.memory_space<vmem>>, vector<1x72x128xbf16>
    %17 = vector.shape_cast %16 : vector<1x72x128xbf16> to vector<72x128xbf16>
    %cst_22 = arith.constant dense<0.000000e+00> : vector<288x128xf32>
    %18 = tpu.matmul %15, %17, %cst_22 {dimension_numbers = #tpu.dot_dimension_numbers<[1], [0], [0], [1], [0, 0, 1, 1], [], []>} : vector<288x72xbf16>, vector<72x128xbf16>, vector<288x128xf32> -> vector<288x128xf32>
    %c0_23 = arith.constant 0 : index
    %c0_24 = arith.constant 0 : index
    %19 = vector.load %arg4[%c0_23, %c0_24] : memref<288x128xf32, #tpu.memory_space<vmem>>, vector<288x128xf32>
    %20 = arith.addf %19, %18 : vector<288x128xf32>
    %c0_25 = arith.constant 0 : index
    %c0_26 = arith.constant 0 : index
    %21 = vector.load %arg4[%c0_25, %c0_26] : memref<288x128xf32, #tpu.memory_space<vmem>>, vector<288x128xf32>
    tpu.vector_store %arg4[%c0_25, %c0_26], %20 {strides = array<i32>} : memref<288x128xf32, #tpu.memory_space<vmem>>, vector<288x128xf32>,
    %c0_27 = arith.constant 0 : index
    %c18 = arith.constant 18 : index
    %c0_28 = arith.constant 0 : index
    %22 = vector.load %arg1[%c0_27, %c18, %c0_28] : memref<1x342x72xbf16, #tpu.memory_space<vmem>>, vector<1x288x72xbf16>
    %23 = vector.shape_cast %22 : vector<1x288x72xbf16> to vector<288x72xbf16>
    %c3 = arith.constant 3 : index
    %c0_29 = arith.constant 0 : index
    %c0_30 = arith.constant 0 : index
    %24 = vector.load %arg2[%c3, %c0_29, %c0_30] : memref<9x72x128xbf16, #tpu.memory_space<vmem>>, vector<1x72x128xbf16>
    %25 = vector.shape_cast %24 : vector<1x72x128xbf16> to vector<72x128xbf16>
    %cst_31 = arith.constant dense<0.000000e+00> : vector<288x128xf32>
    %26 = tpu.matmul %23, %25, %cst_31 {dimension_numbers = #tpu.dot_dimension_numbers<[1], [0], [0], [1], [0, 0, 1, 1], [], []>} : vector<288x72xbf16>, vector<72x128xbf16>, vector<288x128xf32> -> vector<288x128xf32>
    %c0_32 = arith.constant 0 : index
    %c0_33 = arith.constant 0 : index
    %27 = vector.load %arg4[%c0_32, %c0_33] : memref<288x128xf32, #tpu.memory_space<vmem>>, vector<288x128xf32>
    %28 = arith.addf %27, %26 : vector<288x128xf32>
    %c0_34 = arith.constant 0 : index
    %c0_35 = arith.constant 0 : index
    %29 = vector.load %arg4[%c0_34, %c0_35] : memref<288x128xf32, #tpu.memory_space<vmem>>, vector<288x128xf32>
    tpu.vector_store %arg4[%c0_34, %c0_35], %28 {strides = array<i32>} : memref<288x128xf32, #tpu.memory_space<vmem>>, vector<288x128xf32>,
    %c0_36 = arith.constant 0 : index
    %c19 = arith.constant 19 : index
    %c0_37 = arith.constant 0 : index
    %30 = vector.load %arg1[%c0_36, %c19, %c0_37] : memref<1x342x72xbf16, #tpu.memory_space<vmem>>, vector<1x288x72xbf16>
    %31 = vector.shape_cast %30 : vector<1x288x72xbf16> to vector<288x72xbf16>
    %c4 = arith.constant 4 : index
    %c0_38 = arith.constant 0 : index
    %c0_39 = arith.constant 0 : index
    %32 = vector.load %arg2[%c4, %c0_38, %c0_39] : memref<9x72x128xbf16, #tpu.memory_space<vmem>>, vector<1x72x128xbf16>
    %33 = vector.shape_cast %32 : vector<1x72x128xbf16> to vector<72x128xbf16>
    %cst_40 = arith.constant dense<0.000000e+00> : vector<288x128xf32>
    %34 = tpu.matmul %31, %33, %cst_40 {dimension_numbers = #tpu.dot_dimension_numbers<[1], [0], [0], [1], [0, 0, 1, 1], [], []>} : vector<288x72xbf16>, vector<72x128xbf16>, vector<288x128xf32> -> vector<288x128xf32>
    %c0_41 = arith.constant 0 : index
    %c0_42 = arith.constant 0 : index
    %35 = vector.load %arg4[%c0_41, %c0_42] : memref<288x128xf32, #tpu.memory_space<vmem>>, vector<288x128xf32>
    %36 = arith.addf %35, %34 : vector<288x128xf32>
    %c0_43 = arith.constant 0 : index
    %c0_44 = arith.constant 0 : index
    %37 = vector.load %arg4[%c0_43, %c0_44] : memref<288x128xf32, #tpu.memory_space<vmem>>, vector<288x128xf32>
    tpu.vector_store %arg4[%c0_43, %c0_44], %36 {strides = array<i32>} : memref<288x128xf32, #tpu.memory_space<vmem>>, vector<288x128xf32>,
    %c0_45 = arith.constant 0 : index
    %c20 = arith.constant 20 : index
    %c0_46 = arith.constant 0 : index
    %38 = vector.load %arg1[%c0_45, %c20, %c0_46] : memref<1x342x72xbf16, #tpu.memory_space<vmem>>, vector<1x288x72xbf16>
    %39 = vector.shape_cast %38 : vector<1x288x72xbf16> to vector<288x72xbf16>
    %c5 = arith.constant 5 : index
    %c0_47 = arith.constant 0 : index
    %c0_48 = arith.constant 0 : index
    %40 = vector.load %arg2[%c5, %c0_47, %c0_48] : memref<9x72x128xbf16, #tpu.memory_space<vmem>>, vector<1x72x128xbf16>
    %41 = vector.shape_cast %40 : vector<1x72x128xbf16> to vector<72x128xbf16>
    %cst_49 = arith.constant dense<0.000000e+00> : vector<288x128xf32>
    %42 = tpu.matmul %39, %41, %cst_49 {dimension_numbers = #tpu.dot_dimension_numbers<[1], [0], [0], [1], [0, 0, 1, 1], [], []>} : vector<288x72xbf16>, vector<72x128xbf16>, vector<288x128xf32> -> vector<288x128xf32>
    %c0_50 = arith.constant 0 : index
    %c0_51 = arith.constant 0 : index
    %43 = vector.load %arg4[%c0_50, %c0_51] : memref<288x128xf32, #tpu.memory_space<vmem>>, vector<288x128xf32>
    %44 = arith.addf %43, %42 : vector<288x128xf32>
    %c0_52 = arith.constant 0 : index
    %c0_53 = arith.constant 0 : index
    %45 = vector.load %arg4[%c0_52, %c0_53] : memref<288x128xf32, #tpu.memory_space<vmem>>, vector<288x128xf32>
    tpu.vector_store %arg4[%c0_52, %c0_53], %44 {strides = array<i32>} : memref<288x128xf32, #tpu.memory_space<vmem>>, vector<288x128xf32>,
    %c0_54 = arith.constant 0 : index
    %c36 = arith.constant 36 : index
    %c0_55 = arith.constant 0 : index
    %46 = vector.load %arg1[%c0_54, %c36, %c0_55] : memref<1x342x72xbf16, #tpu.memory_space<vmem>>, vector<1x288x72xbf16>
    %47 = vector.shape_cast %46 : vector<1x288x72xbf16> to vector<288x72xbf16>
    %c6 = arith.constant 6 : index
    %c0_56 = arith.constant 0 : index
    %c0_57 = arith.constant 0 : index
    %48 = vector.load %arg2[%c6, %c0_56, %c0_57] : memref<9x72x128xbf16, #tpu.memory_space<vmem>>, vector<1x72x128xbf16>
    %49 = vector.shape_cast %48 : vector<1x72x128xbf16> to vector<72x128xbf16>
    %cst_58 = arith.constant dense<0.000000e+00> : vector<288x128xf32>
    %50 = tpu.matmul %47, %49, %cst_58 {dimension_numbers = #tpu.dot_dimension_numbers<[1], [0], [0], [1], [0, 0, 1, 1], [], []>} : vector<288x72xbf16>, vector<72x128xbf16>, vector<288x128xf32> -> vector<288x128xf32>
    %c0_59 = arith.constant 0 : index
    %c0_60 = arith.constant 0 : index
    %51 = vector.load %arg4[%c0_59, %c0_60] : memref<288x128xf32, #tpu.memory_space<vmem>>, vector<288x128xf32>
    %52 = arith.addf %51, %50 : vector<288x128xf32>
    %c0_61 = arith.constant 0 : index
    %c0_62 = arith.constant 0 : index
    %53 = vector.load %arg4[%c0_61, %c0_62] : memref<288x128xf32, #tpu.memory_space<vmem>>, vector<288x128xf32>
    tpu.vector_store %arg4[%c0_61, %c0_62], %52 {strides = array<i32>} : memref<288x128xf32, #tpu.memory_space<vmem>>, vector<288x128xf32>,
    %c0_63 = arith.constant 0 : index
    %c37 = arith.constant 37 : index
    %c0_64 = arith.constant 0 : index
    %54 = vector.load %arg1[%c0_63, %c37, %c0_64] : memref<1x342x72xbf16, #tpu.memory_space<vmem>>, vector<1x288x72xbf16>
    %55 = vector.shape_cast %54 : vector<1x288x72xbf16> to vector<288x72xbf16>
    %c7 = arith.constant 7 : index
    %c0_65 = arith.constant 0 : index
    %c0_66 = arith.constant 0 : index
    %56 = vector.load %arg2[%c7, %c0_65, %c0_66] : memref<9x72x128xbf16, #tpu.memory_space<vmem>>, vector<1x72x128xbf16>
    %57 = vector.shape_cast %56 : vector<1x72x128xbf16> to vector<72x128xbf16>
    %cst_67 = arith.constant dense<0.000000e+00> : vector<288x128xf32>
    %58 = tpu.matmul %55, %57, %cst_67 {dimension_numbers = #tpu.dot_dimension_numbers<[1], [0], [0], [1], [0, 0, 1, 1], [], []>} : vector<288x72xbf16>, vector<72x128xbf16>, vector<288x128xf32> -> vector<288x128xf32>
    %c0_68 = arith.constant 0 : index
    %c0_69 = arith.constant 0 : index
    %59 = vector.load %arg4[%c0_68, %c0_69] : memref<288x128xf32, #tpu.memory_space<vmem>>, vector<288x128xf32>
    %60 = arith.addf %59, %58 : vector<288x128xf32>
    %c0_70 = arith.constant 0 : index
    %c0_71 = arith.constant 0 : index
    %61 = vector.load %arg4[%c0_70, %c0_71] : memref<288x128xf32, #tpu.memory_space<vmem>>, vector<288x128xf32>
    tpu.vector_store %arg4[%c0_70, %c0_71], %60 {strides = array<i32>} : memref<288x128xf32, #tpu.memory_space<vmem>>, vector<288x128xf32>,
    %c0_72 = arith.constant 0 : index
    %c38 = arith.constant 38 : index
    %c0_73 = arith.constant 0 : index
    %62 = vector.load %arg1[%c0_72, %c38, %c0_73] : memref<1x342x72xbf16, #tpu.memory_space<vmem>>, vector<1x288x72xbf16>
    %63 = vector.shape_cast %62 : vector<1x288x72xbf16> to vector<288x72xbf16>
    %c8 = arith.constant 8 : index
    %c0_74 = arith.constant 0 : index
    %c0_75 = arith.constant 0 : index
    %64 = vector.load %arg2[%c8, %c0_74, %c0_75] : memref<9x72x128xbf16, #tpu.memory_space<vmem>>, vector<1x72x128xbf16>
    %65 = vector.shape_cast %64 : vector<1x72x128xbf16> to vector<72x128xbf16>
    %cst_76 = arith.constant dense<0.000000e+00> : vector<288x128xf32>
    %66 = tpu.matmul %63, %65, %cst_76 {dimension_numbers = #tpu.dot_dimension_numbers<[1], [0], [0], [1], [0, 0, 1, 1], [], []>} : vector<288x72xbf16>, vector<72x128xbf16>, vector<288x128xf32> -> vector<288x128xf32>
    %c0_77 = arith.constant 0 : index
    %c0_78 = arith.constant 0 : index
    %67 = vector.load %arg4[%c0_77, %c0_78] : memref<288x128xf32, #tpu.memory_space<vmem>>, vector<288x128xf32>
    %68 = arith.addf %67, %66 : vector<288x128xf32>
    %c0_79 = arith.constant 0 : index
    %c0_80 = arith.constant 0 : index
    %69 = vector.load %arg4[%c0_79, %c0_80] : memref<288x128xf32, #tpu.memory_space<vmem>>, vector<288x128xf32>
    tpu.vector_store %arg4[%c0_79, %c0_80], %68 {strides = array<i32>} : memref<288x128xf32, #tpu.memory_space<vmem>>, vector<288x128xf32>,
    %c0_81 = arith.constant 0 : index
    %c0_82 = arith.constant 0 : index
    %70 = vector.load %arg4[%c0_81, %c0_82] : memref<288x128xf32, #tpu.memory_space<vmem>>, vector<288x128xf32>
    %cst_83 = arith.constant 0.000000e+00 : f32
    %71 = vector.broadcast %cst_83 : f32 to vector<288x128xf32>
    %72 = arith.maximumf %70, %71 : vector<288x128xf32>
    %c0_84 = arith.constant 0 : index
    %c0_85 = arith.constant 0 : index
    %c0_86 = arith.constant 0 : index
    %73 = vector.load %arg3[%c0_84, %c0_85, %c0_86] : memref<1x288x128xf32, #tpu.memory_space<vmem>>, vector<1x288x128xf32>
    %74 = vector.shape_cast %73 : vector<1x288x128xf32> to vector<288x128xf32>
    %75 = vector.shape_cast %72 : vector<288x128xf32> to vector<1x288x128xf32>
    tpu.vector_store %arg3[%c0_84, %c0_85, %c0_86], %75 {strides = array<i32>} : memref<1x288x128xf32, #tpu.memory_space<vmem>>, vector<1x288x128xf32>,
    return
  }
  func.func @transform_0(%arg0: i32) -> (i32, i32, i32) {
    %c0_i32 = arith.constant 0 : i32
    %c0_i32_0 = arith.constant 0 : i32
    %c0_i32_1 = arith.constant 0 : i32
    return %arg0, %c0_i32, %c0_i32_0 : i32, i32, i32
  }
  func.func @transform_1(%arg0: i32) -> (i32, i32, i32) {
    %c0_i32 = arith.constant 0 : i32
    %c0_i32_0 = arith.constant 0 : i32
    %c0_i32_1 = arith.constant 0 : i32
    %c0_i32_2 = arith.constant 0 : i32
    return %c0_i32, %c0_i32_0, %c0_i32_1 : i32, i32, i32
  }
  func.func @transform_2(%arg0: i32) -> (i32, i32, i32) {
    %c0_i32 = arith.constant 0 : i32
    %c0_i32_0 = arith.constant 0 : i32
    %c0_i32_1 = arith.constant 0 : i32
    return %arg0, %c0_i32, %c0_i32_0 : i32, i32, i32
  }
}

</mosaic_0001>

<bundles_post_ra>
// kernel: doble_conv_forward.2
= control target key start
LH: loop header
LB: loop body
LE: loop exit
PB: predicated region body
PF: predicated region fallthrough
CT: control target
= control target key end

     0   :  { %s5943_s9 = smov 0   ;;  %s6988_s0 = inlined_call_operand.vmem [shape: bf16[2,342,36], index: 0, kind: input, shape index: {}]   ;;  %s6989_s1 = inlined_call_operand.vmem [shape: bf16[9,36,128], index: 1, kind: input, shape index: {}]   ;;  %s6990_s2 = inlined_call_operand.vmem [shape: bf16[2,288,128], index: 2, kind: output, shape index: {}]  }
   0x1 LB: > { %s4683_s10 = sadd.s32 4294967295, %s5926_s9   ;;  %p4687_p0 = scmp.ge.s32.totalorder %s5926_s9, 1  ;;  %s5926_s9 = sphi %s5943_s9, %s12_s9  }
   0x2   : > { %p112_p1 = scmp.lt.s32.totalorder %s5926_s9, 3 }
   0x4   : > { %p113_p2 = pnand %p4687_p0, %p112_p1 }
   0x6   : > { %116 = sbr.rel (%p113_p2) target bundleno = 819 (0x333), region = 28 }
   0xb   : > { %v185_v0 = vld [vmem:[%s6989_s1 + $0x10] sm:$0x3]  ;;  %p134_p3 = scmp.lt.s32.totalorder %s4683_s10, 1  ;;  %v4895_v2 = vld [vmem:[%s6989_s1 + $0x38] sm:$0x3]  ;;  %vm346_vm0 = vcmask 1041408  }
   0xc   : > { %v285_v1 = vunpack.c.l.b16 %v185_v0  ;;  %v4792_v3 = vld [vmem:[%s6989_s1 + $0x24] sm:$0x3]  ;;  %v5101_v4 = vld [vmem:[%s6989_s1 + $0x60] sm:$0x3]  ;;  %v1232_v6 = vunpack.c.l.b16 %v4895_v2  ;;  %v5633_v10 = vld [vmem:[%s6989_s1 + $0x8] sm:$0xff]  ;;  %vm291_vm1 = vcmask 293888  }
   0xd   : > { %s7008_s10 = smov (!%p134_p3, %s4683_s10), 1  ;;  %v779_v8 = vunpack.c.l.b16 %v4792_v3  ;;  %v2270_v9 = vunpack.c.l.b16 %v5101_v4  ;;  %v5632_v14 = vld [vmem:[%s6989_s1] sm:$0xff]  ;;  %v5673_v21 = vld [vmem:[%s6989_s1 + $0x30] sm:$0xff]  ;;  %v4998_v24 = vld [vmem:[%s6989_s1 + $0x4c] sm:$0x3]  ;;  %vm1185_vm2 = vcmask 1046528  }
   0xe   : > { %v288_v5 = vpack.c.b16 %v285_v1, %v285_v1  ;;  %s5910_s21 = smul.u32 172, %s7008_s10  ;;  %v1235_v11 = vpack.c.b16 %v1232_v6, %v1232_v6  ;;  %v5653_v22 = vld [vmem:[%s6989_s1 + $0x1c] sm:$0xff]  ;;  %v1684_v26 = vunpack.c.l.b16 %v4998_v24  ;;  %v5693_v33 = vld [vmem:[%s6989_s1 + $0x44] sm:$0xff]  ;;  %v5652_v35 = vld [vmem:[%s6989_s1 + $0x14] sm:$0xff]  ;;  %vm621_vm3 = vsmask.f32 7424 }
   0xf   : > { %v782_v12 = vpack.c.b16 %v779_v8, %v779_v8  ;;  %v2273_v13 = vpack.c.b16 %v2270_v9, %v2270_v9  ;;  %v5713_v25 = vld [vmem:[%s6989_s1 + $0x58] sm:$0xff]  ;;  %v5672_v34 = vld [vmem:[%s6989_s1 + $0x28] sm:$0xff]  ;;  %v5712_v40 = vld [vmem:[%s6989_s1 + $0x50] sm:$0xff]  ;;  %vm2090_vm4 = vsmask.f32 6400  ;;  %vm2676_vm6 = vcmask 1045504  }
  0x10   : > { %v348_v7 = vsel %vm346_vm0, %v288_v5, 0  ;;  %s5976_s26 = scalar_lea.vmem %s6988_s0, %s5910_s21  ;;  %v1293_v15 = vsel %vm346_vm0, %v1235_v11, 0  ;;  %v1687_v27 = vpack.c.b16 %v1684_v26, %v1684_v26  ;;  %v5692_v41 = vld [vmem:[%s6989_s1 + $0x3c] sm:$0xff]  ;;  %v5307_v51 = vld [vmem:[%s6989_s1 + $0x88] sm:$0x3]  ;;  %vm4167_vm7 = vcmask 1044480  }
  0x11   : > { %5901 = vmatpush.bf16.msra.mxu1 %v348_v7  ;;  %5902 = vmatpush.bf16.msra.mxu2 %v348_v7  ;;  %v5619_v16 = vld [vmem:[%s5976_s26 + $0x28] sm:$0xff]  ;;  %v5624_v17 = vld [vmem:[%s5976_s26 + $0x50] sm:$0xff]  ;;  %v840_v18 = vsel %vm346_vm0, %v782_v12, 0  ;;  %v2331_v19 = vsel %vm346_vm0, %v2273_v13, 0  ;;  %v5614_v20 = vld [vmem:[%s5976_s26] sm:$0xff]  ;;  %v3175_v53 = vunpack.c.l.b16 %v5307_v51  ;;  %s5911_s18 = smul.u32 144, %s7008_s10 }
  0x12   : > { %355 = vmatpush.bf16.msra.mxu0 %v348_v7  ;;  %5903 = vmatpush.bf16.msra.mxu3 %v348_v7  ;;  %v5629_v23 = vld [vmem:[%s5976_s26 + $0x78] sm:$0xff]  ;;  %v1745_v28 = vsel %vm346_vm0, %v1687_v27, 0  ;;  %v5620_v29 = vld [vmem:[%s5976_s26 + $0x30] sm:$0xff]  ;;  %v5615_v31 = vld [vmem:[%s5976_s26 + $0x8] sm:$0xff]  ;;  %vm3581_vm5 = vsmask.f32 5376 }
  0x13   : > { %v5625_v30 = vld [vmem:[%s5976_s26 + $0x58] sm:$0xff]  ;;  %v5630_v32 = vld [vmem:[%s5976_s26 + $0x80] sm:$0xff]  ;;  %v5616_v38 = vld [vmem:[%s5976_s26 + $0x10] sm:$0xff]  ;;  %v3178_v59 = vpack.c.b16 %v3175_v53, %v3175_v53  ;;  %s6792_s10 = scalar_lea.vmem %s6990_s2, %s5911_s18 }
  0x14   : > { %v5621_v36 = vld [vmem:[%s5976_s26 + $0x38] sm:$0xff]  ;;  %v5626_v37 = vld [vmem:[%s5976_s26 + $0x60] sm:$0xff]  ;;  %v5631_v39 = vld [vmem:[%s5976_s26 + $0x88] sm:$0xff] }
  0x15   : > { %5904 = vmatpush.bf16.msra.mxu1 %v5633_v10  ;;  %5905 = vmatpush.bf16.msra.mxu2 %v5633_v10  ;;  %v5001_v42 = vld [vmem:[%s5976_s26 + $0x8] sm:$0xe]  ;;  %v5674_v43 = vld [vmem:[%s5976_s26 + $0x8] sm:$0xf0]  ;;  %v5675_v44 = vld [vmem:[%s5976_s26 + $0x10] sm:$0xff]  ;;  %v3236_v63 = vsel %vm346_vm0, %v3178_v59, 0 }
  0x16   : > { %356 = vmatpush.bf16.msra.mxu0 %v5633_v10  ;;  %5906 = vmatpush.bf16.msra.mxu3 %v5633_v10  ;;  %v5002_v45 = vor.u32 %v5674_v43, %v5001_v42  ;;  %v5622_v46 = vld [vmem:[%s5976_s26 + $0x40] sm:$0xff]  ;;  %v5627_v47 = vld [vmem:[%s5976_s26 + $0x68] sm:$0xff]  ;;  %v5617_v48 = vld [vmem:[%s5976_s26 + $0x18] sm:$0xff]  ;;  %v1639_v50 = vrot.slane %v5675_v44, 1 }
  0x17   : > { %v5410_v54 = vld [vmem:[%s6989_s1 + $0x9c] sm:$0x3]  ;;  %v5204_v55 = vld [vmem:[%s6989_s1 + $0x74] sm:$0x3]  ;;  %v5513_v58 = vld [vmem:[%s6989_s1 + $0xb0] sm:$0x3] }
  0x18   : > { %v1638_v49 = vrot.slane %v5002_v45, 1  ;;  %v3761_v56 = vunpack.c.l.b16 %v5410_v54  ;;  %v2723_v57 = vunpack.c.l.b16 %v5204_v55  ;;  %v4214_v60 = vunpack.c.l.b16 %v5513_v58  ;;  %v5676_v4 = vld [vmem:[%s5976_s26 + $0x18] sm:$0xff]  ;;  %v5104_v5 = vld [vmem:[%s5976_s26 + $0x8] sm:$0xe]  ;;  %v5694_v6 = vld [vmem:[%s5976_s26 + $0x8] sm:$0xf0] }
  0x19   : > { %5907 = vmatpush.bf16.msra.mxu1 %v5632_v14  ;;  %5908 = vmatpush.bf16.msra.mxu2 %v5632_v14  ;;  %v5623_v7 = vld [vmem:[%s5976_s26 + $0x48] sm:$0xff]  ;;  %v5628_v8 = vld [vmem:[%s5976_s26 + $0x70] sm:$0xff]  ;;  %v5618_v9 = vld [vmem:[%s5976_s26 + $0x20] sm:$0xff]  ;;  %v1641_v11 = vrot.slane %v5676_v4, 1  ;;  %v5105_v13 = vor.u32 %v5694_v6, %v5104_v5 }
  0x1a   : > { %357 = vmatpush.bf16.msra.mxu0 %v5632_v14  ;;  %5909 = vmatpush.bf16.msra.mxu3 %v5632_v14  ;;  %v1640_v52 = vsel %vm1185_vm2, %v1638_v49, %v1639_v50  ;;  %v3764_v61 = vpack.c.b16 %v3761_v56, %v3761_v56  ;;  %v2726_v62 = vpack.c.b16 %v2723_v57, %v2723_v57  ;;  %v5634_v10 = vld [vmem:[%s5976_s26] sm:$0xff]  ;;  %v5695_v12 = vld [vmem:[%s5976_s26 + $0x10] sm:$0xff]  ;;  %v5635_v14 = vld [vmem:[%s5976_s26 + $0x8] sm:$0xff] }
  0x1b   : > { %v4217_v0 = vpack.c.b16 %v4214_v60, %v4214_v60  ;;  %v5655_v26 = vld [vmem:[%s5976_s26 + $0x8] sm:$0xff]  ;;  %v5696_v43 = vld [vmem:[%s5976_s26 + $0x18] sm:$0xff]  ;;  %v5636_v44 = vld [vmem:[%s5976_s26 + $0x10] sm:$0xff] }
  0x1c   : > { %4775 = vmatmul.msk.bf16.vlgmr.msra.gmra.mxu1 %vm291_vm1, %v5619_v16  ;;  %4780 = vmatmul.msk.bf16.vlgmr.msra.gmra.mxu2 %vm291_vm1, %v5624_v17  ;;  %v3822_v1 = vsel %vm346_vm0, %v3764_v61, 0  ;;  %v2784_v2 = vsel %vm346_vm0, %v2726_v62, 0  ;;  %v4898_v16 = vld [vmem:[%s5976_s26] sm:$0xe]  ;;  %v1642_v17 = vsel %vm1185_vm2, %v1639_v50, %v1641_v11  ;;  %v638_v49 = vshll.u32 %v5636_v44, 16  ;;  %v5656_v50 = vld [vmem:[%s5976_s26 + $0x10] sm:$0xff] }
  0x1d   : > { %1300 = vmatpush.bf16.msrb.mxu2 %v1293_v15  ;;  %847 = vmatpush.bf16.msrb.mxu1 %v840_v18  ;;  %v4275_v3 = vsel %vm346_vm0, %v4217_v0, 0  ;;  %v625_v15 = vshll.u32 %v5634_v10, 16  ;;  %v5654_v18 = vld [vmem:[%s5976_s26] sm:$0xf0]  ;;  %v1189_v55 = vrot.slane %v5656_v50, 1  ;;  %v5678_v56 = vld [vmem:[%s5976_s26 + $0x28] sm:$0xff] }
  0x1e   : > { %2338 = vmatpush.bf16.msrb.mxu0 %v2331_v19  ;;  %4785 = vmatmul.msk.bf16.vlgmr.msra.gmra.mxu3 %vm291_vm1, %v5629_v23  ;;  %v2092_v19 = vshrl.u32 %v5105_v13, 16  ;;  %v623_v23 = vshrl.u32 %v5634_v10, 16  ;;  %v4899_v27 = vor.u32 %v5654_v18, %v4898_v16  ;;  %v640_v54 = vrot.slane %v638_v49, 1  ;;  %v5697_v62 = vld [vmem:[%s5976_s26 + $0x20] sm:$0xff]  ;;  %v5657_v5 = vld [vmem:[%s5976_s26 + $0x18] sm:$0xff] }
  0x1f   : > { %4770 = vmatmul.msk.bf16.vlgmr.msra.gmra.mxu0 %vm291_vm1, %v5614_v20  ;;  %1752 = vmatpush.bf16.msrb.mxu3 %v1745_v28  ;;  %v2095_v20 = vshll.u32 %v5105_v13, 16  ;;  %v627_v24 = vrot.slane %v625_v15, 1  ;;  %v1645_v60 = vrot.slane %v5678_v56, 1  ;;  %v1191_v10 = vrot.slane %v5657_v5, 1  ;;  %v5638_v18 = vld [vmem:[%s5976_s26 + $0x20] sm:$0xff]  ;;  %v5773_v5 = vld [vmem:[%s6989_s1 + $0x94] sm:$0xff] }
  0x20   : > { %v2094_v28 = vrot.slane %v2092_v19, 1 }
  0x21   : > { %1301 = vmatpush.bf16.msrb.mxu2 %v5673_v21  ;;  %848 = vmatpush.bf16.msrb.mxu1 %v5653_v22  ;;  %v2100_v21 = vshrl.u32 %v5695_v12, 16  ;;  %v2103_v22 = vshll.u32 %v5695_v12, 16 }
  0x22   : > { %2339 = vmatpush.bf16.msrb.mxu0 %v5713_v25  ;;  %v630_v25 = vshll.u32 %v5635_v14, 16 }
  0x23   : > { %1753 = vmatpush.bf16.msrb.mxu3 %v5693_v33 }
  0x24   : > { %v632_v33 = vrot.slane %v630_v25, 1 }
  0x25   : > { %1302 = vmatpush.bf16.msrb.mxu2 %v5672_v34  ;;  %849 = vmatpush.bf16.msrb.mxu1 %v5652_v35  ;;  %v1186_v34 = vrot.slane %v4899_v27, 1  ;;  %v1187_v35 = vrot.slane %v5655_v26, 1 }
  0x26   : > { %2340 = vmatpush.bf16.msrb.mxu0 %v5712_v40 }
  0x27   : > { %1754 = vmatpush.bf16.msrb.mxu3 %v5692_v41  ;;  %v1188_v40 = vsel %vm1185_vm2, %v1186_v34, %v1187_v35  ;;  %v1190_v59 = vsel %vm1185_vm2, %v1187_v35, %v1189_v55 }
  0x29   : > { %3243 = vmatpush.bf16.msra.mxu2 %v3236_v63  ;;  %2791 = vmatpush.bf16.msra.mxu1 %v2784_v2  ;;  %v5637_v63 = vld [vmem:[%s5976_s26 + $0x18] sm:$0xff]  ;;  %v2121_v2 = vshll.u32 %v5697_v62, 16 }
  0x2a   : > { %4282 = vmatpush.bf16.msra.mxu0 %v4275_v3  ;;  %v642_v3 = vshrl.u32 %v5636_v44, 16  ;;  %v646_v4 = vshll.u32 %v5637_v63, 16 }
  0x2b   : > { %3829 = vmatpush.bf16.msra.mxu3 %v3822_v1  ;;  %v2118_v1 = vshrl.u32 %v5697_v62, 16 }
  0x2c   : > { %4776 = vmatmul.msk.bf16.gmra.mxu1 %vm291_vm1, %v5620_v29  ;;  %4781 = vmatmul.msk.bf16.gmra.mxu2 %vm291_vm1, %v5625_v30  ;;  %v2097_v29 = vrot.slane %v2095_v20, 2  ;;  %v2102_v30 = vrot.slane %v2100_v21, 1 }
  0x2d   : > { %v2120_v6 = vrot.slane %v2118_v1, 1 }
  0x2e   : > { %4786 = vmatmul.msk.bf16.gmra.mxu3 %vm291_vm1, %v5630_v32  ;;  %v628_v32 = vor.u32 %v627_v24, %v623_v23  ;;  %v654_v23 = vshll.u32 %v5638_v18, 16  ;;  %v5658_v24 = vld [vmem:[%s5976_s26 + $0x20] sm:$0xff] }
  0x2f   : > { %4771 = vmatmul.msk.bf16.gmra.mxu0 %vm291_vm1, %v5615_v31  ;;  %v2105_v31 = vrot.slane %v2103_v22, 2  ;;  %v650_v22 = vshrl.u32 %v5637_v63, 16  ;;  %3830 = vmatpush.bf16.msra.mxu3 %v5773_v5 }
  0x3c   : > { %4777 = vmatmul.msk.bf16.gmra.mxu1 %vm291_vm1, %v5621_v36  ;;  %4782 = vmatmul.msk.bf16.gmra.mxu2 %vm291_vm1, %v5626_v37  ;;  %v5677_v36 = vld [vmem:[%s5976_s26 + $0x20] sm:$0xff]  ;;  %v2098_v37 = vor.u32 %v2097_v29, %v2094_v28  ;;  %v656_v28 = vrot.slane %v654_v23, 1  ;;  %v1193_v29 = vrot.slane %v5658_v24, 1 }
  0x3d   : > { %v1643_v41 = vrot.slane %v5677_v36, 1 }
  0x3e   : > { %4787 = vmatmul.msk.bf16.gmra.mxu3 %vm291_vm1, %v5631_v39  ;;  %v633_v39 = vsel %vm621_vm3, %v628_v32, %v632_v33  ;;  %v1194_v34 = vsel %vm1185_vm2, %v1191_v10, %v1193_v29 }
  0x3f   : > { %4772 = vmatmul.msk.bf16.gmra.mxu0 %vm291_vm1, %v5616_v38  ;;  %v2106_v38 = vor.u32 %v2105_v31, %v2102_v30  ;;  %v1644_v45 = vsel %vm1185_vm2, %v1641_v11, %v1643_v41  ;;  %v1646_v0 = vsel %vm1185_vm2, %v1643_v41, %v1645_v60  ;;  %v5679_v11 = vld [vmem:[%s5976_s26 + $0x30] sm:$0xff]  ;;  %v5680_v30 = vld [vmem:[%s5976_s26 + $0x38] sm:$0xff] }
  0x40   : > { %v1647_v15 = vrot.slane %v5679_v11, 1  ;;  %v1649_v35 = vrot.slane %v5680_v30, 1 }
  0x41   : > { %v2107_v42 = vsel %vm2090_vm4, %v2098_v37, %v2106_v38 }
  0x42   : > { %v1648_v19 = vsel %vm1185_vm2, %v1645_v60, %v1647_v15 }
  0x4c   : > { %4778 = vmatmul.msk.bf16.gmra.mxu1 %vm291_vm1, %v5622_v46  ;;  %4783 = vmatmul.msk.bf16.gmra.mxu2 %vm291_vm1, %v5627_v47  ;;  %v2109_v46 = vshrl.u32 %v5696_v43, 16  ;;  %v2112_v47 = vshll.u32 %v5696_v43, 16 }
  0x4e   : > { %5079 = vmatmul.msk.bf16.vlgmr.msrb.gmra.mxu3 %vm291_vm1, %v1640_v52  ;;  %v2111_v51 = vrot.slane %v2109_v46, 1  ;;  %v2114_v52 = vrot.slane %v2112_v47, 2  ;;  %v5659_v47 = vld [vmem:[%s5976_s26 + $0x28] sm:$0xff] }
  0x4f   : > { %4773 = vmatmul.msk.bf16.gmra.mxu0 %vm291_vm1, %v5617_v48  ;;  %v634_v48 = vshrl.u32 %v5635_v14, 16  ;;  %v1192_v14 = vsel %vm1185_vm2, %v1189_v55, %v1191_v10  ;;  %v5681_v55 = vld [vmem:[%s5976_s26 + $0x40] sm:$0xff] }
  0x50   : > { %v2115_v57 = vor.u32 %v2114_v52, %v2111_v51 }
  0x51   : > { %v636_v53 = vor.u32 %v634_v48, %v632_v33 }
  0x52   : > { %v2116_v61 = vsel %vm2090_vm4, %v2106_v38, %v2115_v57  ;;  %v5699_v38 = vld [vmem:[%s5976_s26 + $0x30] sm:$0xff] }
  0x53   : > { %v641_v58 = vsel %vm621_vm3, %v636_v53, %v640_v54  ;;  %v2136_v41 = vshrl.u32 %v5699_v38, 16 }
  0x55   : > { %v2138_v49 = vrot.slane %v2136_v41, 1 }
  0x5c   : > { %4779 = vmatmul.msk.bf16.gmra.mxu1 %vm291_vm1, %v5623_v7  ;;  %4784 = vmatmul.msk.bf16.gmra.mxu2 %vm291_vm1, %v5628_v8  ;;  %v2123_v7 = vrot.slane %v2121_v2, 2  ;;  %v644_v8 = vor.u32 %v642_v3, %v640_v54  ;;  %v1195_v54 = vrot.slane %v5659_v47, 1  ;;  %v5753_v2 = vld [vmem:[%s6989_s1 + $0x80] sm:$0xff]  ;;  %v5640_v3 = vld [vmem:[%s5976_s26 + $0x30] sm:$0xff] }
  0x5d   : > { %3244 = vmatpush.bf16.msra.mxu2 %v5753_v2  ;;  %v674_v41 = vshrl.u32 %v5640_v3, 16 }
  0x5e   : > { %5080 = vmatmul.msk.bf16.gmra.mxu3 %vm291_vm1, %v1642_v17  ;;  %v2124_v12 = vor.u32 %v2123_v7, %v2120_v6  ;;  %v5698_v17 = vld [vmem:[%s5976_s26 + $0x28] sm:$0xff]  ;;  %v1196_v60 = vsel %vm1185_vm2, %v1193_v29, %v1195_v54 }
  0x5f   : > { %4774 = vmatmul.msk.bf16.gmra.mxu0 %vm291_vm1, %v5618_v9  ;;  %v648_v9 = vrot.slane %v646_v4, 1  ;;  %v2127_v20 = vshrl.u32 %v5698_v17, 16  ;;  %v2130_v21 = vshll.u32 %v5698_v17, 16  ;;  %v5793_v17 = vld [vmem:[%s6989_s1 + $0xa8] sm:$0xff] }
  0x60   : > { %v2125_v16 = vsel %vm2090_vm4, %v2115_v57, %v2124_v12  ;;  %4283 = vmatpush.bf16.msra.mxu0 %v5793_v17  ;;  %v5662_v17 = vld [vmem:[%s5976_s26 + $0x40] sm:$0xff] }
  0x61   : > { %v649_v13 = vsel %vm621_vm3, %v644_v8, %v648_v9  ;;  %v2129_v25 = vrot.slane %v2127_v20, 1  ;;  %v2132_v26 = vrot.slane %v2130_v21, 2  ;;  %v652_v27 = vor.u32 %v650_v22, %v648_v9  ;;  %v5733_v9 = vld [vmem:[%s6989_s1 + $0x6c] sm:$0xff] }
  0x62   : > { %2792 = vmatpush.bf16.msra.mxu1 %v5733_v9  ;;  %v5682_v22 = vld [vmem:[%s5976_s26 + $0x48] sm:$0xff] }
  0x63   : > { %v2133_v31 = vor.u32 %v2132_v26, %v2129_v25  ;;  %v657_v33 = vsel %vm621_vm3, %v652_v27, %v656_v28 }
  0x65   : > { %v2134_v37 = vsel %vm2090_vm4, %v2124_v12, %v2133_v31  ;;  %v670_v12 = vshll.u32 %v5640_v3, 16 }
  0x67   : > { %v672_v20 = vrot.slane %v670_v12, 1 }
  0x6c   : > { %4873 = vmatmul.msk.bf16.vlgmr.msrb.gmra.mxu1 %vm291_vm1, %v633_v39  ;;  %4976 = vmatmul.msk.bf16.vlgmr.msrb.gmra.mxu2 %vm291_vm1, %v1188_v40  ;;  %v5639_v39 = vld [vmem:[%s5976_s26 + $0x28] sm:$0xff]  ;;  %v1650_v40 = vsel %vm1185_vm2, %v1647_v15, %v1649_v35 }
  0x6d   : > { %v662_v46 = vshll.u32 %v5639_v39, 16  ;;  %v666_v11 = vshrl.u32 %v5639_v39, 16 }
  0x6e   : > { %5081 = vmatmul.msk.bf16.gmra.mxu3 %vm291_vm1, %v1644_v45  ;;  %v658_v45 = vshrl.u32 %v5638_v18, 16 }
  0x6f   : > { %5182 = vmatmul.msk.bf16.vlgmr.msrb.gmra.mxu0 %vm291_vm1, %v2107_v42  ;;  %v2139_v42 = vshll.u32 %v5699_v38, 16  ;;  %v664_v53 = vrot.slane %v662_v46, 1 }
  0x70   : > { %v660_v52 = vor.u32 %v658_v45, %v656_v28  ;;  %v1653_v28 = vrot.slane %v5682_v22, 1  ;;  %v5661_v45 = vld [vmem:[%s5976_s26 + $0x38] sm:$0xff] }
  0x71   : > { %v2141_v50 = vrot.slane %v2139_v42, 2 }
  0x73   : > { %v2142_v56 = vor.u32 %v2141_v50, %v2138_v49 }
  0x75   : > { %v2143_v63 = vsel %vm2090_vm4, %v2133_v31, %v2142_v56  ;;  %v5701_v31 = vld [vmem:[%s5976_s26 + $0x40] sm:$0xff] }
  0x76   : > { %v2157_v38 = vshll.u32 %v5701_v31, 16 }
  0x78   : > { %v2159_v49 = vrot.slane %v2157_v38, 2 }
  0x7c   : > { %4874 = vmatmul.msk.bf16.gmra.mxu1 %vm291_vm1, %v641_v58  ;;  %4977 = vmatmul.msk.bf16.gmra.mxu2 %vm291_vm1, %v1190_v59  ;;  %v665_v59 = vsel %vm621_vm3, %v660_v52, %v664_v53  ;;  %v676_v52 = vor.u32 %v674_v41, %v672_v20 }
  0x7e   : > { %5082 = vmatmul.msk.bf16.gmra.mxu3 %vm291_vm1, %v1646_v0  ;;  %v5700_v0 = vld [vmem:[%s5976_s26 + $0x38] sm:$0xff] }
  0x7f   : > { %5183 = vmatmul.msk.bf16.gmra.mxu0 %vm291_vm1, %v2116_v61  ;;  %v1651_v61 = vrot.slane %v5681_v55, 1  ;;  %v2145_v6 = vshrl.u32 %v5700_v0, 16  ;;  %v2148_v7 = vshll.u32 %v5700_v0, 16  ;;  %v5683_v55 = vld [vmem:[%s5976_s26 + $0x50] sm:$0xff] }
  0x80   : > { %v1655_v0 = vrot.slane %v5683_v55, 1 }
  0x81   : > { %v1652_v4 = vsel %vm1185_vm2, %v1649_v35, %v1651_v61  ;;  %v2147_v15 = vrot.slane %v2145_v6, 1  ;;  %v1654_v35 = vsel %vm1185_vm2, %v1651_v61, %v1653_v28  ;;  %v5642_v6 = vld [vmem:[%s5976_s26 + $0x40] sm:$0xff] }
  0x8c   : > { %4875 = vmatmul.msk.bf16.gmra.mxu1 %vm291_vm1, %v649_v13  ;;  %4978 = vmatmul.msk.bf16.gmra.mxu2 %vm291_vm1, %v1192_v14  ;;  %v5660_v13 = vld [vmem:[%s5976_s26 + $0x30] sm:$0xff] }
  0x8d   : > { %v1197_v21 = vrot.slane %v5660_v13, 1 }
  0x8e   : > { %5083 = vmatmul.msk.bf16.gmra.mxu3 %vm291_vm1, %v1648_v19  ;;  %v668_v19 = vor.u32 %v666_v11, %v664_v53 }
  0x8f   : > { %5184 = vmatmul.msk.bf16.gmra.mxu0 %vm291_vm1, %v2125_v16  ;;  %v2150_v16 = vrot.slane %v2148_v7, 2  ;;  %v1198_v27 = vsel %vm1185_vm2, %v1195_v54, %v1197_v21  ;;  %v1199_v54 = vrot.slane %v5661_v45, 1  ;;  %v1656_v7 = vsel %vm1185_vm2, %v1653_v28, %v1655_v0  ;;  %v5684_v28 = vld [vmem:[%s5976_s26 + $0x58] sm:$0xff]  ;;  %v5703_v45 = vld [vmem:[%s5976_s26 + $0x50] sm:$0xff] }
  0x90   : > { %v673_v26 = vsel %vm621_vm3, %v668_v19, %v672_v20  ;;  %v1657_v38 = vrot.slane %v5684_v28, 1 }
  0x91   : > { %v2151_v23 = vor.u32 %v2150_v16, %v2147_v15  ;;  %v686_v16 = vshll.u32 %v5642_v6, 16 }
  0x93   : > { %v2152_v30 = vsel %vm2090_vm4, %v2142_v56, %v2151_v23 }
  0x99   : > { %v6114_v32 = vpop.f32.mrf.mxu1 }
  0x9c   : > { %v6118_v36 = vpop.f32.mrf.mxu0  ;;  %4876 = vmatmul.msk.bf16.gmra.mxu1 %vm291_vm1, %v657_v33  ;;  %4979 = vmatmul.msk.bf16.gmra.mxu2 %vm291_vm1, %v1194_v34  ;;  %v5641_v34 = vld [vmem:[%s5976_s26 + $0x38] sm:$0xff] }
  0x9d   : > { %v678_v42 = vshll.u32 %v5641_v34, 16  ;;  %v682_v15 = vshrl.u32 %v5641_v34, 16 }
  0x9e   : > { %5084 = vmatmul.msk.bf16.gmra.mxu3 %vm291_vm1, %v1650_v40 }
  0x9f   : > { %5185 = vmatmul.msk.bf16.gmra.mxu0 %vm291_vm1, %v2134_v37  ;;  %v6127_v43 = vpop.f32.mrf.mxu2  ;;  %v2154_v37 = vshrl.u32 %v5701_v31, 16  ;;  %v680_v53 = vrot.slane %v678_v42, 1 }
  0xa1   : > { %v6130_v44 = vpop.f32.mrf.mxu1  ;;  %v6135_v51 = vpop.f32.mrf.mxu3  ;;  %v2156_v47 = vrot.slane %v2154_v37, 1  ;;  %v681_v61 = vsel %vm621_vm3, %v676_v52, %v680_v53  ;;  %v1658_v52 = vsel %vm1185_vm2, %v1655_v0, %v1657_v38 }
  0xa3   : > { %v2160_v56 = vor.u32 %v2159_v49, %v2156_v47  ;;  %v5643_v49 = vld [vmem:[%s5976_s26 + $0x48] sm:$0xff] }
  0xa4   : > { %v6133_v48 = vpop.f32.mrf.mxu0 }
  0xa5   : > { %v2161_v3 = vsel %vm2090_vm4, %v2151_v23, %v2160_v56  ;;  %v684_v23 = vor.u32 %v682_v15, %v680_v53  ;;  %v2172_v53 = vshrl.u32 %v5703_v45, 16 }
  0xa7   : > { %v6138_v57 = vpop.f32.mrf.mxu2 }
  0xa9   : > { %v6140_v58 = vpop.f32.mrf.mxu1  ;;  %v6148_v1 = vpop.f32.mrf.mxu3 }
  0xac   : > { %v6144_v62 = vpop.f32.mrf.mxu0  ;;  %4877 = vmatmul.msk.bf16.gmra.mxu1 %vm291_vm1, %v665_v59  ;;  %4980 = vmatmul.msk.bf16.gmra.mxu2 %vm291_vm1, %v1196_v60 }
  0xae   : > { %5085 = vmatmul.msk.bf16.gmra.mxu3 %vm291_vm1, %v1652_v4  ;;  %v5702_v4 = vld [vmem:[%s5976_s26 + $0x48] sm:$0xff] }
  0xaf   : > { %5186 = vmatmul.msk.bf16.gmra.mxu0 %vm291_vm1, %v2143_v63  ;;  %v6161_v8 = vpop.f32.mrf.mxu2  ;;  %v1200_v63 = vsel %vm1185_vm2, %v1197_v21, %v1199_v54  ;;  %v2163_v9 = vshrl.u32 %v5702_v4, 16  ;;  %v2166_v11 = vshll.u32 %v5702_v4, 16 }
  0xb1   : > { %v6167_v10 = vpop.f32.mrf.mxu1  ;;  %v6175_v18 = vpop.f32.mrf.mxu3  ;;  %v2165_v20 = vrot.slane %v2163_v9, 1  ;;  %v2168_v21 = vrot.slane %v2166_v11, 2 }
  0xb4   : > { %v6170_v14 = vpop.f32.mrf.mxu0 }
  0xb7   : > { %v6178_v24 = vpop.f32.mrf.mxu2 }
  0xb9   : > { %v6180_v25 = vpop.f32.mrf.mxu1  ;;  %v6188_v33 = vpop.f32.mrf.mxu3 }
  0xba   : > { %6991 = vst [vmem:[#allocation3_spill] sm:$0xff] %v6188_v33 }
  0xbc   : > { %v6184_v29 = vpop.f32.mrf.mxu0  ;;  %4878 = vmatmul.msk.bf16.gmra.mxu1 %vm291_vm1, %v673_v26  ;;  %4981 = vmatmul.msk.bf16.gmra.mxu2 %vm291_vm1, %v1198_v27  ;;  %v688_v26 = vrot.slane %v686_v16, 1  ;;  %v1201_v27 = vrot.slane %v5662_v17, 1  ;;  %v5685_v17 = vld [vmem:[%s5976_s26 + $0x60] sm:$0xff] }
  0xbe   : > { %5086 = vmatmul.msk.bf16.gmra.mxu3 %vm291_vm1, %v1654_v35  ;;  %v689_v34 = vsel %vm621_vm3, %v684_v23, %v688_v26  ;;  %v1202_v37 = vsel %vm1185_vm2, %v1199_v54, %v1201_v27  ;;  %v2175_v54 = vshll.u32 %v5703_v45, 16  ;;  %v5704_v45 = vld [vmem:[%s5976_s26 + $0x58] sm:$0xff] }
  0xbf   : > { %5187 = vmatmul.msk.bf16.gmra.mxu0 %vm291_vm1, %v2152_v30  ;;  %v6195_v39 = vpop.f32.mrf.mxu2  ;;  %v2169_v30 = vor.u32 %v2168_v21, %v2165_v20 }
  0xc0   : > { %v2177_v9 = vrot.slane %v2175_v54, 2 }
  0xc1   : > { %v6198_v40 = vpop.f32.mrf.mxu1  ;;  %v6203_v50 = vpop.f32.mrf.mxu3  ;;  %v2170_v42 = vsel %vm2090_vm4, %v2160_v56, %v2169_v30 }
  0xc2   : > { %6992 = vst [vmem:[#allocation4_spill] sm:$0xff] %v6203_v50  ;;  %v5686_v50 = vld [vmem:[%s5976_s26 + $0x68] sm:$0xff] }
  0xc4   : > { %v6201_v46 = vpop.f32.mrf.mxu0 }
  0xc7   : > { %v6206_v59 = vpop.f32.mrf.mxu2 }
  0xc9   : > { %v6208_v60 = vpop.f32.mrf.mxu1  ;;  %v6216_v5 = vpop.f32.mrf.mxu3 }
  0xca   : > { %6993 = vst [vmem:[#allocation5_spill] sm:$0xff] %v6216_v5 }
  0xcc   : > { %v6212_v2 = vpop.f32.mrf.mxu0  ;;  %4879 = vmatmul.msk.bf16.gmra.mxu1 %vm291_vm1, %v681_v61  ;;  %4982 = vmatmul.msk.bf16.gmra.mxu2 %vm291_vm1, %v1200_v63  ;;  %v690_v61 = vshrl.u32 %v5642_v6, 16  ;;  %v694_v63 = vshll.u32 %v5643_v49, 16 }
  0xce   : > { %5087 = vmatmul.msk.bf16.gmra.mxu3 %vm291_vm1, %v1656_v7  ;;  %v2174_v7 = vrot.slane %v2172_v53, 1  ;;  %v692_v0 = vor.u32 %v690_v61, %v688_v26  ;;  %v696_v15 = vrot.slane %v694_v63, 1  ;;  %v5644_v26 = vld [vmem:[%s5976_s26 + $0x50] sm:$0xff]  ;;  %v2184_v61 = vshll.u32 %v5704_v45, 16 }
  0xcf   : > { %5188 = vmatmul.msk.bf16.gmra.mxu0 %vm291_vm1, %v2161_v3  ;;  %v6223_v12 = vpop.f32.mrf.mxu2  ;;  %v5663_v3 = vld [vmem:[%s5976_s26 + $0x48] sm:$0xff] }
  0xd0   : > { %v1203_v16 = vrot.slane %v5663_v3, 1  ;;  %v2178_v20 = vor.u32 %v2177_v9, %v2174_v7  ;;  %v697_v6 = vsel %vm621_vm3, %v692_v0, %v696_v15  ;;  %v698_v7 = vshrl.u32 %v5643_v49, 16  ;;  %v5664_v0 = vld [vmem:[%s5976_s26 + $0x50] sm:$0xff] }
  0xd1   : > { %v6226_v13 = vpop.f32.mrf.mxu1  ;;  %v1756_v22 = vpop.f32.mrf.mxu3  ;;  %v702_v9 = vshll.u32 %v5644_v26, 16 }
  0xd2   : > { %v1204_v28 = vsel %vm1185_vm2, %v1201_v27, %v1203_v16  ;;  %v2181_v27 = vshrl.u32 %v5704_v45, 16  ;;  %v1205_v45 = vrot.slane %v5664_v0, 1 }
  0xd4   : > { %v6229_v19 = vpop.f32.mrf.mxu0 }
  0xd7   : > { %v6232_v31 = vpop.f32.mrf.mxu2 }
  0xd9   : > { %v6234_v35 = vpop.f32.mrf.mxu1  ;;  %v6242_v47 = vpop.f32.mrf.mxu3 }
  0xdc   : > { %v6238_v41 = vpop.f32.mrf.mxu0  ;;  %4880 = vmatmul.msk.bf16.gmra.mxu1 %vm291_vm1, %v689_v34  ;;  %4983 = vmatmul.msk.bf16.gmra.mxu2 %vm291_vm1, %v1202_v37  ;;  %v1659_v34 = vrot.slane %v5685_v17, 1 }
  0xde   : > { %5088 = vmatmul.msk.bf16.gmra.mxu3 %vm291_vm1, %v1658_v52  ;;  %v1660_v53 = vsel %vm1185_vm2, %v1657_v38, %v1659_v34 }
  0xdf   : > { %5189 = vmatmul.msk.bf16.gmra.mxu0 %vm291_vm1, %v2170_v42  ;;  %v6249_v55 = vpop.f32.mrf.mxu2  ;;  %v2179_v42 = vsel %vm2090_vm4, %v2169_v30, %v2178_v20 }
  0xe1   : > { %v6252_v56 = vpop.f32.mrf.mxu1  ;;  %v6257_v11 = vpop.f32.mrf.mxu3 }
  0xe4   : > { %v6255_v4 = vpop.f32.mrf.mxu0 }
  0xe7   : > { %v6260_v21 = vpop.f32.mrf.mxu2 }
  0xe9   : > { %v851_v23 = vpop.f32.mrf.mxu1  ;;  %v6266_v52 = vpop.f32.mrf.mxu3 }
  0xea   : > { %v977_v54 = vadd.f32 %v851_v23, %v6118_v36  ;;  %v700_v36 = vor.u32 %v698_v7, %v696_v15  ;;  %v704_v23 = vrot.slane %v702_v9, 1  ;;  %v5705_v7 = vld [vmem:[%s5976_s26 + $0x60] sm:$0xff] }
  0xec   : > { %v2342_v37 = vpop.f32.mrf.mxu0  ;;  %4881 = vmatmul.msk.bf16.gmra.mxu1 %vm291_vm1, %v697_v6  ;;  %4984 = vmatmul.msk.bf16.gmra.mxu2 %vm291_vm1, %v1204_v28  ;;  %v2183_v28 = vrot.slane %v2181_v27, 1  ;;  %v1206_v27 = vsel %vm1185_vm2, %v1203_v16, %v1205_v45  ;;  %v2190_v16 = vshrl.u32 %v5705_v7, 16 }
  0xee   : > { %5089 = vmatmul.msk.bf16.gmra.mxu3 %vm291_vm1, %v1660_v53 }
  0xef   : > { %5190 = vmatmul.msk.bf16.gmra.mxu0 %vm291_vm1, %v2179_v42  ;;  %v1304_v63 = vpop.f32.mrf.mxu2  ;;  %v2186_v42 = vrot.slane %v2184_v61, 2  ;;  %v1661_v61 = vrot.slane %v5686_v50, 1 }
  0xf0   : > { %v1430_v30 = vadd.f32 %v1304_v63, %v977_v54 }
  0xf1   : > { %v853_v3 = vpop.f32.mrf.mxu1  ;;  %v6276_v5 = vpop.f32.mrf.mxu3  ;;  %v2187_v53 = vor.u32 %v2186_v42, %v2183_v28  ;;  %v1662_v50 = vsel %vm1185_vm2, %v1659_v34, %v1661_v61  ;;  %v706_v42 = vshrl.u32 %v5644_v26, 16 }
  0xf2   : > { %v1882_v17 = vadd.f32 %v1756_v22, %v1430_v30  ;;  %v978_v54 = vadd.f32 %v853_v3, %v6133_v48  ;;  %v705_v22 = vsel %vm621_vm3, %v700_v36, %v704_v23  ;;  %v6295_v3 = vld [vmem:[%s5976_s26 + $0x58] sm:$0xff] }
  0xf3   : > { %v2188_v15 = vsel %vm2090_vm4, %v2178_v20, %v2187_v53  ;;  %v2193_v20 = vshll.u32 %v5705_v7, 16  ;;  %v6302_v36 = vld [vmem:[%s5976_s26 + $0x58] sm:$0xff] }
  0xf4   : > { %v2344_v6 = vpop.f32.mrf.mxu0  ;;  %v6278_v38 = vadd.f32 %v2342_v37, %v1882_v17 }
  0xf5   : > { %v2195_v34 = vrot.slane %v2193_v20, 2 }
  0xf7   : > { %v1306_v49 = vpop.f32.mrf.mxu2 }
  0xf8   : > { %v1431_v63 = vadd.f32 %v1306_v49, %v978_v54 }
  0xf9   : > { %v856_v33 = vpop.f32.mrf.mxu1  ;;  %v6287_v9 = vpop.f32.mrf.mxu3 }
  0xfa   : > { %v1883_v37 = vadd.f32 %v6242_v47, %v1431_v63  ;;  %v979_v47 = vadd.f32 %v856_v33, %v6144_v62  ;;  %v2192_v63 = vrot.slane %v2190_v16, 1  ;;  %v708_v33 = vor.u32 %v706_v42, %v704_v23  ;;  %v5706_v42 = vld [vmem:[%s5976_s26 + $0x68] sm:$0xff] }
  0xfc   : > { %v2347_v30 = vpop.f32.mrf.mxu0  ;;  %4882 = vmatmul.msk.bf16.gmra.mxu1 %vm291_vm1, %v705_v22  ;;  %4985 = vmatmul.msk.bf16.gmra.mxu2 %vm291_vm1, %v1206_v27  ;;  %v6291_v48 = vadd.f32 %v2344_v6, %v1883_v37  ;;  %v710_v6 = vshll.u32 %v6295_v3, 16  ;;  %v1207_v37 = vrot.slane %v6302_v36, 1  ;;  %v2196_v7 = vor.u32 %v2195_v34, %v2192_v63 }
  0xfd   : > { %v2202_v63 = vshll.u32 %v5706_v42, 16 }
  0xfe   : > { %5090 = vmatmul.msk.bf16.gmra.mxu3 %vm291_vm1, %v1662_v50  ;;  %v712_v27 = vrot.slane %v710_v6, 1  ;;  %v1208_v20 = vsel %vm1185_vm2, %v1205_v45, %v1207_v37 }
  0xff   : > { %5191 = vmatmul.msk.bf16.gmra.mxu0 %vm291_vm1, %v2188_v15  ;;  %v1309_v0 = vpop.f32.mrf.mxu2  ;;  %v6311_v15 = vld [vmem:[%s5976_s26 + $0x70] sm:$0xff] }
 0x100   : > { %v1432_v17 = vadd.f32 %v1309_v0, %v979_v47  ;;  %v713_v16 = vsel %vm621_vm3, %v708_v33, %v712_v27 }
 0x101   : > { %v858_v28 = vpop.f32.mrf.mxu1  ;;  %v6305_v22 = vpop.f32.mrf.mxu3 }
 0x102   : > { %v1884_v54 = vadd.f32 %v6257_v11, %v1432_v17  ;;  %v980_v26 = vadd.f32 %v858_v28, %v6170_v14  ;;  %v2197_v17 = vsel %vm2090_vm4, %v2187_v53, %v2196_v7  ;;  %v5752_v14 = vld [vmem:[%s6989_s1 + $0x78] sm:$0xff]  ;;  %v5772_v53 = vld [vmem:[%s6989_s1 + $0x8c] sm:$0xff] }
 0x103   : > { %3245 = vmatpush.bf16.msra.mxu2 %v5752_v14  ;;  %3831 = vmatpush.bf16.msra.mxu3 %v5772_v53  ;;  %v5688_v14 = vld [vmem:[%s5976_s26 + $0x78] sm:$0xff] }
 0x104   : > { %v2349_v49 = vpop.f32.mrf.mxu0  ;;  %v6307_v62 = vadd.f32 %v2347_v30, %v1884_v54  ;;  %v1663_v30 = vrot.slane %v6311_v15, 1  ;;  %v2199_v54 = vshrl.u32 %v5706_v42, 16  ;;  %v714_v15 = vshrl.u32 %v6295_v3, 16 }
 0x106   : > { %v1664_v45 = vsel %vm1185_vm2, %v1661_v61, %v1663_v30 }
 0x107   : > { %v1311_v50 = vpop.f32.mrf.mxu2 }
 0x108   : > { %v1433_v11 = vadd.f32 %v1311_v50, %v980_v26  ;;  %v5666_v26 = vld [vmem:[%s5976_s26 + $0x60] sm:$0xff] }
 0x109   : > { %v861_v47 = vpop.f32.mrf.mxu1  ;;  %v6320_v6 = vpop.f32.mrf.mxu3  ;;  %v1209_v42 = vrot.slane %v5666_v26, 1 }
 0x10a   : > { %v1885_v23 = vadd.f32 %v6266_v52, %v1433_v11  ;;  %v6331_v52 = vld [vmem:[%s5976_s26 + $0x60] sm:$0xff]  ;;  %v981_v36 = vadd.f32 %v861_v47, %v6184_v29  ;;  %v2204_v29 = vrot.slane %v2202_v63, 2 }
 0x10b   : > { %v718_v61 = vshll.u32 %v6331_v52, 16  ;;  %v5732_v47 = vld [vmem:[%s6989_s1 + $0x64] sm:$0xff] }
 0x10c   : > { %v2352_v0 = vpop.f32.mrf.mxu0  ;;  %4883 = vmatmul.msk.bf16.gmra.mxu1 %vm291_vm1, %v713_v16  ;;  %4986 = vmatmul.msk.bf16.gmra.mxu2 %vm291_vm1, %v1208_v20  ;;  %v6327_v28 = vadd.f32 %v2349_v49, %v1885_v23  ;;  %v2201_v16 = vrot.slane %v2199_v54, 1  ;;  %v5792_v20 = vld [vmem:[%s6989_s1 + $0xa0] sm:$0xff] }
 0x10d   : > { %2793 = vmatpush.bf16.msra.mxu1 %v5732_v47  ;;  %4284 = vmatpush.bf16.msra.mxu0 %v5792_v20  ;;  %v1665_v47 = vrot.slane %v5688_v14, 1 }
 0x10e   : > { %5091 = vmatmul.msk.bf16.gmra.mxu3 %vm291_vm1, %v1664_v45  ;;  %v2205_v53 = vor.u32 %v2204_v29, %v2201_v16 }
 0x10f   : > { %5192 = vmatmul.msk.bf16.gmra.mxu0 %vm291_vm1, %v2197_v17  ;;  %v1314_v34 = vpop.f32.mrf.mxu2  ;;  %v716_v17 = vor.u32 %v714_v15, %v712_v27  ;;  %v5707_v15 = vld [vmem:[%s5976_s26 + $0x70] sm:$0xff] }
 0x110   : > { %v1434_v49 = vadd.f32 %v1314_v34, %v981_v36  ;;  %v2206_v27 = vsel %vm2090_vm4, %v2196_v7, %v2205_v53  ;;  %v2208_v26 = vshrl.u32 %v5707_v15, 16  ;;  %v2211_v16 = vshll.u32 %v5707_v15, 16 }
 0x111   : > { %v863_v33 = vpop.f32.mrf.mxu1  ;;  %v6349_v23 = vpop.f32.mrf.mxu3 }
 0x112   : > { %v1886_v50 = vadd.f32 %v6276_v5, %v1434_v49  ;;  %v720_v5 = vrot.slane %v718_v61, 1  ;;  %v982_v45 = vadd.f32 %v863_v33, %v6201_v46  ;;  %v1210_v49 = vsel %vm1185_vm2, %v1207_v37, %v1209_v42  ;;  %v5647_v33 = vld [vmem:[%s5976_s26 + $0x68] sm:$0xff] }
 0x113   : > { %v1666_v37 = vsel %vm1185_vm2, %v1663_v30, %v1665_v47  ;;  %v726_v14 = vshll.u32 %v5647_v33, 16 }
 0x114   : > { %v2354_v11 = vpop.f32.mrf.mxu0  ;;  %v6351_v3 = vadd.f32 %v2352_v0, %v1886_v50  ;;  %v721_v34 = vsel %vm621_vm3, %v716_v17, %v720_v5  ;;  %v722_v17 = vshrl.u32 %v6331_v52, 16 }
 0x117   : > { %v1316_v36 = vpop.f32.mrf.mxu2 }
 0x118   : > { %v1435_v54 = vadd.f32 %v1316_v36, %v982_v45 }
 0x119   : > { %v866_v63 = vpop.f32.mrf.mxu1  ;;  %v6360_v61 = vpop.f32.mrf.mxu3 }
 0x11a   : > { %v1887_v0 = vadd.f32 %v6287_v9, %v1435_v54  ;;  %v983_v9 = vadd.f32 %v866_v63, %v6212_v2  ;;  %v2210_v54 = vrot.slane %v2208_v26, 1  ;;  %v724_v63 = vor.u32 %v722_v17, %v720_v5  ;;  %v5708_v17 = vld [vmem:[%s5976_s26 + $0x78] sm:$0xff] }
 0x11c   : > { %v2357_v50 = vpop.f32.mrf.mxu0  ;;  %4884 = vmatmul.msk.bf16.gmra.mxu1 %vm291_vm1, %v721_v34  ;;  %4987 = vmatmul.msk.bf16.gmra.mxu2 %vm291_vm1, %v1210_v49  ;;  %v6364_v46 = vadd.f32 %v2354_v11, %v1887_v0  ;;  %v5667_v11 = vld [vmem:[%s5976_s26 + $0x68] sm:$0xff]  ;;  %v2213_v34 = vrot.slane %v2211_v16, 2  ;;  %v728_v49 = vrot.slane %v726_v14, 1 }
 0x11d   : > { %v1211_v0 = vrot.slane %v5667_v11, 1  ;;  %v2217_v11 = vshrl.u32 %v5708_v17, 16 }
 0x11e   : > { %5092 = vmatmul.msk.bf16.gmra.mxu3 %vm291_vm1, %v1666_v37  ;;  %v2214_v37 = vor.u32 %v2213_v34, %v2210_v54 }
 0x11f   : > { %5193 = vmatmul.msk.bf16.gmra.mxu0 %vm291_vm1, %v2206_v27  ;;  %v1319_v7 = vpop.f32.mrf.mxu2  ;;  %v5689_v27 = vld [vmem:[%s5976_s26 + $0x80] sm:$0xff]  ;;  %v1212_v26 = vsel %vm1185_vm2, %v1209_v42, %v1211_v0 }
 0x120   : > { %v1436_v29 = vadd.f32 %v1319_v7, %v983_v9  ;;  %v1667_v16 = vrot.slane %v5689_v27, 1  ;;  %v2215_v5 = vsel %vm2090_vm4, %v2205_v53, %v2214_v37 }
 0x121   : > { %v868_v20 = vpop.f32.mrf.mxu1  ;;  %v6374_v30 = vpop.f32.mrf.mxu3 }
 0x122   : > { %v1888_v45 = vadd.f32 %v6305_v22, %v1436_v29  ;;  %v984_v15 = vadd.f32 %v868_v20, %v6229_v19  ;;  %v729_v22 = vsel %vm621_vm3, %v724_v63, %v728_v49  ;;  %v5648_v20 = vld [vmem:[%s5976_s26 + $0x70] sm:$0xff]  ;;  %v1668_v42 = vsel %vm1185_vm2, %v1665_v47, %v1667_v16 }
 0x123   : > { %v730_v63 = vshrl.u32 %v5647_v33, 16  ;;  %v734_v27 = vshll.u32 %v5648_v20, 16 }
 0x124   : > { %v2359_v36 = vpop.f32.mrf.mxu0  ;;  %v6376_v2 = vadd.f32 %v2357_v50, %v1888_v45  ;;  %v2220_v45 = vshll.u32 %v5708_v17, 16 }
 0x127   : > { %v1321_v52 = vpop.f32.mrf.mxu2 }
 0x128   : > { %v1437_v9 = vadd.f32 %v1321_v52, %v984_v15  ;;  %v5668_v15 = vld [vmem:[%s5976_s26 + $0x70] sm:$0xff] }
 0x129   : > { %v871_v7 = vpop.f32.mrf.mxu1  ;;  %v6385_v14 = vpop.f32.mrf.mxu3 }
 0x12a   : > { %v1889_v50 = vadd.f32 %v6320_v6, %v1437_v9  ;;  %v985_v6 = vadd.f32 %v871_v7, %v6238_v41  ;;  %v2219_v9 = vrot.slane %v2217_v11, 1  ;;  %v732_v41 = vor.u32 %v730_v63, %v728_v49  ;;  %v5709_v63 = vld [vmem:[%s5976_s26 + $0x80] sm:$0xff] }
 0x12b   : > { %v736_v7 = vrot.slane %v734_v27, 1 }
 0x12c   : > { %v2362_v29 = vpop.f32.mrf.mxu0  ;;  %4885 = vmatmul.msk.bf16.gmra.mxu1 %vm291_vm1, %v729_v22  ;;  %4988 = vmatmul.msk.bf16.gmra.mxu2 %vm291_vm1, %v1212_v26  ;;  %v6389_v19 = vadd.f32 %v2359_v36, %v1889_v50  ;;  %v2222_v22 = vrot.slane %v2220_v45, 2  ;;  %v1213_v50 = vrot.slane %v5668_v15, 1  ;;  %v2226_v15 = vshrl.u32 %v5709_v63, 16 }
 0x12e   : > { %5093 = vmatmul.msk.bf16.gmra.mxu3 %vm291_vm1, %v1668_v42  ;;  %v2223_v42 = vor.u32 %v2222_v22, %v2219_v9  ;;  %v1214_v11 = vsel %vm1185_vm2, %v1211_v0, %v1213_v50 }
 0x12f   : > { %5194 = vmatmul.msk.bf16.gmra.mxu0 %vm291_vm1, %v2215_v5  ;;  %v1324_v53 = vpop.f32.mrf.mxu2  ;;  %v5690_v5 = vld [vmem:[%s5976_s26 + $0x88] sm:$0xff] }
 0x130   : > { %v1438_v54 = vadd.f32 %v1324_v53, %v985_v6  ;;  %v1669_v45 = vrot.slane %v5690_v5, 1  ;;  %v2224_v49 = vsel %vm2090_vm4, %v2214_v37, %v2223_v42 }
 0x131   : > { %v873_v34 = vpop.f32.mrf.mxu1  ;;  %v6398_v26 = vpop.f32.mrf.mxu3 }
 0x132   : > { %v1890_v36 = vadd.f32 %v6349_v23, %v1438_v54  ;;  %v986_v17 = vadd.f32 %v873_v34, %v6255_v4  ;;  %v737_v23 = vsel %vm621_vm3, %v732_v41, %v736_v7  ;;  %v5649_v34 = vld [vmem:[%s5976_s26 + $0x78] sm:$0xff]  ;;  %v1670_v0 = vsel %vm1185_vm2, %v1667_v16, %v1669_v45 }
 0x133   : > { %v738_v41 = vshrl.u32 %v5648_v20, 16  ;;  %v742_v5 = vshll.u32 %v5649_v34, 16 }
 0x134   : > { %v2364_v52 = vpop.f32.mrf.mxu0  ;;  %v6400_v47 = vadd.f32 %v2362_v29, %v1890_v36  ;;  %v2229_v36 = vshll.u32 %v5709_v63, 16 }
 0x137   : > { %v1326_v33 = vpop.f32.mrf.mxu2 }
 0x138   : > { %v1439_v6 = vadd.f32 %v1326_v33, %v986_v17  ;;  %v5669_v17 = vld [vmem:[%s5976_s26 + $0x78] sm:$0xff] }
 0x139   : > { %v876_v53 = vpop.f32.mrf.mxu1  ;;  %v6409_v27 = vpop.f32.mrf.mxu3 }
 0x13a   : > { %v1891_v29 = vadd.f32 %v6360_v61, %v1439_v6  ;;  %v987_v61 = vadd.f32 %v876_v53, %v6114_v32  ;;  %v2228_v6 = vrot.slane %v2226_v15, 1  ;;  %v740_v32 = vor.u32 %v738_v41, %v736_v7  ;;  %v5710_v41 = vld [vmem:[%s5976_s26 + $0x88] sm:$0xff] }
 0x13b   : > { %v744_v53 = vrot.slane %v742_v5, 1 }
 0x13c   : > { %v2367_v54 = vpop.f32.mrf.mxu0  ;;  %4886 = vmatmul.msk.bf16.gmra.mxu1 %vm291_vm1, %v737_v23  ;;  %4989 = vmatmul.msk.bf16.gmra.mxu2 %vm291_vm1, %v1214_v11  ;;  %v6413_v4 = vadd.f32 %v2364_v52, %v1891_v29  ;;  %v2231_v23 = vrot.slane %v2229_v36, 2  ;;  %v1215_v29 = vrot.slane %v5669_v17, 1  ;;  %v2235_v17 = vshrl.u32 %v5710_v41, 16 }
 0x13d   : > { %v745_v15 = vsel %vm621_vm3, %v740_v32, %v744_v53 }
 0x13e   : > { %6994 = vst [vmem:[#allocation6_spill] sm:$0xff] %v6413_v4  ;;  %5094 = vmatmul.msk.bf16.gmra.mxu3 %vm291_vm1, %v1670_v0  ;;  %v2232_v20 = vor.u32 %v2231_v23, %v2228_v6  ;;  %v1216_v36 = vsel %vm1185_vm2, %v1213_v50, %v1215_v29  ;;  %v6444_v50 = vld [vmem:[%s5976_s26 + $0x80] sm:$0xff] }
 0x13f   : > { %5195 = vmatmul.msk.bf16.gmra.mxu0 %vm291_vm1, %v2224_v49  ;;  %v1329_v37 = vpop.f32.mrf.mxu2  ;;  %v6427_v49 = vld [vmem:[%s5976_s26 + $0x90] sm:$0xff] }
 0x140   : > { %v1440_v9 = vadd.f32 %v1329_v37, %v987_v61 }
 0x141   : > { %v878_v22 = vpop.f32.mrf.mxu1  ;;  %v6422_v11 = vpop.f32.mrf.mxu3 }
 0x142   : > { %v1892_v52 = vadd.f32 %v6374_v30, %v1440_v9  ;;  %v988_v63 = vadd.f32 %v878_v22, %v6130_v44  ;;  %v2233_v9 = vsel %vm2090_vm4, %v2223_v42, %v2232_v20  ;;  %v2238_v42 = vshll.u32 %v5710_v41, 16 }
 0x144   : > { %v2369_v33 = vpop.f32.mrf.mxu0  ;;  %v6424_v16 = vadd.f32 %v2367_v54, %v1892_v52  ;;  %v1671_v54 = vrot.slane %v6427_v49, 1  ;;  %v1538_v52 = vld [vmem:[%s5976_s26 + $0x98] sm:$0x1]  ;;  %v746_v49 = vshrl.u32 %v5649_v34, 16 }
 0x146   : > { %6995 = vst [vmem:[#allocation7_spill] sm:$0xff] %v6424_v16  ;;  %v1672_v22 = vsel %vm1185_vm2, %v1669_v45, %v1671_v54  ;;  %v2237_v45 = vrot.slane %v2235_v17, 1 }
 0x147   : > { %v1331_v0 = vpop.f32.mrf.mxu2 }
 0x148   : > { %v1441_v61 = vadd.f32 %v1331_v0, %v988_v63  ;;  %v6452_v63 = vld [vmem:[%s5976_s26 + $0x80] sm:$0xff]  ;;  %v1618_v0 = vunpack.c.l.b16 %v1538_v52 }
 0x149   : > { %v881_v30 = vpop.f32.mrf.mxu1  ;;  %v6436_v5 = vpop.f32.mrf.mxu3  ;;  %v1217_v41 = vrot.slane %v6452_v63, 1  ;;  %v5413_v63 = vld [vmem:[%s5976_s26 + $0x10] sm:$0xc] }
 0x14a   : > { %v1893_v7 = vadd.f32 %v6385_v14, %v1441_v61  ;;  %v989_v14 = vadd.f32 %v881_v30, %v6140_v58  ;;  %v1637_v34 = vpack.c.b16 %v1618_v0, %v1618_v0  ;;  %v5754_v0 = vld [vmem:[%s5976_s26 + $0x10] sm:$0xf0] }
 0x14c   : > { %v2372_v37 = vpop.f32.mrf.mxu0  ;;  %4887 = vmatmul.msk.bf16.gmra.mxu1 %vm291_vm1, %v745_v15  ;;  %4990 = vmatmul.msk.bf16.gmra.mxu2 %vm291_vm1, %v1216_v36  ;;  %v6440_v44 = vadd.f32 %v2369_v33, %v1893_v7  ;;  %v750_v33 = vshll.u32 %v6444_v50, 16  ;;  %v2240_v36 = vrot.slane %v2238_v42, 2  ;;  %v748_v7 = vor.u32 %v746_v49, %v744_v53 }
 0x14d   : > { %v1673_v53 = vrot.slane %v1637_v34, 1 }
 0x14e   : > { %6996 = vst [vmem:[#allocation8_spill] sm:$0xff] %v6440_v44  ;;  %5095 = vmatmul.msk.bf16.gmra.mxu3 %vm291_vm1, %v1672_v22 }
 0x14f   : > { %5196 = vmatmul.msk.bf16.gmra.mxu0 %vm291_vm1, %v2233_v9  ;;  %v1334_v6 = vpop.f32.mrf.mxu2  ;;  %v752_v9 = vrot.slane %v750_v33, 1  ;;  %v6474_v33 = vld [vmem:[%s5976_s26 + $0x88] sm:$0xff] }
 0x150   : > { %v1442_v23 = vadd.f32 %v1334_v6, %v989_v14  ;;  %v6461_v14 = vor.u32 %v2240_v36, %v2237_v45 }
 0x151   : > { %v883_v32 = vpop.f32.mrf.mxu1  ;;  %v6455_v58 = vpop.f32.mrf.mxu3  ;;  %v753_v52 = vsel %vm621_vm3, %v748_v7, %v752_v9 }
 0x152   : > { %v1894_v61 = vadd.f32 %v6398_v26, %v1442_v23  ;;  %v990_v22 = vadd.f32 %v883_v32, %v6167_v10  ;;  %v2242_v49 = vsel %vm2090_vm4, %v2232_v20, %v6461_v14  ;;  %v5711_v10 = vld [vmem:[%s5976_s26 + $0x90] sm:$0xff]  ;;  %v5414_v20 = vor.u32 %v5754_v0, %v5413_v63 }
 0x153   : > { %v2244_v36 = vshrl.u32 %v5711_v10, 16  ;;  %v2247_v7 = vshll.u32 %v5711_v10, 16 }
 0x154   : > { %v2374_v15 = vpop.f32.mrf.mxu0  ;;  %v6457_v30 = vadd.f32 %v2372_v37, %v1894_v61  ;;  %v1218_v37 = vsel %vm1185_vm2, %v1215_v29, %v1217_v41  ;;  %v5755_v61 = vld [vmem:[%s5976_s26 + $0x18] sm:$0xff] }
 0x155   : > { %v2249_v10 = vrot.slane %v2247_v7, 2 }
 0x156   : > { %6997 = vst [vmem:[#allocation9_spill] sm:$0xff] %v6457_v30 }
 0x157   : > { %v1336_v26 = vpop.f32.mrf.mxu2 }
 0x158   : > { %v1443_v17 = vadd.f32 %v1336_v26, %v990_v22  ;;  %v754_v26 = vshrl.u32 %v6444_v50, 16  ;;  %v1990_v50 = vld [vmem:[%s5976_s26 + $0x98] sm:$0x3] }
 0x159   : > { %v886_v42 = vpop.f32.mrf.mxu1  ;;  %v6469_v32 = vpop.f32.mrf.mxu3 }
 0x15a   : > { %v1895_v6 = vadd.f32 %v6409_v27, %v1443_v17  ;;  %v1674_v27 = vsel %vm1185_vm2, %v1671_v54, %v1673_v53  ;;  %v991_v45 = vadd.f32 %v886_v42, %v6180_v25  ;;  %v758_v17 = vshll.u32 %v6474_v33, 16 }
 0x15b   : > { %v3586_v54 = vshll.u32 %v5414_v20, 16  ;;  %v3591_v53 = vshrl.u32 %v5755_v61, 16  ;;  %v756_v0 = vor.u32 %v754_v26, %v752_v9 }
 0x15c   : > { %v2377_v23 = vpop.f32.mrf.mxu0  ;;  %4888 = vmatmul.msk.bf16.gmra.mxu1 %vm291_vm1, %v753_v52  ;;  %4991 = vmatmul.msk.bf16.gmra.mxu2 %vm291_vm1, %v1218_v37  ;;  %v6478_v29 = vadd.f32 %v2374_v15, %v1895_v6  ;;  %v6487_v52 = vld [vmem:[%s5976_s26 + $0x88] sm:$0xff]  ;;  %v3583_v37 = vshrl.u32 %v5414_v20, 16  ;;  %v3594_v6 = vshll.u32 %v5755_v61, 16 }
 0x15d   : > { %v3588_v30 = vrot.slane %v3586_v54, 3  ;;  %v3593_v20 = vrot.slane %v3591_v53, 2 }
 0x15e   : > { %6998 = vst [vmem:[#allocation10_spill] sm:$0xff] %v6478_v29  ;;  %5096 = vmatmul.msk.bf16.gmra.mxu3 %vm291_vm1, %v1674_v27  ;;  %v3585_v27 = vrot.slane %v3583_v37, 2  ;;  %v3596_v44 = vrot.slane %v3594_v6, 3 }
 0x15f   : > { %5197 = vmatmul.msk.bf16.gmra.mxu0 %vm291_vm1, %v2242_v49  ;;  %v1339_v34 = vpop.f32.mrf.mxu2  ;;  %v2246_v49 = vrot.slane %v2244_v36, 1  ;;  %v2070_v36 = vunpack.c.l.b16 %v1990_v50 }
 0x160   : > { %v1444_v22 = vadd.f32 %v1339_v34, %v991_v45  ;;  %v760_v45 = vrot.slane %v758_v17, 1  ;;  %v1219_v34 = vrot.slane %v6487_v52, 1  ;;  %v3589_v17 = vor.u32 %v3588_v30, %v3585_v27 }
 0x161   : > { %v888_v15 = vpop.f32.mrf.mxu1  ;;  %v6491_v63 = vpop.f32.mrf.mxu3  ;;  %v2250_v61 = vor.u32 %v2249_v10, %v2246_v49  ;;  %v3597_v37 = vor.u32 %v3596_v44, %v3593_v20  ;;  %v2089_v6 = vpack.c.b16 %v2070_v36, %v2070_v36  ;;  %v762_v27 = vshrl.u32 %v6474_v33, 16 }
 0x162   : > { %v1896_v25 = vadd.f32 %v6422_v11, %v1444_v22  ;;  %v992_v11 = vadd.f32 %v888_v15, %v6198_v40  ;;  %v521_v22 = vld [vmem:[%s5976_s26 + $0x90] sm:$0x1]  ;;  %v761_v4 = vsel %vm621_vm3, %v756_v0, %v760_v45 }
 0x163   : > { %v601_v26 = vunpack.c.l.b16 %v521_v22  ;;  %v2251_v40 = vsel %vm2090_vm4, %v6461_v14, %v2250_v61  ;;  %v1085_v15 = vld [vmem:[%s5976_s26 + $0x90] sm:$0x1]  ;;  %v2253_v49 = vshrl.u32 %v2089_v6, 16  ;;  %v2256_v10 = vshll.u32 %v2089_v6, 16 }
 0x164   : > { %v2379_v42 = vpop.f32.mrf.mxu0  ;;  %v6495_v29 = vadd.f32 %v2377_v23, %v1896_v25  ;;  %v1220_v23 = vsel %vm1185_vm2, %v1217_v41, %v1219_v34  ;;  %v1165_v30 = vunpack.c.l.b16 %v1085_v15 }
 0x165   : > { %v620_v44 = vpack.c.b16 %v601_v26, %v601_v26  ;;  %v2258_v26 = vrot.slane %v2256_v10, 2 }
 0x166   : > { %v1184_v20 = vpack.c.b16 %v1165_v30, %v1165_v30 }
 0x167   : > { %v1341_v7 = vpop.f32.mrf.mxu2 }
 0x168   : > { %v1445_v16 = vadd.f32 %v1341_v7, %v992_v11 }
 0x169   : > { %v891_v9 = vpop.f32.mrf.mxu1  ;;  %v6507_v25 = vpop.f32.mrf.mxu3 }
 0x16a   : > { %v1897_v54 = vadd.f32 %v6436_v5, %v1445_v16  ;;  %v3598_v16 = vsel %vm3581_vm5, %v3589_v17, %v3597_v37  ;;  %v5756_v5 = vld [vmem:[%s5976_s26 + $0x20] sm:$0xff]  ;;  %v993_v14 = vadd.f32 %v891_v9, %v6208_v60  ;;  %v764_v60 = vor.u32 %v762_v27, %v760_v45 }
 0x16b   : > { %v3600_v11 = vshrl.u32 %v5756_v5, 16  ;;  %v3603_v22 = vshll.u32 %v5756_v5, 16 }
 0x16c   : > { %v2382_v53 = vpop.f32.mrf.mxu0  ;;  %4889 = vmatmul.msk.bf16.gmra.mxu1 %vm291_vm1, %v761_v4  ;;  %4992 = vmatmul.msk.bf16.gmra.mxu2 %vm291_vm1, %v1220_v23  ;;  %v6511_v41 = vadd.f32 %v2379_v42, %v1897_v54  ;;  %v766_v42 = vshll.u32 %v620_v44, 16  ;;  %v2255_v23 = vrot.slane %v2253_v49, 1 }
 0x16d   : > { %v3602_v33 = vrot.slane %v3600_v11, 2  ;;  %v3605_v15 = vrot.slane %v3603_v22, 3  ;;  %v5774_v11 = vld [vmem:[%s5976_s26 + $0x10] sm:$0xf0] }
 0x16e   : > { %5491 = vmatmul.msk.bf16.vlgmr.msra.gmra.mxu3 %vm291_vm1, %v3598_v16  ;;  %v768_v54 = vrot.slane %v766_v42, 1  ;;  %v2259_v44 = vor.u32 %v2258_v26, %v2255_v23  ;;  %v6552_v26 = vld [vmem:[%s5976_s26 + $0x18] sm:$0xff] }
 0x16f   : > { %5198 = vmatmul.msk.bf16.gmra.mxu0 %vm291_vm1, %v2251_v40  ;;  %v1344_v50 = vpop.f32.mrf.mxu2  ;;  %v1221_v40 = vrot.slane %v1184_v20, 1  ;;  %v5516_v20 = vld [vmem:[%s5976_s26 + $0x10] sm:$0x8] }
 0x170   : > { %v1446_v0 = vadd.f32 %v1344_v50, %v993_v14  ;;  %v769_v5 = vsel %vm621_vm3, %v764_v60, %v768_v54  ;;  %v2260_v49 = vsel %vm2090_vm4, %v2250_v61, %v2259_v44  ;;  %v5714_v50 = vld [vmem:[%s5976_s26 + $0x8] sm:$0xf0]  ;;  %v5310_v61 = vld [vmem:[%s5976_s26 + $0x10] sm:$0xc] }
 0x171   : > { %v893_v4 = vpop.f32.mrf.mxu1  ;;  %v6520_v17 = vpop.f32.mrf.mxu3  ;;  %v1222_v45 = vsel %vm1185_vm2, %v1219_v34, %v1221_v40  ;;  %v5207_v34 = vld [vmem:[%s5976_s26 + $0x8] sm:$0xc] }
 0x172   : > { %v1898_v36 = vadd.f32 %v6455_v58, %v1446_v0  ;;  %v994_v6 = vadd.f32 %v893_v4, %v6226_v13  ;;  %v5757_v0 = vld [vmem:[%s5976_s26 + $0x28] sm:$0xff]  ;;  %v5734_v4 = vld [vmem:[%s5976_s26 + $0x10] sm:$0xf0] }
 0x173   : > { %v5311_v60 = vor.u32 %v5734_v4, %v5310_v61  ;;  %v3612_v54 = vshll.u32 %v5757_v0, 16 }
 0x174   : > { %v2384_v7 = vpop.f32.mrf.mxu0  ;;  %v6522_v9 = vadd.f32 %v2382_v53, %v1898_v36  ;;  %v3606_v53 = vor.u32 %v3605_v15, %v3602_v33  ;;  %v6548_v36 = vld [vmem:[%s5976_s26 + $0x10] sm:$0xff]  ;;  %v5775_v33 = vld [vmem:[%s5976_s26 + $0x18] sm:$0xff]  ;;  %v5517_v15 = vor.u32 %v5774_v11, %v5516_v20 }
 0x177   : > { %v1346_v30 = vpop.f32.mrf.mxu2 }
 0x178   : > { %v1447_v16 = vadd.f32 %v1346_v30, %v994_v6  ;;  %v2678_v30 = vrot.slane %v6548_v36, 2  ;;  %v5758_v36 = vld [vmem:[%s5976_s26 + $0x30] sm:$0xff] }
 0x179   : > { %v896_v58 = vpop.f32.mrf.mxu1  ;;  %v6531_v10 = vpop.f32.mrf.mxu3 }
 0x17a   : > { %v1899_v14 = vadd.f32 %v6469_v32, %v1447_v16  ;;  %v3607_v32 = vsel %vm3581_vm5, %v3597_v37, %v3606_v53  ;;  %v995_v27 = vadd.f32 %v896_v58, %v6234_v35  ;;  %v3609_v37 = vshrl.u32 %v5757_v0, 16 }
 0x17b   : > { %v3129_v58 = vrot.slane %v5311_v60, 2  ;;  %v5716_v60 = vld [vmem:[%s5976_s26 + $0x18] sm:$0xff] }
 0x17c   : > { %v2387_v13 = vpop.f32.mrf.mxu0  ;;  %4890 = vmatmul.msk.bf16.gmra.mxu1 %vm291_vm1, %v769_v5  ;;  %4993 = vmatmul.msk.bf16.gmra.mxu2 %vm291_vm1, %v1222_v45  ;;  %v6535_v52 = vadd.f32 %v2384_v7, %v1899_v14  ;;  %v5208_v7 = vor.u32 %v5714_v50, %v5207_v34  ;;  %v3130_v5 = vrot.slane %v6552_v26, 2  ;;  %v3611_v45 = vrot.slane %v3609_v37, 2  ;;  %v5736_v37 = vld [vmem:[%s5976_s26 + $0x20] sm:$0xff] }
 0x17d   : > { %v3614_v14 = vrot.slane %v3612_v54, 3  ;;  %v4168_v34 = vrot.slane %v5517_v15, 3  ;;  %v3618_v54 = vshrl.u32 %v5758_v36, 16  ;;  %v5776_v15 = vld [vmem:[%s5976_s26 + $0x20] sm:$0xff] }
 0x17e   : > { %5492 = vmatmul.msk.bf16.gmra.mxu3 %vm291_vm1, %v3607_v32  ;;  %v2677_v44 = vrot.slane %v5208_v7, 2 }
 0x17f   : > { %5199 = vmatmul.msk.bf16.gmra.mxu0 %vm291_vm1, %v2260_v49  ;;  %v1349_v42 = vpop.f32.mrf.mxu2  ;;  %v3615_v61 = vor.u32 %v3614_v14, %v3611_v45  ;;  %v3132_v45 = vrot.slane %v5736_v37, 2 }
 0x180   : > { %v1448_v22 = vadd.f32 %v1349_v42, %v995_v27  ;;  %v2679_v27 = vsel %vm2676_vm6, %v2677_v44, %v2678_v30 }
 0x181   : > { %v898_v23 = vpop.f32.mrf.mxu1  ;;  %v6556_v6 = vpop.f32.mrf.mxu3 }
 0x182   : > { %v1900_v35 = vadd.f32 %v6491_v63, %v1448_v22  ;;  %v996_v49 = vadd.f32 %v898_v23, %v6252_v56  ;;  %v4169_v63 = vrot.slane %v5775_v33, 3  ;;  %v3616_v22 = vsel %vm3581_vm5, %v3606_v53, %v3615_v61 }
 0x183   : > { %v2680_v53 = vrot.slane %v5716_v60, 2 }
 0x184   : > { %v2389_v40 = vpop.f32.mrf.mxu0  ;;  %v6559_v16 = vadd.f32 %v2387_v13, %v1900_v35  ;;  %v3131_v13 = vsel %vm2676_vm6, %v3129_v58, %v3130_v5  ;;  %v4170_v56 = vsel %vm4167_vm7, %v4168_v34, %v4169_v63  ;;  %v3621_v35 = vshll.u32 %v5758_v36, 16 }
 0x185   : > { %v4171_v34 = vrot.slane %v5776_v15, 3 }
 0x186   : > { %v3623_v14 = vrot.slane %v3621_v35, 3  ;;  %v5777_v35 = vld [vmem:[%s5976_s26 + $0x28] sm:$0xff] }
 0x187   : > { %v1351_v50 = vpop.f32.mrf.mxu2 }
 0x188   : > { %v1449_v32 = vadd.f32 %v1351_v50, %v996_v49 }
 0x189   : > { %v901_v0 = vpop.f32.mrf.mxu1  ;;  %v6567_v20 = vpop.f32.mrf.mxu3 }
 0x18a   : > { %v1901_v4 = vadd.f32 %v6507_v25, %v1449_v32  ;;  %v997_v25 = vadd.f32 %v901_v0, %v6127_v43  ;;  %v3620_v43 = vrot.slane %v3618_v54, 2 }
 0x18c   : > { %v2392_v42 = vpop.f32.mrf.mxu0  ;;  %5285 = vmatmul.msk.bf16.vlgmr.msra.gmra.mxu1 %vm291_vm1, %v2679_v27  ;;  %5388 = vmatmul.msk.bf16.vlgmr.msra.gmra.mxu2 %vm291_vm1, %v3131_v13  ;;  %v6571_v11 = vadd.f32 %v2389_v40, %v1901_v4  ;;  %v2681_v27 = vsel %vm2676_vm6, %v2678_v30, %v2680_v53  ;;  %v3624_v13 = vor.u32 %v3623_v14, %v3620_v43 }
 0x18e   : > { %5493 = vmatmul.msk.bf16.gmra.mxu3 %vm291_vm1, %v3616_v22  ;;  %v3625_v30 = vsel %vm3581_vm5, %v3615_v61, %v3624_v13 }
 0x18f   : > { %5594 = vmatmul.msk.bf16.vlgmr.msra.gmra.mxu0 %vm291_vm1, %v4170_v56  ;;  %v1354_v7 = vpop.f32.mrf.mxu2  ;;  %v4172_v56 = vsel %vm4167_vm7, %v4169_v63, %v4171_v34 }
 0x190   : > { %v1450_v23 = vadd.f32 %v1354_v7, %v997_v25  ;;  %v5717_v7 = vld [vmem:[%s5976_s26 + $0x20] sm:$0xff] }
 0x191   : > { %v903_v26 = vpop.f32.mrf.mxu1  ;;  %v6582_v44 = vpop.f32.mrf.mxu3  ;;  %v2682_v61 = vrot.slane %v5717_v7, 2 }
 0x192   : > { %v1902_v33 = vadd.f32 %v6520_v17, %v1450_v23  ;;  %v998_v49 = vadd.f32 %v903_v26, %v6138_v57  ;;  %v3133_v17 = vsel %vm2676_vm6, %v3130_v5, %v3132_v45  ;;  %v5759_v5 = vld [vmem:[%s5976_s26 + $0x38] sm:$0xff]  ;;  %v5737_v23 = vld [vmem:[%s5976_s26 + $0x28] sm:$0xff] }
 0x193   : > { %v3627_v26 = vshrl.u32 %v5759_v5, 16  ;;  %v3630_v60 = vshll.u32 %v5759_v5, 16  ;;  %v3134_v15 = vrot.slane %v5737_v23, 2 }
 0x194   : > { %v2394_v40 = vpop.f32.mrf.mxu0  ;;  %v6584_v58 = vadd.f32 %v2392_v42, %v1902_v33 }
 0x195   : > { %v3632_v43 = vrot.slane %v3630_v60, 3  ;;  %v5778_v60 = vld [vmem:[%s5976_s26 + $0x30] sm:$0xff] }
 0x197   : > { %v1356_v50 = vpop.f32.mrf.mxu2 }
 0x198   : > { %v1451_v32 = vadd.f32 %v1356_v50, %v998_v49  ;;  %v4173_v49 = vrot.slane %v5777_v35, 3 }
 0x199   : > { %v906_v0 = vpop.f32.mrf.mxu1  ;;  %v6591_v22 = vpop.f32.mrf.mxu3 }
 0x19a   : > { %v1903_v4 = vadd.f32 %v6531_v10, %v1451_v32  ;;  %v999_v10 = vadd.f32 %v906_v0, %v6161_v8  ;;  %v3629_v8 = vrot.slane %v3627_v26, 2 }
 0x19c   : > { %v2397_v42 = vpop.f32.mrf.mxu0  ;;  %5286 = vmatmul.msk.bf16.gmra.mxu1 %vm291_vm1, %v2681_v27  ;;  %5389 = vmatmul.msk.bf16.gmra.mxu2 %vm291_vm1, %v3133_v17  ;;  %v6595_v57 = vadd.f32 %v2394_v40, %v1903_v4  ;;  %v2683_v27 = vsel %vm2676_vm6, %v2680_v53, %v2682_v61  ;;  %v3633_v17 = vor.u32 %v3632_v43, %v3629_v8 }
 0x19e   : > { %5494 = vmatmul.msk.bf16.gmra.mxu3 %vm291_vm1, %v3625_v30  ;;  %v3634_v53 = vsel %vm3581_vm5, %v3624_v13, %v3633_v17 }
 0x19f   : > { %5595 = vmatmul.msk.bf16.gmra.mxu0 %vm291_vm1, %v4172_v56  ;;  %v1359_v36 = vpop.f32.mrf.mxu2  ;;  %v4174_v56 = vsel %vm4167_vm7, %v4171_v34, %v4173_v49 }
 0x1a0   : > { %v1452_v25 = vadd.f32 %v1359_v36, %v999_v10  ;;  %v5718_v36 = vld [vmem:[%s5976_s26 + $0x28] sm:$0xff] }
 0x1a1   : > { %v908_v63 = vpop.f32.mrf.mxu1  ;;  %v6606_v33 = vpop.f32.mrf.mxu3  ;;  %v2684_v13 = vrot.slane %v5718_v36, 2 }
 0x1a2   : > { %v1904_v37 = vadd.f32 %v6556_v6, %v1452_v25  ;;  %v1000_v14 = vadd.f32 %v908_v63, %v6178_v24  ;;  %v3135_v6 = vsel %vm2676_vm6, %v3132_v45, %v3134_v15  ;;  %v5760_v45 = vld [vmem:[%s5976_s26 + $0x40] sm:$0xff]  ;;  %v5738_v25 = vld [vmem:[%s5976_s26 + $0x30] sm:$0xff] }
 0x1a3   : > { %v3636_v63 = vshrl.u32 %v5760_v45, 16  ;;  %v3639_v7 = vshll.u32 %v5760_v45, 16  ;;  %v3136_v35 = vrot.slane %v5738_v25, 2 }
 0x1a4   : > { %v2399_v54 = vpop.f32.mrf.mxu0  ;;  %v6608_v40 = vadd.f32 %v2397_v42, %v1904_v37 }
 0x1a5   : > { %v3641_v8 = vrot.slane %v3639_v7, 3  ;;  %v5779_v7 = vld [vmem:[%s5976_s26 + $0x38] sm:$0xff] }
 0x1a7   : > { %v1361_v50 = vpop.f32.mrf.mxu2 }
 0x1a8   : > { %v1453_v32 = vadd.f32 %v1361_v50, %v1000_v14  ;;  %v4175_v14 = vrot.slane %v5778_v60, 3 }
 0x1a9   : > { %v911_v0 = vpop.f32.mrf.mxu1  ;;  %v6615_v30 = vpop.f32.mrf.mxu3 }
 0x1aa   : > { %v1905_v4 = vadd.f32 %v6567_v20, %v1453_v32  ;;  %v1001_v20 = vadd.f32 %v911_v0, %v6195_v39  ;;  %v3638_v39 = vrot.slane %v3636_v63, 2 }
 0x1ac   : > { %v2402_v42 = vpop.f32.mrf.mxu0  ;;  %5287 = vmatmul.msk.bf16.gmra.mxu1 %vm291_vm1, %v2683_v27  ;;  %5390 = vmatmul.msk.bf16.gmra.mxu2 %vm291_vm1, %v3135_v6  ;;  %v6619_v24 = vadd.f32 %v2399_v54, %v1905_v4  ;;  %v2685_v27 = vsel %vm2676_vm6, %v2682_v61, %v2684_v13  ;;  %v3642_v6 = vor.u32 %v3641_v8, %v3638_v39 }
 0x1ae   : > { %5495 = vmatmul.msk.bf16.gmra.mxu3 %vm291_vm1, %v3634_v53  ;;  %v3643_v61 = vsel %vm3581_vm5, %v3633_v17, %v3642_v6 }
 0x1af   : > { %5596 = vmatmul.msk.bf16.gmra.mxu0 %vm291_vm1, %v4174_v56  ;;  %v1364_v5 = vpop.f32.mrf.mxu2  ;;  %v4176_v56 = vsel %vm4167_vm7, %v4173_v49, %v4175_v14 }
 0x1b0   : > { %v1454_v10 = vadd.f32 %v1364_v5, %v1001_v20  ;;  %v5719_v5 = vld [vmem:[%s5976_s26 + $0x30] sm:$0xff] }
 0x1b1   : > { %v913_v34 = vpop.f32.mrf.mxu1  ;;  %v6630_v37 = vpop.f32.mrf.mxu3  ;;  %v2686_v17 = vrot.slane %v5719_v5, 2 }
 0x1b2   : > { %v1906_v23 = vadd.f32 %v6582_v44, %v1454_v10  ;;  %v1002_v43 = vadd.f32 %v913_v34, %v6206_v59  ;;  %v3137_v44 = vsel %vm2676_vm6, %v3134_v15, %v3136_v35  ;;  %v5761_v15 = vld [vmem:[%s5976_s26 + $0x48] sm:$0xff]  ;;  %v5739_v10 = vld [vmem:[%s5976_s26 + $0x38] sm:$0xff] }
 0x1b3   : > { %v3645_v34 = vshrl.u32 %v5761_v15, 16  ;;  %v3648_v36 = vshll.u32 %v5761_v15, 16  ;;  %v3138_v60 = vrot.slane %v5739_v10, 2 }
 0x1b4   : > { %v2404_v26 = vpop.f32.mrf.mxu0  ;;  %v6632_v54 = vadd.f32 %v2402_v42, %v1906_v23 }
 0x1b5   : > { %v3650_v39 = vrot.slane %v3648_v36, 3  ;;  %v5780_v36 = vld [vmem:[%s5976_s26 + $0x40] sm:$0xff] }
 0x1b7   : > { %v1366_v50 = vpop.f32.mrf.mxu2 }
 0x1b8   : > { %v1455_v32 = vadd.f32 %v1366_v50, %v1002_v43  ;;  %v4177_v43 = vrot.slane %v5779_v7, 3 }
 0x1b9   : > { %v916_v0 = vpop.f32.mrf.mxu1  ;;  %v6639_v53 = vpop.f32.mrf.mxu3 }
 0x1ba   : > { %v1907_v4 = vadd.f32 %v6591_v22, %v1455_v32  ;;  %v1003_v22 = vadd.f32 %v916_v0, %v6223_v12  ;;  %v3647_v12 = vrot.slane %v3645_v34, 2 }
 0x1bc   : > { %v2407_v42 = vpop.f32.mrf.mxu0  ;;  %5288 = vmatmul.msk.bf16.gmra.mxu1 %vm291_vm1, %v2685_v27  ;;  %5391 = vmatmul.msk.bf16.gmra.mxu2 %vm291_vm1, %v3137_v44  ;;  %v6643_v59 = vadd.f32 %v2404_v26, %v1907_v4  ;;  %v2687_v27 = vsel %vm2676_vm6, %v2684_v13, %v2686_v17  ;;  %v3651_v44 = vor.u32 %v3650_v39, %v3647_v12 }
 0x1be   : > { %5496 = vmatmul.msk.bf16.gmra.mxu3 %vm291_vm1, %v3643_v61  ;;  %v3652_v13 = vsel %vm3581_vm5, %v3642_v6, %v3651_v44 }
 0x1bf   : > { %5597 = vmatmul.msk.bf16.gmra.mxu0 %vm291_vm1, %v4176_v56  ;;  %v1369_v45 = vpop.f32.mrf.mxu2  ;;  %v4178_v56 = vsel %vm4167_vm7, %v4175_v14, %v4177_v43 }
 0x1c0   : > { %v1456_v20 = vadd.f32 %v1369_v45, %v1003_v22  ;;  %v5720_v45 = vld [vmem:[%s5976_s26 + $0x38] sm:$0xff] }
 0x1c1   : > { %v918_v49 = vpop.f32.mrf.mxu1  ;;  %v6654_v23 = vpop.f32.mrf.mxu3  ;;  %v2688_v6 = vrot.slane %v5720_v45, 2 }
 0x1c2   : > { %v1908_v25 = vadd.f32 %v6606_v33, %v1456_v20  ;;  %v1004_v8 = vadd.f32 %v918_v49, %v6232_v31  ;;  %v3139_v33 = vsel %vm2676_vm6, %v3136_v35, %v3138_v60  ;;  %v5762_v35 = vld [vmem:[%s5976_s26 + $0x50] sm:$0xff]  ;;  %v5740_v20 = vld [vmem:[%s5976_s26 + $0x40] sm:$0xff] }
 0x1c3   : > { %v3654_v49 = vshrl.u32 %v5762_v35, 16  ;;  %v3657_v5 = vshll.u32 %v5762_v35, 16  ;;  %v3140_v7 = vrot.slane %v5740_v20, 2 }
 0x1c4   : > { %v2409_v63 = vpop.f32.mrf.mxu0  ;;  %v6656_v26 = vadd.f32 %v2407_v42, %v1908_v25 }
 0x1c5   : > { %v3659_v12 = vrot.slane %v3657_v5, 3  ;;  %v5781_v5 = vld [vmem:[%s5976_s26 + $0x48] sm:$0xff] }
 0x1c7   : > { %v1371_v50 = vpop.f32.mrf.mxu2 }
 0x1c8   : > { %v1457_v32 = vadd.f32 %v1371_v50, %v1004_v8  ;;  %v4179_v8 = vrot.slane %v5780_v36, 3 }
 0x1c9   : > { %v921_v0 = vpop.f32.mrf.mxu1  ;;  %v6663_v61 = vpop.f32.mrf.mxu3 }
 0x1ca   : > { %v1909_v4 = vadd.f32 %v6615_v30, %v1457_v32  ;;  %v1005_v30 = vadd.f32 %v921_v0, %v6249_v55  ;;  %v3656_v55 = vrot.slane %v3654_v49, 2 }
 0x1cc   : > { %v2412_v42 = vpop.f32.mrf.mxu0  ;;  %5289 = vmatmul.msk.bf16.gmra.mxu1 %vm291_vm1, %v2687_v27  ;;  %5392 = vmatmul.msk.bf16.gmra.mxu2 %vm291_vm1, %v3139_v33  ;;  %v6667_v31 = vadd.f32 %v2409_v63, %v1909_v4  ;;  %v2689_v27 = vsel %vm2676_vm6, %v2686_v17, %v2688_v6  ;;  %v3660_v33 = vor.u32 %v3659_v12, %v3656_v55 }
 0x1ce   : > { %5497 = vmatmul.msk.bf16.gmra.mxu3 %vm291_vm1, %v3652_v13  ;;  %v3661_v17 = vsel %vm3581_vm5, %v3651_v44, %v3660_v33 }
 0x1cf   : > { %5598 = vmatmul.msk.bf16.gmra.mxu0 %vm291_vm1, %v4178_v56  ;;  %v1374_v15 = vpop.f32.mrf.mxu2  ;;  %v4180_v56 = vsel %vm4167_vm7, %v4177_v43, %v4179_v8 }
 0x1d0   : > { %v1458_v22 = vadd.f32 %v1374_v15, %v1005_v30  ;;  %v5721_v15 = vld [vmem:[%s5976_s26 + $0x40] sm:$0xff] }
 0x1d1   : > { %v923_v14 = vpop.f32.mrf.mxu1  ;;  %v6678_v25 = vpop.f32.mrf.mxu3  ;;  %v2690_v44 = vrot.slane %v5721_v15, 2 }
 0x1d2   : > { %v1910_v10 = vadd.f32 %v6630_v37, %v1458_v22  ;;  %v1006_v39 = vadd.f32 %v923_v14, %v6260_v21  ;;  %v3141_v37 = vsel %vm2676_vm6, %v3138_v60, %v3140_v7  ;;  %v5763_v60 = vld [vmem:[%s5976_s26 + $0x58] sm:$0xff]  ;;  %v5741_v22 = vld [vmem:[%s5976_s26 + $0x48] sm:$0xff] }
 0x1d3   : > { %v3663_v14 = vshrl.u32 %v5763_v60, 16  ;;  %v3666_v45 = vshll.u32 %v5763_v60, 16  ;;  %v3142_v36 = vrot.slane %v5741_v22, 2 }
 0x1d4   : > { %v2414_v34 = vpop.f32.mrf.mxu0  ;;  %v6680_v63 = vadd.f32 %v2412_v42, %v1910_v10 }
 0x1d5   : > { %v3668_v55 = vrot.slane %v3666_v45, 3  ;;  %v5782_v45 = vld [vmem:[%s5976_s26 + $0x50] sm:$0xff] }
 0x1d7   : > { %v1376_v50 = vpop.f32.mrf.mxu2 }
 0x1d8   : > { %v1459_v32 = vadd.f32 %v1376_v50, %v1006_v39  ;;  %v4181_v39 = vrot.slane %v5781_v5, 3 }
 0x1d9   : > { %v926_v0 = vpop.f32.mrf.mxu1  ;;  %v6687_v13 = vpop.f32.mrf.mxu3 }
 0x1da   : > { %v1911_v4 = vadd.f32 %v6639_v53, %v1459_v32  ;;  %v1007_v53 = vadd.f32 %v926_v0, %v6135_v51  ;;  %v3665_v51 = vrot.slane %v3663_v14, 2 }
 0x1dc   : > { %v2417_v42 = vpop.f32.mrf.mxu0  ;;  %5290 = vmatmul.msk.bf16.gmra.mxu1 %vm291_vm1, %v2689_v27  ;;  %5393 = vmatmul.msk.bf16.gmra.mxu2 %vm291_vm1, %v3141_v37  ;;  %v6691_v21 = vadd.f32 %v2414_v34, %v1911_v4  ;;  %v2691_v27 = vsel %vm2676_vm6, %v2688_v6, %v2690_v44  ;;  %v3669_v37 = vor.u32 %v3668_v55, %v3665_v51  ;;  %v6999_v55 = vld [vmem:[#allocation3_spill] sm:$0xff] }
 0x1de   : > { %5498 = vmatmul.msk.bf16.gmra.mxu3 %vm291_vm1, %v3661_v17  ;;  %v3670_v6 = vsel %vm3581_vm5, %v3660_v33, %v3669_v37 }
 0x1df   : > { %5599 = vmatmul.msk.bf16.gmra.mxu0 %vm291_vm1, %v4180_v56  ;;  %v1379_v35 = vpop.f32.mrf.mxu2  ;;  %v4182_v56 = vsel %vm4167_vm7, %v4179_v8, %v4181_v39 }
 0x1e0   : > { %v1460_v30 = vadd.f32 %v1379_v35, %v1007_v53  ;;  %v5722_v35 = vld [vmem:[%s5976_s26 + $0x48] sm:$0xff] }
 0x1e1   : > { %v928_v43 = vpop.f32.mrf.mxu1  ;;  %v6702_v10 = vpop.f32.mrf.mxu3  ;;  %v2692_v33 = vrot.slane %v5722_v35, 2  ;;  %v5723_v35 = vld [vmem:[%s5976_s26 + $0x50] sm:$0xff] }
 0x1e2   : > { %v1912_v20 = vadd.f32 %v6654_v23, %v1460_v30  ;;  %v1008_v12 = vadd.f32 %v928_v43, %v6148_v1  ;;  %v3143_v23 = vsel %vm2676_vm6, %v3140_v7, %v3142_v36  ;;  %v5764_v7 = vld [vmem:[%s5976_s26 + $0x60] sm:$0xff]  ;;  %v5742_v30 = vld [vmem:[%s5976_s26 + $0x50] sm:$0xff] }
 0x1e3   : > { %v3672_v43 = vshrl.u32 %v5764_v7, 16  ;;  %v3675_v15 = vshll.u32 %v5764_v7, 16  ;;  %v3144_v5 = vrot.slane %v5742_v30, 2  ;;  %v5743_v30 = vld [vmem:[%s5976_s26 + $0x58] sm:$0xff] }
 0x1e4   : > { %v2419_v49 = vpop.f32.mrf.mxu0  ;;  %v6704_v34 = vadd.f32 %v2417_v42, %v1912_v20 }
 0x1e5   : > { %v3677_v51 = vrot.slane %v3675_v15, 3 }
 0x1e7   : > { %v1381_v50 = vpop.f32.mrf.mxu2 }
 0x1e8   : > { %v1461_v32 = vadd.f32 %v1381_v50, %v1008_v12  ;;  %v4183_v50 = vrot.slane %v5782_v45, 3  ;;  %v5783_v45 = vld [vmem:[%s5976_s26 + $0x58] sm:$0xff] }
 0x1e9   : > { %v931_v0 = vpop.f32.mrf.mxu1  ;;  %v6711_v17 = vpop.f32.mrf.mxu3 }
 0x1ea   : > { %v1913_v4 = vadd.f32 %v6663_v61, %v1461_v32  ;;  %v1009_v61 = vadd.f32 %v931_v0, %v6175_v18  ;;  %v3674_v18 = vrot.slane %v3672_v43, 2 }
 0x1ec   : > { %v2422_v42 = vpop.f32.mrf.mxu0  ;;  %5291 = vmatmul.msk.bf16.gmra.mxu1 %vm291_vm1, %v2691_v27  ;;  %5394 = vmatmul.msk.bf16.gmra.mxu2 %vm291_vm1, %v3143_v23  ;;  %v6715_v1 = vadd.f32 %v2419_v49, %v1913_v4  ;;  %v2693_v23 = vsel %vm2676_vm6, %v2690_v44, %v2692_v33  ;;  %v3678_v4 = vor.u32 %v3677_v51, %v3674_v18 }
 0x1ee   : > { %5499 = vmatmul.msk.bf16.gmra.mxu3 %vm291_vm1, %v3670_v6  ;;  %v4184_v6 = vsel %vm4167_vm7, %v4181_v39, %v4183_v50  ;;  %v3679_v44 = vsel %vm3581_vm5, %v3669_v37, %v3678_v4  ;;  %v2694_v37 = vrot.slane %v5723_v35, 2  ;;  %v5724_v35 = vld [vmem:[%s5976_s26 + $0x58] sm:$0xff] }
 0x1ef   : > { %5600 = vmatmul.msk.bf16.gmra.mxu0 %vm291_vm1, %v4182_v56  ;;  %v1384_v60 = vpop.f32.mrf.mxu2 }
 0x1f0   : > { %v1462_v53 = vadd.f32 %v1384_v60, %v1009_v61  ;;  %v7000_v60 = vld [vmem:[#allocation4_spill] sm:$0xff] }
 0x1f1   : > { %v933_v8 = vpop.f32.mrf.mxu1  ;;  %v6726_v20 = vpop.f32.mrf.mxu3 }
 0x1f2   : > { %v1914_v22 = vadd.f32 %v6678_v25, %v1462_v53  ;;  %v1010_v12 = vadd.f32 %v933_v8, %v6999_v55  ;;  %v3145_v25 = vsel %vm2676_vm6, %v3142_v36, %v3144_v5  ;;  %v5765_v36 = vld [vmem:[%s5976_s26 + $0x68] sm:$0xff]  ;;  %v3146_v55 = vrot.slane %v5743_v30, 2  ;;  %v5744_v30 = vld [vmem:[%s5976_s26 + $0x60] sm:$0xff] }
 0x1f3   : > { %v3681_v43 = vshrl.u32 %v5765_v36, 16  ;;  %v3684_v15 = vshll.u32 %v5765_v36, 16 }
 0x1f4   : > { %v2424_v14 = vpop.f32.mrf.mxu0  ;;  %v6728_v49 = vadd.f32 %v2422_v42, %v1914_v22 }
 0x1f7   : > { %v1386_v32 = vpop.f32.mrf.mxu2 }
 0x1f8   : > { %v1463_v0 = vadd.f32 %v1386_v32, %v1010_v12  ;;  %v3683_v12 = vrot.slane %v3681_v43, 2  ;;  %v3686_v32 = vrot.slane %v3684_v15, 3 }
 0x1f9   : > { %v936_v27 = vpop.f32.mrf.mxu1  ;;  %v6735_v7 = vpop.f32.mrf.mxu3 }
 0x1fa   : > { %v1915_v42 = vadd.f32 %v6687_v13, %v1463_v0  ;;  %v1011_v13 = vadd.f32 %v936_v27, %v7000_v60  ;;  %v7001_v0 = vld [vmem:[#allocation5_spill] sm:$0xff]  ;;  %v3687_v36 = vor.u32 %v3686_v32, %v3683_v12  ;;  %v5784_v12 = vld [vmem:[%s5976_s26 + $0x60] sm:$0xff]  ;;  %v2696_v32 = vrot.slane %v5724_v35, 2 }
 0x1fc   : > { %v2427_v56 = vpop.f32.mrf.mxu0  ;;  %5292 = vmatmul.msk.bf16.gmra.mxu1 %vm291_vm1, %v2693_v23  ;;  %5395 = vmatmul.msk.bf16.gmra.mxu2 %vm291_vm1, %v3145_v25  ;;  %v6739_v61 = vadd.f32 %v2424_v14, %v1915_v42  ;;  %v4185_v23 = vrot.slane %v5783_v45, 3 }
 0x1fe   : > { %5500 = vmatmul.msk.bf16.gmra.mxu3 %vm291_vm1, %v3679_v44  ;;  %v2695_v44 = vsel %vm2676_vm6, %v2692_v33, %v2694_v37  ;;  %v3688_v33 = vsel %vm3581_vm5, %v3678_v4, %v3687_v36 }
 0x1ff   : > { %5601 = vmatmul.msk.bf16.gmra.mxu0 %vm291_vm1, %v4184_v6  ;;  %v1389_v53 = vpop.f32.mrf.mxu2 }
 0x200   : > { %v1464_v8 = vadd.f32 %v1389_v53, %v1011_v13  ;;  %v4186_v13 = vsel %vm4167_vm7, %v4183_v50, %v4185_v23 }
 0x201   : > { %v938_v39 = vpop.f32.mrf.mxu1  ;;  %v6750_v18 = vpop.f32.mrf.mxu3 }
 0x202   : > { %v1916_v22 = vadd.f32 %v6702_v10, %v1464_v8  ;;  %v1012_v27 = vadd.f32 %v938_v39, %v7001_v0  ;;  %v3147_v10 = vsel %vm2676_vm6, %v3144_v5, %v3146_v55  ;;  %v5766_v5 = vld [vmem:[%s5976_s26 + $0x70] sm:$0xff]  ;;  %v3148_v0 = vrot.slane %v5744_v30, 2 }
 0x203   : > { %v3690_v43 = vshrl.u32 %v5766_v5, 16  ;;  %v3693_v15 = vshll.u32 %v5766_v5, 16 }
 0x204   : > { %v2429_v14 = vpop.f32.mrf.mxu0  ;;  %v6752_v51 = vadd.f32 %v2427_v56, %v1916_v22 }
 0x205   : > { %v3692_v4 = vrot.slane %v3690_v43, 2 }
 0x207   : > { %v1391_v25 = vpop.f32.mrf.mxu2 }
 0x208   : > { %v1465_v42 = vadd.f32 %v1391_v25, %v1012_v27  ;;  %v3695_v27 = vrot.slane %v3693_v15, 3  ;;  %v5725_v15 = vld [vmem:[%s5976_s26 + $0x60] sm:$0xff] }
 0x209   : > { %v2795_v6 = vpop.f32.mrf.mxu1  ;;  %v6759_v53 = vpop.f32.mrf.mxu3 }
 0x20a   : > { %v1917_v56 = vadd.f32 %v6711_v17, %v1465_v42  ;;  %v2921_v17 = vadd.f32 %v2795_v6, %v6278_v38  ;;  %v4187_v42 = vrot.slane %v5784_v12, 3 }
 0x20c   : > { %v4286_v60 = vpop.f32.mrf.mxu0  ;;  %5293 = vmatmul.msk.bf16.gmra.mxu1 %vm291_vm1, %v2695_v44  ;;  %5396 = vmatmul.msk.bf16.gmra.mxu2 %vm291_vm1, %v3147_v10  ;;  %v6763_v8 = vadd.f32 %v2429_v14, %v1917_v56  ;;  %v2697_v56 = vsel %vm2676_vm6, %v2694_v37, %v2696_v32  ;;  %v4188_v35 = vsel %vm4167_vm7, %v4185_v23, %v4187_v42 }
 0x20e   : > { %5501 = vmatmul.msk.bf16.gmra.mxu3 %vm291_vm1, %v3688_v33  ;;  %v3696_v33 = vor.u32 %v3695_v27, %v3692_v4  ;;  %v5785_v27 = vld [vmem:[%s5976_s26 + $0x68] sm:$0xff] }
 0x20f   : > { %5602 = vmatmul.msk.bf16.gmra.mxu0 %vm291_vm1, %v4186_v13  ;;  %v3247_v39 = vpop.f32.mrf.mxu2  ;;  %v3149_v13 = vsel %vm2676_vm6, %v3146_v55, %v3148_v0  ;;  %v5767_v55 = vld [vmem:[%s5976_s26 + $0x78] sm:$0xff] }
 0x210   : > { %v3373_v22 = vadd.f32 %v3247_v39, %v2921_v17  ;;  %v3697_v37 = vsel %vm3581_vm5, %v3687_v36, %v3696_v33  ;;  %v3699_v36 = vshrl.u32 %v5767_v55, 16 }
 0x211   : > { %v2797_v50 = vpop.f32.mrf.mxu1  ;;  %v6773_v14 = vpop.f32.mrf.mxu3 }
 0x212   : > { %v3959_v25 = vadd.f32 %v6726_v20, %v3373_v22  ;;  %v2922_v38 = vadd.f32 %v2797_v50, %v6291_v48  ;;  %v5745_v22 = vld [vmem:[%s5976_s26 + $0x68] sm:$0xff] }
 0x214   : > { %v4288_v45 = vpop.f32.mrf.mxu0  ;;  %v4412_v5 = vadd.f32 %v4286_v60, %v3959_v25 }
 0x217   : > { %v3249_v6 = vpop.f32.mrf.mxu2 }
 0x218   : > { %v3374_v44 = vadd.f32 %v3249_v6, %v2922_v38  ;;  %v2698_v38 = vrot.slane %v5725_v15, 2  ;;  %v3150_v6 = vrot.slane %v5745_v22, 2  ;;  %v5726_v22 = vld [vmem:[%s5976_s26 + $0x68] sm:$0xff] }
 0x219   : > { %v2800_v10 = vpop.f32.mrf.mxu1  ;;  %v6782_v20 = vpop.f32.mrf.mxu3 }
 0x21a   : > { %v3960_v39 = vadd.f32 %v6735_v7, %v3374_v44  ;;  %v4520_v7 = vmax.f32 %v4412_v5, 0.0  ;;  %v2923_v30 = vadd.f32 %v2800_v10, %v6307_v62  ;;  %v3701_v44 = vrot.slane %v3699_v36, 2  ;;  %v5746_v36 = vld [vmem:[%s5976_s26 + $0x70] sm:$0xff] }
 0x21b   : > { %v4189_v10 = vrot.slane %v5785_v27, 3 }
 0x21c   : > { %v4291_v17 = vpop.f32.mrf.mxu0  ;;  %v4413_v48 = vadd.f32 %v4288_v45, %v3960_v39  ;;  %5294 = vmatmul.msk.bf16.gmra.mxu1 %vm291_vm1, %v2697_v56  ;;  %5397 = vmatmul.msk.bf16.gmra.mxu2 %vm291_vm1, %v3149_v13  ;;  %v3702_v45 = vshll.u32 %v5767_v55, 16 }
 0x21e   : > { %v4521_v60 = vmax.f32 %v4413_v48, 0.0  ;;  %5502 = vmatmul.msk.bf16.gmra.mxu3 %vm291_vm1, %v3697_v37  ;;  %v3704_v56 = vrot.slane %v3702_v45, 3  ;;  %v2699_v48 = vsel %vm2676_vm6, %v2696_v32, %v2698_v38  ;;  %v3151_v37 = vsel %vm2676_vm6, %v3148_v0, %v3150_v6  ;;  %v5768_v0 = vld [vmem:[%s5976_s26 + $0x80] sm:$0xff] }
 0x21f   : > { %5603 = vmatmul.msk.bf16.gmra.mxu0 %vm291_vm1, %v4188_v35  ;;  %v3252_v23 = vpop.f32.mrf.mxu2  ;;  %v3708_v45 = vshrl.u32 %v5768_v0, 16 }
 0x220   : > { %v5797_v50 = vpack.c.bf16 %v4521_v60, %v4520_v7  ;;  %v3375_v12 = vadd.f32 %v3252_v23, %v2923_v30  ;;  %v3705_v55 = vor.u32 %v3704_v56, %v3701_v44  ;;  %v5786_v44 = vld [vmem:[%s5976_s26 + $0x70] sm:$0xff]  ;;  %v2700_v56 = vrot.slane %v5726_v22, 2  ;;  %v5747_v22 = vld [vmem:[%s5976_s26 + $0x78] sm:$0xff] }
 0x221   : > { %v2802_v43 = vpop.f32.mrf.mxu1  ;;  %v6800_v25 = vpop.f32.mrf.mxu3 }
 0x222   : > { %5798 = vst [vmem:[%s6792_s10] sm:$0xff] %v5797_v50   ;;  %v3961_v13 = vadd.f32 %v6750_v18, %v3375_v12  ;;  %v2924_v62 = vadd.f32 %v2802_v43, %v6327_v28  ;;  %v4190_v50 = vsel %vm4167_vm7, %v4187_v42, %v4189_v10  ;;  %v3706_v32 = vsel %vm3581_vm5, %v3696_v33, %v3705_v55 }
 0x223   : > { %v3711_v12 = vshll.u32 %v5768_v0, 16 }
 0x224   : > { %v4293_v4 = vpop.f32.mrf.mxu0  ;;  %v4414_v7 = vadd.f32 %v4291_v17, %v3961_v13  ;;  %v3152_v13 = vrot.slane %v5746_v36, 2 }
 0x227   : > { %v3254_v5 = vpop.f32.mrf.mxu2 }
 0x228   : > { %v3376_v39 = vadd.f32 %v3254_v5, %v2924_v62  ;;  %v3710_v62 = vrot.slane %v3708_v45, 2  ;;  %v3713_v5 = vrot.slane %v3711_v12, 3 }
 0x229   : > { %v2805_v35 = vpop.f32.mrf.mxu1  ;;  %v6808_v18 = vpop.f32.mrf.mxu3 }
 0x22a   : > { %v3962_v60 = vadd.f32 %v6759_v53, %v3376_v39  ;;  %v4522_v53 = vmax.f32 %v4414_v7, 0.0  ;;  %v2925_v42 = vadd.f32 %v2805_v35, %v6351_v3  ;;  %v4191_v35 = vrot.slane %v5786_v44, 3 }
 0x22c   : > { %v4296_v23 = vpop.f32.mrf.mxu0  ;;  %v4415_v28 = vadd.f32 %v4293_v4, %v3962_v60  ;;  %5295 = vmatmul.msk.bf16.gmra.mxu1 %vm291_vm1, %v2699_v48  ;;  %5398 = vmatmul.msk.bf16.gmra.mxu2 %vm291_vm1, %v3151_v37  ;;  %v2701_v60 = vsel %vm2676_vm6, %v2698_v38, %v2700_v56 }
 0x22e   : > { %v4523_v17 = vmax.f32 %v4415_v28, 0.0  ;;  %5503 = vmatmul.msk.bf16.gmra.mxu3 %vm291_vm1, %v3706_v32  ;;  %v3714_v28 = vor.u32 %v3713_v5, %v3710_v62  ;;  %v3154_v62 = vrot.slane %v5747_v22, 2 }
 0x22f   : > { %5604 = vmatmul.msk.bf16.gmra.mxu0 %vm291_vm1, %v4190_v50  ;;  %v3257_v30 = vpop.f32.mrf.mxu2  ;;  %v3153_v50 = vsel %vm2676_vm6, %v3150_v6, %v3152_v13  ;;  %v5769_v6 = vld [vmem:[%s5976_s26 + $0x88] sm:$0xff] }
 0x230   : > { %v5802_v43 = vpack.c.bf16 %v4523_v17, %v4522_v53  ;;  %v3377_v4 = vadd.f32 %v3257_v30, %v2925_v42  ;;  %v4192_v17 = vsel %vm4167_vm7, %v4189_v10, %v4191_v35  ;;  %v3715_v38 = vsel %vm3581_vm5, %v3705_v55, %v3714_v28 }
 0x231   : > { %v2807_v15 = vpop.f32.mrf.mxu1  ;;  %v6821_v33 = vpop.f32.mrf.mxu3  ;;  %v3717_v36 = vshrl.u32 %v5769_v6, 16  ;;  %v3720_v45 = vshll.u32 %v5769_v6, 16 }
 0x232   : > { %5884 = vst [vmem:[%s6792_s10 + $0x8] sm:$0xff] %v5802_v43   ;;  %v3963_v39 = vadd.f32 %v6773_v14, %v3377_v4  ;;  %v2926_v3 = vadd.f32 %v2807_v15, %v6364_v46  ;;  %v5727_v15 = vld [vmem:[%s5976_s26 + $0x70] sm:$0xff] }
 0x233   : > { %v2702_v44 = vrot.slane %v5727_v15, 2  ;;  %v3719_v5 = vrot.slane %v3717_v36, 2 }
 0x234   : > { %v4298_v27 = vpop.f32.mrf.mxu0  ;;  %v4416_v32 = vadd.f32 %v4296_v23, %v3963_v39  ;;  %v3722_v39 = vrot.slane %v3720_v45, 3  ;;  %v5788_v45 = vld [vmem:[%s5976_s26 + $0x80] sm:$0xff] }
 0x237   : > { %v3259_v48 = vpop.f32.mrf.mxu2 }
 0x238   : > { %v3378_v37 = vadd.f32 %v3259_v48, %v2926_v3 }
 0x239   : > { %v2810_v7 = vpop.f32.mrf.mxu1  ;;  %v6829_v14 = vpop.f32.mrf.mxu3 }
 0x23a   : > { %v3964_v0 = vadd.f32 %v6782_v20, %v3378_v37  ;;  %v4524_v20 = vmax.f32 %v4416_v32, 0.0  ;;  %v2927_v10 = vadd.f32 %v2810_v7, %v6376_v2  ;;  %v3155_v32 = vsel %vm2676_vm6, %v3152_v13, %v3154_v62  ;;  %v5770_v13 = vld [vmem:[%s5976_s26 + $0x90] sm:$0xff] }
 0x23b   : > { %v3729_v15 = vshll.u32 %v5770_v13, 16 }
 0x23c   : > { %v4301_v53 = vpop.f32.mrf.mxu0  ;;  %v4417_v46 = vadd.f32 %v4298_v27, %v3964_v0  ;;  %5296 = vmatmul.msk.bf16.gmra.mxu1 %vm291_vm1, %v2701_v60  ;;  %5399 = vmatmul.msk.bf16.gmra.mxu2 %vm291_vm1, %v3153_v50  ;;  %v5787_v27 = vld [vmem:[%s5976_s26 + $0x78] sm:$0xff]  ;;  %v2703_v50 = vsel %vm2676_vm6, %v2700_v56, %v2702_v44  ;;  %v3723_v0 = vor.u32 %v3722_v39, %v3719_v5 }
 0x23d   : > { %v4193_v48 = vrot.slane %v5787_v27, 3  ;;  %v3731_v5 = vrot.slane %v3729_v15, 3  ;;  %v5789_v15 = vld [vmem:[%s5976_s26 + $0x88] sm:$0xff] }
 0x23e   : > { %v4525_v23 = vmax.f32 %v4417_v46, 0.0  ;;  %5504 = vmatmul.msk.bf16.gmra.mxu3 %vm291_vm1, %v3715_v38  ;;  %v3724_v56 = vsel %vm3581_vm5, %v3714_v28, %v3723_v0 }
 0x23f   : > { %5605 = vmatmul.msk.bf16.gmra.mxu0 %vm291_vm1, %v4192_v17  ;;  %v3262_v30 = vpop.f32.mrf.mxu2  ;;  %v4194_v6 = vsel %vm4167_vm7, %v4191_v35, %v4193_v48 }
 0x240   : > { %v5807_v43 = vpack.c.bf16 %v4525_v23, %v4524_v20  ;;  %v3379_v12 = vadd.f32 %v3262_v30, %v2927_v10  ;;  %v5748_v10 = vld [vmem:[%s5976_s26 + $0x80] sm:$0xff] }
 0x241   : > { %v2812_v42 = vpop.f32.mrf.mxu1  ;;  %v6842_v55 = vpop.f32.mrf.mxu3 }
 0x242   : > { %5885 = vst [vmem:[%s6792_s10 + $0x10] sm:$0xff] %v5807_v43   ;;  %v3965_v3 = vadd.f32 %v6800_v25, %v3379_v12  ;;  %v2928_v2 = vadd.f32 %v2812_v42, %v6389_v19  ;;  %v5728_v43 = vld [vmem:[%s5976_s26 + $0x78] sm:$0xff]  ;;  %v3726_v42 = vshrl.u32 %v5770_v13, 16 }
 0x243   : > { %v2704_v12 = vrot.slane %v5728_v43, 2 }
 0x244   : > { %v4303_v4 = vpop.f32.mrf.mxu0  ;;  %v4418_v17 = vadd.f32 %v4301_v53, %v3965_v3  ;;  %v3728_v27 = vrot.slane %v3726_v42, 2 }
 0x247   : > { %v3264_v37 = vpop.f32.mrf.mxu2 }
 0x248   : > { %v3380_v7 = vadd.f32 %v3264_v37, %v2928_v2  ;;  %v4195_v2 = vrot.slane %v5788_v45, 3 }
 0x249   : > { %v2815_v60 = vpop.f32.mrf.mxu1  ;;  %v6850_v25 = vpop.f32.mrf.mxu3 }
 0x24a   : > { %v3966_v46 = vadd.f32 %v6808_v18, %v3380_v7  ;;  %v4526_v18 = vmax.f32 %v4418_v17, 0.0  ;;  %v2929_v35 = vadd.f32 %v2815_v60, %v6400_v47  ;;  %v7002_v47 = vld [vmem:[#allocation6_spill] sm:$0xff]  ;;  %v3732_v17 = vor.u32 %v3731_v5, %v3728_v27 }
 0x24c   : > { %v4306_v38 = vpop.f32.mrf.mxu0  ;;  %v4419_v19 = vadd.f32 %v4303_v4, %v3966_v46  ;;  %5297 = vmatmul.msk.bf16.gmra.mxu1 %vm291_vm1, %v2703_v50  ;;  %5400 = vmatmul.msk.bf16.gmra.mxu2 %vm291_vm1, %v3155_v32  ;;  %v3156_v4 = vrot.slane %v5748_v10, 2  ;;  %v2705_v50 = vsel %vm2676_vm6, %v2702_v44, %v2704_v12  ;;  %v3733_v44 = vsel %vm3581_vm5, %v3723_v0, %v3732_v17 }
 0x24e   : > { %v4527_v53 = vmax.f32 %v4419_v19, 0.0  ;;  %5505 = vmatmul.msk.bf16.gmra.mxu3 %vm291_vm1, %v3724_v56  ;;  %v3157_v32 = vsel %vm2676_vm6, %v3154_v62, %v3156_v4  ;;  %v4196_v56 = vsel %vm4167_vm7, %v4193_v48, %v4195_v2  ;;  %v5771_v62 = vld [vmem:[%s5976_s26 + $0x98] sm:$0xff]  ;;  %v7003_v48 = vld [vmem:[#allocation7_spill] sm:$0xff] }
 0x24f   : > { %5606 = vmatmul.msk.bf16.gmra.mxu0 %vm291_vm1, %v4194_v6  ;;  %v3267_v20 = vpop.f32.mrf.mxu2  ;;  %v3735_v43 = vshrl.u32 %v5771_v62, 16  ;;  %v3738_v10 = vshll.u32 %v5771_v62, 16 }
 0x250   : > { %v5812_v23 = vpack.c.bf16 %v4527_v53, %v4526_v18  ;;  %v3381_v22 = vadd.f32 %v3267_v20, %v2929_v35  ;;  %v6881_v35 = vld [vmem:[%s5976_s26 + $0x80] sm:$0xff] }
 0x251   : > { %v2817_v30 = vpop.f32.mrf.mxu1  ;;  %v6863_v28 = vpop.f32.mrf.mxu3  ;;  %v3737_v27 = vrot.slane %v3735_v43, 2  ;;  %v3740_v5 = vrot.slane %v3738_v10, 3 }
 0x252   : > { %5886 = vst [vmem:[%s6792_s10 + $0x18] sm:$0xff] %v5812_v23   ;;  %v3967_v39 = vadd.f32 %v6821_v33, %v3381_v22  ;;  %v2930_v3 = vadd.f32 %v2817_v30, %v7002_v47  ;;  %v6884_v30 = vld [vmem:[%s5976_s26 + $0x88] sm:$0xff] }
 0x253   : > { %v3158_v45 = vrot.slane %v6884_v30, 2  ;;  %v7004_v47 = vld [vmem:[#allocation8_spill] sm:$0xff]  ;;  %v5750_v30 = vld [vmem:[%s5976_s26 + $0x90] sm:$0xff] }
 0x254   : > { %v4308_v36 = vpop.f32.mrf.mxu0  ;;  %v4420_v46 = vadd.f32 %v4306_v38, %v3967_v39 }
 0x257   : > { %v3269_v37 = vpop.f32.mrf.mxu2 }
 0x258   : > { %v3382_v7 = vadd.f32 %v3269_v37, %v2930_v3  ;;  %v4197_v37 = vrot.slane %v5789_v15, 3  ;;  %v5790_v15 = vld [vmem:[%s5976_s26 + $0x90] sm:$0xff] }
 0x259   : > { %v2820_v60 = vpop.f32.mrf.mxu1  ;;  %v6871_v33 = vpop.f32.mrf.mxu3 }
 0x25a   : > { %v3968_v6 = vadd.f32 %v6829_v14, %v3382_v7  ;;  %v4528_v14 = vmax.f32 %v4420_v46, 0.0  ;;  %v2931_v20 = vadd.f32 %v2820_v60, %v7003_v48  ;;  %v3159_v46 = vsel %vm2676_vm6, %v3156_v4, %v3158_v45  ;;  %v7005_v48 = vld [vmem:[#allocation9_spill] sm:$0xff] }
 0x25b   : > { %v4198_v62 = vsel %vm4167_vm7, %v4195_v2, %v4197_v37 }
 0x25c   : > { %v4311_v19 = vpop.f32.mrf.mxu0  ;;  %v4421_v13 = vadd.f32 %v4308_v36, %v3968_v6  ;;  %5298 = vmatmul.msk.bf16.gmra.mxu1 %vm291_vm1, %v2705_v50  ;;  %5401 = vmatmul.msk.bf16.gmra.mxu2 %vm291_vm1, %v3157_v32  ;;  %v2706_v36 = vrot.slane %v6881_v35, 2  ;;  %v3741_v6 = vor.u32 %v3740_v5, %v3737_v27  ;;  %v5730_v35 = vld [vmem:[%s5976_s26 + $0x88] sm:$0xff]  ;;  %v3160_v5 = vrot.slane %v5750_v30, 2 }
 0x25d   : > { %v2708_v27 = vrot.slane %v5730_v35, 2  ;;  %v5791_v35 = vld [vmem:[%s5976_s26 + $0x98] sm:$0xff] }
 0x25e   : > { %v4529_v38 = vmax.f32 %v4421_v13, 0.0  ;;  %5506 = vmatmul.msk.bf16.gmra.mxu3 %vm291_vm1, %v3733_v44  ;;  %v2707_v32 = vsel %vm2676_vm6, %v2704_v12, %v2706_v36  ;;  %v3742_v12 = vsel %vm3581_vm5, %v3732_v17, %v3741_v6 }
 0x25f   : > { %5607 = vmatmul.msk.bf16.gmra.mxu0 %vm291_vm1, %v4196_v56  ;;  %v3272_v18 = vpop.f32.mrf.mxu2 }
 0x260   : > { %v5817_v53 = vpack.c.bf16 %v4529_v38, %v4528_v14  ;;  %v3383_v42 = vadd.f32 %v3272_v18, %v2931_v20  ;;  %v3481_v14 = vld [vmem:[%s5976_s26 + $0xa0] sm:$0x7] }
 0x261   : > { %v2822_v23 = vpop.f32.mrf.mxu1  ;;  %v6888_v22 = vpop.f32.mrf.mxu3  ;;  %v3561_v38 = vunpack.c.l.b16 %v3481_v14 }
 0x262   : > { %5887 = vst [vmem:[%s6792_s10 + $0x20] sm:$0xff] %v5817_v53   ;;  %v3969_v39 = vadd.f32 %v6842_v55, %v3383_v42  ;;  %v2932_v3 = vadd.f32 %v2822_v23, %v7004_v47 }
 0x264   : > { %v4313_v0 = vpop.f32.mrf.mxu0  ;;  %v4422_v56 = vadd.f32 %v4311_v19, %v3969_v39 }
 0x266   : > { %v4530_v4 = vmax.f32 %v4422_v56, 0.0 }
 0x267   : > { %v3274_v7 = vpop.f32.mrf.mxu2 }
 0x268   : > { %v3384_v60 = vadd.f32 %v3274_v7, %v2932_v3  ;;  %v7006_v7 = vld [vmem:[#allocation10_spill] sm:$0xff] }
 0x269   : > { %v2825_v50 = vpop.f32.mrf.mxu1  ;;  %v6899_v55 = vpop.f32.mrf.mxu3 }
 0x26a   : > { %v3970_v13 = vadd.f32 %v6850_v25, %v3384_v60  ;;  %v3580_v25 = vpack.c.b16 %v3561_v38, %v3561_v38  ;;  %v2933_v20 = vadd.f32 %v2825_v50, %v7005_v48  ;;  %v4199_v50 = vrot.slane %v5790_v15, 3  ;;  %v5751_v48 = vld [vmem:[%s5976_s26 + $0x98] sm:$0xff] }
 0x26c   : > { %v4316_v44 = vpop.f32.mrf.mxu0  ;;  %v4423_v18 = vadd.f32 %v4313_v0, %v3970_v13  ;;  %5299 = vmatmul.msk.bf16.gmra.mxu1 %vm291_vm1, %v2707_v32  ;;  %5402 = vmatmul.msk.bf16.gmra.mxu2 %vm291_vm1, %v3159_v46  ;;  %v3744_v43 = vshrl.u32 %v3580_v25, 16  ;;  %v3747_v10 = vshll.u32 %v3580_v25, 16  ;;  %v2709_v13 = vsel %vm2676_vm6, %v2706_v36, %v2708_v27 }
 0x26d   : > { %v4200_v25 = vsel %vm4167_vm7, %v4197_v37, %v4199_v50 }
 0x26e   : > { %v4531_v2 = vmax.f32 %v4423_v18, 0.0  ;;  %5507 = vmatmul.msk.bf16.gmra.mxu3 %vm291_vm1, %v3742_v12  ;;  %v3746_v39 = vrot.slane %v3744_v43, 2  ;;  %v3749_v47 = vrot.slane %v3747_v10, 3  ;;  %v3162_v43 = vrot.slane %v5751_v48, 2 }
 0x26f   : > { %5608 = vmatmul.msk.bf16.gmra.mxu0 %vm291_vm1, %v4198_v62  ;;  %v3277_v19 = vpop.f32.mrf.mxu2  ;;  %v3161_v62 = vsel %vm2676_vm6, %v3158_v45, %v3160_v5 }
 0x270   : > { %v5822_v53 = vpack.c.bf16 %v4531_v2, %v4530_v4  ;;  %v3385_v42 = vadd.f32 %v3277_v19, %v2933_v20  ;;  %v3750_v14 = vor.u32 %v3749_v47, %v3746_v39 }
 0x271   : > { %v2827_v23 = vpop.f32.mrf.mxu1  ;;  %v6911_v17 = vpop.f32.mrf.mxu3 }
 0x272   : > { %5888 = vst [vmem:[%s6792_s10 + $0x28] sm:$0xff] %v5822_v53   ;;  %v3971_v3 = vadd.f32 %v6863_v28, %v3385_v42  ;;  %v2934_v60 = vadd.f32 %v2827_v23, %v7006_v7  ;;  %v3751_v36 = vsel %vm3581_vm5, %v3741_v6, %v3750_v14  ;;  %v5731_v53 = vld [vmem:[%s5976_s26 + $0x90] sm:$0xff]  ;;  %v4201_v42 = vrot.slane %v5791_v35, 3 }
 0x273   : > { %v2710_v6 = vrot.slane %v5731_v53, 2 }
 0x274   : > { %v4318_v0 = vpop.f32.mrf.mxu0  ;;  %v4424_v38 = vadd.f32 %v4316_v44, %v3971_v3  ;;  %v3163_v3 = vsel %vm2676_vm6, %v3160_v5, %v3162_v43 }
 0x275   : > { %v2711_v47 = vsel %vm2676_vm6, %v2708_v27, %v2710_v6 }
 0x276   : > { %v4532_v45 = vmax.f32 %v4424_v38, 0.0 }
 0x277   : > { %v3279_v32 = vpop.f32.mrf.mxu2 }
 0x278   : > { %v3386_v46 = vadd.f32 %v3279_v32, %v2934_v60 }
 0x279   : > { %v2830_v56 = vpop.f32.mrf.mxu1  ;;  %v6919_v28 = vpop.f32.mrf.mxu3 }
 0x27a   : > { %v3972_v18 = vadd.f32 %v6871_v33, %v3386_v46  ;;  %v2935_v19 = vadd.f32 %v2830_v56, %v6495_v29  ;;  %v4202_v46 = vsel %vm4167_vm7, %v4199_v50, %v4201_v42  ;;  %v2576_v56 = vld [vmem:[%s5976_s26 + $0x98] sm:$0x3] }
 0x27b   : > { %v2656_v27 = vunpack.c.l.b16 %v2576_v56 }
 0x27c   : > { %v4321_v12 = vpop.f32.mrf.mxu0  ;;  %v4425_v4 = vadd.f32 %v4318_v0, %v3972_v18  ;;  %5300 = vmatmul.msk.bf16.gmra.mxu1 %vm291_vm1, %v2709_v13  ;;  %5403 = vmatmul.msk.bf16.gmra.mxu2 %vm291_vm1, %v3161_v62  ;;  %v3029_v13 = vld [vmem:[%s5976_s26 + $0xa0] sm:$0x3] }
 0x27d   : > { %v4067_v62 = vld [vmem:[%s5976_s26 + $0xa0] sm:$0x7]  ;;  %v3109_v5 = vunpack.c.l.b16 %v3029_v13 }
 0x27e   : > { %v4533_v33 = vmax.f32 %v4425_v4, 0.0  ;;  %5508 = vmatmul.msk.bf16.gmra.mxu3 %vm291_vm1, %v3751_v36  ;;  %v2675_v4 = vpack.c.b16 %v2656_v27, %v2656_v27 }
 0x27f   : > { %5609 = vmatmul.msk.bf16.gmra.mxu0 %vm291_vm1, %v4200_v25  ;;  %v3282_v44 = vpop.f32.mrf.mxu2  ;;  %v3128_v36 = vpack.c.b16 %v3109_v5, %v3109_v5 }
 0x280   : > { %v5827_v2 = vpack.c.bf16 %v4533_v33, %v4532_v45  ;;  %v3387_v20 = vadd.f32 %v3282_v44, %v2935_v19  ;;  %v2712_v19 = vrot.slane %v2675_v4, 2 }
 0x281   : > { %v2832_v37 = vpop.f32.mrf.mxu1  ;;  %v6931_v30 = vpop.f32.mrf.mxu3 }
 0x282   : > { %5889 = vst [vmem:[%s6792_s10 + $0x30] sm:$0xff] %v5827_v2   ;;  %v3973_v10 = vadd.f32 %v6888_v22, %v3387_v20  ;;  %v2936_v29 = vadd.f32 %v2832_v37, %v6511_v41  ;;  %v3164_v37 = vrot.slane %v3128_v36, 2 }
 0x284   : > { %v4323_v23 = vpop.f32.mrf.mxu0  ;;  %v4426_v7 = vadd.f32 %v4321_v12, %v3973_v10 }
 0x286   : > { %v4534_v14 = vmax.f32 %v4426_v7, 0.0 }
 0x287   : > { %v3284_v0 = vpop.f32.mrf.mxu2 }
 0x288   : > { %v3388_v15 = vadd.f32 %v3284_v0, %v2936_v29  ;;  %v3165_v29 = vsel %vm2676_vm6, %v3162_v43, %v3164_v37 }
 0x289   : > { %v2835_v39 = vpop.f32.mrf.mxu1  ;;  %v3880_v22 = vpop.f32.mrf.mxu3 }
 0x28a   : > { %v3974_v60 = vadd.f32 %v6899_v55, %v3388_v15  ;;  %v4147_v55 = vunpack.c.l.b16 %v4067_v62  ;;  %v2937_v50 = vadd.f32 %v2835_v39, %v6522_v9  ;;  %v2713_v9 = vsel %vm2676_vm6, %v2710_v6, %v2712_v19 }
 0x28c   : > { %v4326_v32 = vpop.f32.mrf.mxu0  ;;  %v4427_v41 = vadd.f32 %v4323_v23, %v3974_v60  ;;  %5301 = vmatmul.msk.bf16.gmra.mxu1 %vm291_vm1, %v2711_v47  ;;  %5404 = vmatmul.msk.bf16.gmra.mxu2 %vm291_vm1, %v3163_v3  ;;  %v4166_v44 = vpack.c.b16 %v4147_v55, %v4147_v55 }
 0x28e   : > { %v4535_v38 = vmax.f32 %v4427_v41, 0.0  ;;  %v4203_v20 = vrot.slane %v4166_v44, 3 }
 0x28f   : > { %5610 = vmatmul.msk.bf16.gmra.mxu0 %vm291_vm1, %v4202_v46  ;;  %v3287_v18 = vpop.f32.mrf.mxu2 }
 0x290   : > { %v5832_v12 = vpack.c.bf16 %v4535_v38, %v4534_v14  ;;  %v3389_v45 = vadd.f32 %v3287_v18, %v2937_v50  ;;  %v4204_v47 = vsel %vm4167_vm7, %v4201_v42, %v4203_v20 }
 0x291   : > { %v2837_v25 = vpop.f32.mrf.mxu1  ;;  %v3883_v2 = vpop.f32.mrf.mxu3 }
 0x292   : > { %5890 = vst [vmem:[%s6792_s10 + $0x38] sm:$0xff] %v5832_v12   ;;  %v3975_v53 = vadd.f32 %v6911_v17, %v3389_v45  ;;  %v2938_v48 = vadd.f32 %v2837_v25, %v6535_v52 }
 0x294   : > { %v4328_v33 = vpop.f32.mrf.mxu0  ;;  %v4428_v0 = vadd.f32 %v4326_v32, %v3975_v53 }
 0x296   : > { %v4536_v17 = vmax.f32 %v4428_v0, 0.0 }
 0x297   : > { %v3289_v23 = vpop.f32.mrf.mxu2 }
 0x298   : > { %v3390_v35 = vadd.f32 %v3289_v23, %v2938_v48 }
 0x299   : > { %v2840_v10 = vpop.f32.mrf.mxu1  ;;  %v3885_v52 = vpop.f32.mrf.mxu3 }
 0x29a   : > { %v3976_v15 = vadd.f32 %v6919_v28, %v3390_v35  ;;  %v2939_v43 = vadd.f32 %v2840_v10, %v6559_v16 }
 0x29c   : > { %v4331_v39 = vpop.f32.mrf.mxu0  ;;  %v4429_v3 = vadd.f32 %v4328_v33, %v3976_v15  ;;  %5302 = vmatmul.msk.bf16.gmra.mxu1 %vm291_vm1, %v2713_v9  ;;  %5405 = vmatmul.msk.bf16.gmra.mxu2 %vm291_vm1, %v3165_v29 }
 0x29e   : > { %v4537_v7 = vmax.f32 %v4429_v3, 0.0 }
 0x29f   : > { %5611 = vmatmul.msk.bf16.gmra.mxu0 %vm291_vm1, %v4204_v47  ;;  %v3292_v6 = vpop.f32.mrf.mxu2 }
 0x2a0   : > { %v5837_v60 = vpack.c.bf16 %v4537_v7, %v4536_v17  ;;  %v3391_v28 = vadd.f32 %v3292_v6, %v2939_v43 }
 0x2a1   : > { %v2842_v32 = vpop.f32.mrf.mxu1  ;;  %v3888_v62 = vpop.f32.mrf.mxu3 }
 0x2a2   : > { %5891 = vst [vmem:[%s6792_s10 + $0x40] sm:$0xff] %v5837_v60   ;;  %v3977_v42 = vadd.f32 %v6931_v30, %v3391_v28  ;;  %v2940_v56 = vadd.f32 %v2842_v32, %v6571_v11 }
 0x2a4   : > { %v4333_v46 = vpop.f32.mrf.mxu0  ;;  %v4430_v5 = vadd.f32 %v4331_v39, %v3977_v42 }
 0x2a6   : > { %v4538_v18 = vmax.f32 %v4430_v5, 0.0 }
 0x2a7   : > { %v3294_v13 = vpop.f32.mrf.mxu2 }
 0x2a8   : > { %v3392_v41 = vadd.f32 %v3294_v13, %v2940_v56 }
 0x2a9   : > { %v2845_v27 = vpop.f32.mrf.mxu1  ;;  %v3890_v36 = vpop.f32.mrf.mxu3 }
 0x2aa   : > { %v3978_v14 = vadd.f32 %v3880_v22, %v3392_v41  ;;  %v2941_v25 = vadd.f32 %v2845_v27, %v6584_v58 }
 0x2ac   : > { %v4336_v38 = vpop.f32.mrf.mxu0  ;;  %v4431_v55 = vadd.f32 %v4333_v46, %v3978_v14 }
 0x2ae   : > { %v4539_v12 = vmax.f32 %v4431_v55, 0.0 }
 0x2af   : > { %v3297_v16 = vpop.f32.mrf.mxu2 }
 0x2b0   : > { %v5842_v50 = vpack.c.bf16 %v4539_v12, %v4538_v18  ;;  %v3393_v30 = vadd.f32 %v3297_v16, %v2941_v25 }
 0x2b1   : > { %v2847_v4 = vpop.f32.mrf.mxu1  ;;  %v3893_v20 = vpop.f32.mrf.mxu3 }
 0x2b2   : > { %5892 = vst [vmem:[%s6792_s10 + $0x48] sm:$0xff] %v5842_v50   ;;  %v3979_v45 = vadd.f32 %v3883_v2, %v3393_v30  ;;  %v2942_v33 = vadd.f32 %v2847_v4, %v6595_v57 }
 0x2b4   : > { %v4338_v11 = vpop.f32.mrf.mxu0  ;;  %v4432_v37 = vadd.f32 %v4336_v38, %v3979_v45 }
 0x2b6   : > { %v4540_v35 = vmax.f32 %v4432_v37, 0.0 }
 0x2b7   : > { %v3299_v44 = vpop.f32.mrf.mxu2 }
 0x2b8   : > { %v3394_v19 = vadd.f32 %v3299_v44, %v2942_v33 }
 0x2b9   : > { %v2850_v22 = vpop.f32.mrf.mxu1  ;;  %v3895_v39 = vpop.f32.mrf.mxu3 }
 0x2ba   : > { %v3980_v53 = vadd.f32 %v3885_v52, %v3394_v19  ;;  %v2943_v29 = vadd.f32 %v2850_v22, %v6608_v40 }
 0x2bc   : > { %v4341_v48 = vpop.f32.mrf.mxu0  ;;  %v4433_v23 = vadd.f32 %v4338_v11, %v3980_v53 }
 0x2be   : > { %v4541_v10 = vmax.f32 %v4433_v23, 0.0 }
 0x2bf   : > { %v3302_v58 = vpop.f32.mrf.mxu2 }
 0x2c0   : > { %v5847_v9 = vpack.c.bf16 %v4541_v10, %v4540_v35  ;;  %v3395_v2 = vadd.f32 %v3302_v58, %v2943_v29 }
 0x2c1   : > { %v2852_v0 = vpop.f32.mrf.mxu1  ;;  %v3898_v40 = vpop.f32.mrf.mxu3 }
 0x2c2   : > { %5893 = vst [vmem:[%s6792_s10 + $0x50] sm:$0xff] %v5847_v9   ;;  %v3981_v57 = vadd.f32 %v3888_v62, %v3395_v2  ;;  %v2944_v47 = vadd.f32 %v2852_v0, %v6619_v24 }
 0x2c4   : > { %v4343_v15 = vpop.f32.mrf.mxu0  ;;  %v4434_v7 = vadd.f32 %v4341_v48, %v3981_v57 }
 0x2c6   : > { %v4542_v32 = vmax.f32 %v4434_v7, 0.0 }
 0x2c7   : > { %v3304_v3 = vpop.f32.mrf.mxu2 }
 0x2c8   : > { %v3396_v52 = vadd.f32 %v3304_v3, %v2944_v47 }
 0x2c9   : > { %v2855_v17 = vpop.f32.mrf.mxu1  ;;  %v3900_v55 = vpop.f32.mrf.mxu3 }
 0x2ca   : > { %v3982_v6 = vadd.f32 %v3890_v36, %v3396_v52  ;;  %v2945_v56 = vadd.f32 %v2855_v17, %v6632_v54 }
 0x2cc   : > { %v4346_v60 = vpop.f32.mrf.mxu0  ;;  %v4435_v43 = vadd.f32 %v4343_v15, %v3982_v6 }
 0x2ce   : > { %v4543_v28 = vmax.f32 %v4435_v43, 0.0 }
 0x2cf   : > { %v3307_v46 = vpop.f32.mrf.mxu2 }
 0x2d0   : > { %v5852_v42 = vpack.c.bf16 %v4543_v28, %v4542_v32  ;;  %v3397_v62 = vadd.f32 %v3307_v46, %v2945_v56 }
 0x2d1   : > { %v2857_v13 = vpop.f32.mrf.mxu1  ;;  %v3903_v44 = vpop.f32.mrf.mxu3 }
 0x2d2   : > { %5894 = vst [vmem:[%s6792_s10 + $0x58] sm:$0xff] %v5852_v42   ;;  %v3983_v27 = vadd.f32 %v3893_v20, %v3397_v62  ;;  %v2946_v24 = vadd.f32 %v2857_v13, %v6643_v59 }
 0x2d4   : > { %v4348_v41 = vpop.f32.mrf.mxu0  ;;  %v4436_v18 = vadd.f32 %v4346_v60, %v3983_v27 }
 0x2d6   : > { %v4544_v25 = vmax.f32 %v4436_v18, 0.0 }
 0x2d7   : > { %v3309_v5 = vpop.f32.mrf.mxu2 }
 0x2d8   : > { %v3398_v14 = vadd.f32 %v3309_v5, %v2946_v24 }
 0x2d9   : > { %v2860_v38 = vpop.f32.mrf.mxu1  ;;  %v3905_v10 = vpop.f32.mrf.mxu3 }
 0x2da   : > { %v3984_v12 = vadd.f32 %v3895_v39, %v3398_v14  ;;  %v2947_v30 = vadd.f32 %v2860_v38, %v6656_v26 }
 0x2dc   : > { %v4351_v16 = vpop.f32.mrf.mxu0  ;;  %v4437_v50 = vadd.f32 %v4348_v41, %v3984_v12 }
 0x2de   : > { %v4545_v4 = vmax.f32 %v4437_v50, 0.0 }
 0x2df   : > { %v3312_v36 = vpop.f32.mrf.mxu2 }
 0x2e0   : > { %v5857_v54 = vpack.c.bf16 %v4545_v4, %v4544_v25  ;;  %v3399_v45 = vadd.f32 %v3312_v36, %v2947_v30 }
 0x2e1   : > { %v2862_v11 = vpop.f32.mrf.mxu1  ;;  %v3908_v3 = vpop.f32.mrf.mxu3 }
 0x2e2   : > { %5895 = vst [vmem:[%s6792_s10 + $0x60] sm:$0xff] %v5857_v54   ;;  %v3985_v59 = vadd.f32 %v3898_v40, %v3399_v45  ;;  %v2948_v19 = vadd.f32 %v2862_v11, %v6667_v31 }
 0x2e4   : > { %v4353_v33 = vpop.f32.mrf.mxu0  ;;  %v4438_v48 = vadd.f32 %v4351_v16, %v3985_v59 }
 0x2e6   : > { %v4546_v58 = vmax.f32 %v4438_v48, 0.0 }
 0x2e7   : > { %v3314_v22 = vpop.f32.mrf.mxu2 }
 0x2e8   : > { %v3400_v37 = vadd.f32 %v3314_v22, %v2948_v19 }
 0x2e9   : > { %v2865_v53 = vpop.f32.mrf.mxu1  ;;  %v3910_v56 = vpop.f32.mrf.mxu3 }
 0x2ea   : > { %v3986_v20 = vadd.f32 %v3900_v55, %v3400_v37  ;;  %v2949_v0 = vadd.f32 %v2865_v53, %v6680_v63 }
 0x2ec   : > { %v4356_v23 = vpop.f32.mrf.mxu0  ;;  %v4439_v35 = vadd.f32 %v4353_v33, %v3986_v20 }
 0x2ee   : > { %v4547_v9 = vmax.f32 %v4439_v35, 0.0 }
 0x2ef   : > { %v3317_v26 = vpop.f32.mrf.mxu2 }
 0x2f0   : > { %v5862_v29 = vpack.c.bf16 %v4547_v9, %v4546_v58  ;;  %v3401_v15 = vadd.f32 %v3317_v26, %v2949_v0 }
 0x2f1   : > { %v2867_v2 = vpop.f32.mrf.mxu1  ;;  %v3913_v55 = vpop.f32.mrf.mxu3 }
 0x2f2   : > { %5896 = vst [vmem:[%s6792_s10 + $0x68] sm:$0xff] %v5862_v29   ;;  %v3987_v57 = vadd.f32 %v3903_v44, %v3401_v15  ;;  %v2950_v31 = vadd.f32 %v2867_v2, %v6691_v21 }
 0x2f4   : > { %v4358_v39 = vpop.f32.mrf.mxu0  ;;  %v4440_v7 = vadd.f32 %v4356_v23, %v3987_v57 }
 0x2f6   : > { %v4548_v32 = vmax.f32 %v4440_v7, 0.0 }
 0x2f7   : > { %v3319_v47 = vpop.f32.mrf.mxu2 }
 0x2f8   : > { %v3402_v52 = vadd.f32 %v3319_v47, %v2950_v31 }
 0x2f9   : > { %v2870_v17 = vpop.f32.mrf.mxu1  ;;  %v3915_v30 = vpop.f32.mrf.mxu3 }
 0x2fa   : > { %v3988_v6 = vadd.f32 %v3905_v10, %v3402_v52  ;;  %v2951_v40 = vadd.f32 %v2870_v17, %v6704_v34 }
 0x2fc   : > { %v4361_v60 = vpop.f32.mrf.mxu0  ;;  %v4441_v43 = vadd.f32 %v4358_v39, %v3988_v6 }
 0x2fe   : > { %v4549_v28 = vmax.f32 %v4441_v43, 0.0 }
 0x2ff   : > { %v3322_v46 = vpop.f32.mrf.mxu2 }
 0x300   : > { %v5867_v63 = vpack.c.bf16 %v4549_v28, %v4548_v32  ;;  %v3403_v13 = vadd.f32 %v3322_v46, %v2951_v40 }
 0x301   : > { %v2872_v42 = vpop.f32.mrf.mxu1  ;;  %v3918_v20 = vpop.f32.mrf.mxu3 }
 0x302   : > { %5897 = vst [vmem:[%s6792_s10 + $0x70] sm:$0xff] %v5867_v63   ;;  %v3989_v62 = vadd.f32 %v3908_v3, %v3403_v13  ;;  %v2952_v41 = vadd.f32 %v2872_v42, %v6715_v1 }
 0x304   : > { %v4363_v21 = vpop.f32.mrf.mxu0  ;;  %v4442_v14 = vadd.f32 %v4361_v60, %v3989_v62 }
 0x306   : > { %v4550_v16 = vmax.f32 %v4442_v14, 0.0 }
 0x307   : > { %v3324_v27 = vpop.f32.mrf.mxu2 }
 0x308   : > { %v3404_v24 = vadd.f32 %v3324_v27, %v2952_v41 }
 0x309   : > { %v2875_v5 = vpop.f32.mrf.mxu1  ;;  %v3920_v2 = vpop.f32.mrf.mxu3 }
 0x30a   : > { %v3990_v38 = vadd.f32 %v3910_v56, %v3404_v24  ;;  %v2953_v4 = vadd.f32 %v2875_v5, %v6728_v49 }
 0x30c   : > { %v4443_v18 = vadd.f32 %v4363_v21, %v3990_v38  ;;  %v4366_v12 = vpop.f32.mrf.mxu0 }
 0x30e   : > { %v4551_v50 = vmax.f32 %v4443_v18, 0.0 }
 0x30f   : > { %v3327_v34 = vpop.f32.mrf.mxu2 }
 0x310   : > { %v5872_v25 = vpack.c.bf16 %v4551_v50, %v4550_v16  ;;  %v3405_v54 = vadd.f32 %v3327_v34, %v2953_v4 }
 0x311   : > { %v2877_v36 = vpop.f32.mrf.mxu1 }
 0x312   : > { %5898 = vst [vmem:[%s6792_s10 + $0x78] sm:$0xff] %v5872_v25   ;;  %v3991_v11 = vadd.f32 %v3913_v55, %v3405_v54  ;;  %v2954_v1 = vadd.f32 %v2877_v36, %v6739_v61 }
 0x314   : > { %v4368_v45 = vpop.f32.mrf.mxu0  ;;  %v4444_v19 = vadd.f32 %v4366_v12, %v3991_v11 }
 0x316   : > { %v4552_v53 = vmax.f32 %v4444_v19, 0.0 }
 0x317   : > { %v3329_v33 = vpop.f32.mrf.mxu2 }
 0x318   : > { %v3406_v44 = vadd.f32 %v3329_v33, %v2954_v1 }
 0x319   : > { %v2880_v59 = vpop.f32.mrf.mxu1 }
 0x31a   : > { %v3992_v22 = vadd.f32 %v3915_v30, %v3406_v44  ;;  %v2955_v35 = vadd.f32 %v2880_v59, %v6752_v51 }
 0x31c   : > { %v4445_v37 = vadd.f32 %v4368_v45, %v3992_v22  ;;  %v4371_v10 = vpop.f32.mrf.mxu0 }
 0x31e   : > { %v4553_v48 = vmax.f32 %v4445_v37, 0.0 }
 0x31f   : > { %v3332_v23 = vpop.f32.mrf.mxu2 }
 0x320   : > { %v5877_v49 = vpack.c.bf16 %v4553_v48, %v4552_v53  ;;  %v3407_v58 = vadd.f32 %v3332_v23, %v2955_v35 }
 0x321   : > { %v2882_v9 = vpop.f32.mrf.mxu1 }
 0x322   : > { %5899 = vst [vmem:[%s6792_s10 + $0x80] sm:$0xff] %v5877_v49   ;;  %v3993_v61 = vadd.f32 %v3918_v20, %v3407_v58  ;;  %v2956_v26 = vadd.f32 %v2882_v9, %v6763_v8 }
 0x324   : > { %v4446_v15 = vadd.f32 %v4371_v10, %v3993_v61  ;;  %v4373_v57 = vpop.f32.mrf.mxu0 }
 0x326   : > { %v4554_v47 = vmax.f32 %v4446_v15, 0.0 }
 0x327   : > { %v3334_v29 = vpop.f32.mrf.mxu2 }
 0x328   : > { %v3408_v0 = vadd.f32 %v3334_v29, %v2956_v26 }
 0x32a   : > { %v3994_v39 = vadd.f32 %v3920_v2, %v3408_v0 }
 0x32c   : > { %v4447_v31 = vadd.f32 %v4373_v57, %v3994_v39 }
 0x32e   : > { %v4555_v3 = vmax.f32 %v4447_v31, 0.0 }
 0x330   : > { %v5882_v52 = vpack.c.bf16 %v4555_v3, %v4554_v47 }
 0x332   : > { %5900 = vst [vmem:[%s6792_s10 + $0x88] sm:$0xff] %v5882_v52  }
 0x333 PF: > { %s12_s9 = sadd.s32 1, %s5926_s9  }
 0x334   : > { %p9_p4 = scmp.ge.s32.totalorder %s12_s9, 4  }
 0x336   :  { %11 = sbr.rel (!%p9_p4) target bundleno = 1 (0x1), region = 66 }

// kernel: doble_conv_forward.3
= control target key start
LH: loop header
LB: loop body
LE: loop exit
PB: predicated region body
PF: predicated region fallthrough
CT: control target
= control target key end

     0   :  { %s6072_s9 = smov 0   ;;  %s7211_s0 = inlined_call_operand.vmem [shape: bf16[2,342,72], index: 0, kind: input, shape index: {}]   ;;  %s7212_s1 = inlined_call_operand.vmem [shape: bf16[9,72,128], index: 1, kind: input, shape index: {}]   ;;  %s7213_s2 = inlined_call_operand.vmem [shape: f32[2,288,128], index: 2, kind: output, shape index: {}]  }
   0x1 LB: > { %s4791_s10 = sadd.s32 4294967295, %s6055_s9   ;;  %p4795_p0 = scmp.ge.s32.totalorder %s6055_s9, 1  ;;  %s6055_s9 = sphi %s6072_s9, %s12_s9  }
   0x2   : > { %p112_p1 = scmp.lt.s32.totalorder %s6055_s9, 3 }
   0x4   : > { %p113_p2 = pnand %p4795_p0, %p112_p1 }
   0x6   : > { %116 = sbr.rel (%p113_p2) target bundleno = 825 (0x339), region = 28 }
   0xb   : > { %v189_v0 = vld [vmem:[%s7212_s1 + $0x20] sm:$0xf]  ;;  %vm362_vm0 = vcmask 1043456   ;;  %v5847_v4 = vld [vmem:[%s7212_s1 + $0x18] sm:$0xff]  ;;  %p134_p3 = scmp.lt.s32.totalorder %s4791_s10, 1  ;;  %v5846_v6 = vld [vmem:[%s7212_s1 + $0x10] sm:$0xff] }
   0xc   : > { %v297_v1 = vunpack.c.l.b16 %v189_v0  ;;  %v5027_v5 = vld [vmem:[%s7212_s1 + $0x68] sm:$0xf]  ;;  %v4912_v7 = vld [vmem:[%s7212_s1 + $0x44] sm:$0xf]  ;;  %v5257_v8 = vld [vmem:[%s7212_s1 + $0xb0] sm:$0xf] }
   0xd   : > { %s7231_s10 = smov (!%p134_p3, %s4791_s10), 1  ;;  %v1276_v9 = vunpack.c.l.b16 %v5027_v5  ;;  %v807_v10 = vunpack.c.l.b16 %v4912_v7  ;;  %v2346_v11 = vunpack.c.l.b16 %v5257_v8  ;;  %v5845_v12 = vld [vmem:[%s7212_s1 + $0x8] sm:$0xff]  ;;  %v5844_v16 = vld [vmem:[%s7212_s1] sm:$0xff]  ;;  %vm307_vm1 = vcmask 588800   ;;  %v5890_v28 = vld [vmem:[%s7212_s1 + $0x58] sm:$0xff] }
   0xe   : > { %v302_v2 = vpack.c.b16 %v297_v1, %v297_v1  ;;  %s6039_s25 = smul.u32 172, %s7231_s10  ;;  %v5891_v23 = vld [vmem:[%s7212_s1 + $0x60] sm:$0xff]  ;;  %v5935_v25 = vld [vmem:[%s7212_s1 + $0xa8] sm:$0xff]  ;;  %v5868_v30 = vld [vmem:[%s7212_s1 + $0x34] sm:$0xff]  ;;  %vm1221_vm2 = vcmask 1046528   ;;  %vm2760_vm6 = vcmask 1045504  }
   0xf   : > { %v1281_v13 = vpack.c.b16 %v1276_v9, %v1276_v9  ;;  %v812_v14 = vpack.c.b16 %v807_v10, %v807_v10  ;;  %v2351_v15 = vpack.c.b16 %v2346_v11, %v2346_v11  ;;  %v5869_v24 = vld [vmem:[%s7212_s1 + $0x3c] sm:$0xff]  ;;  %v5142_v27 = vld [vmem:[%s7212_s1 + $0x8c] sm:$0xf]  ;;  %v5913_v34 = vld [vmem:[%s7212_s1 + $0x84] sm:$0xff]  ;;  %vm641_vm3 = vsmask.f32 7424 }
  0x10   : > { %v364_v3 = vsel %vm362_vm0, %v302_v2, 0  ;;  %s6111_s30 = scalar_lea.vmem %s7211_s0, %s6039_s25  ;;  %v1744_v29 = vunpack.c.l.b16 %v5142_v27  ;;  %v5934_v32 = vld [vmem:[%s7212_s1 + $0xa0] sm:$0xff]  ;;  %v5889_v39 = vld [vmem:[%s7212_s1 + $0x50] sm:$0xff]  ;;  %v5933_v42 = vld [vmem:[%s7212_s1 + $0x98] sm:$0xff]  ;;  %vm2158_vm4 = vsmask.f32 6400 }
  0x11   : > { %6024 = vmatpush.bf16.msra.mxu1 %v364_v3  ;;  %6025 = vmatpush.bf16.msra.mxu2 %v364_v3  ;;  %v1341_v17 = vsel %vm362_vm0, %v1281_v13, 0  ;;  %v5831_v18 = vld [vmem:[%s6111_s30 + $0x28] sm:$0xff]  ;;  %v5836_v19 = vld [vmem:[%s6111_s30 + $0x50] sm:$0xff]  ;;  %v872_v20 = vsel %vm362_vm0, %v812_v14, 0  ;;  %v2411_v21 = vsel %vm362_vm0, %v2351_v15, 0  ;;  %v5826_v22 = vld [vmem:[%s6111_s30] sm:$0xff] }
  0x12   : > { %369 = vmatpush.bf16.msra.mxu0 %v364_v3  ;;  %6026 = vmatpush.bf16.msra.mxu3 %v364_v3  ;;  %v5841_v26 = vld [vmem:[%s6111_s30 + $0x78] sm:$0xff]  ;;  %v1749_v31 = vpack.c.b16 %v1744_v29, %v1744_v29  ;;  %v5832_v35 = vld [vmem:[%s6111_s30 + $0x30] sm:$0xff]  ;;  %v5827_v37 = vld [vmem:[%s6111_s30 + $0x8] sm:$0xff]  ;;  %vm3697_vm5 = vsmask.f32 5376  ;;  %vm4299_vm7 = vcmask 1044480  }
  0x13   : > { %v5837_v36 = vld [vmem:[%s6111_s30 + $0x58] sm:$0xff]  ;;  %v5842_v38 = vld [vmem:[%s6111_s30 + $0x80] sm:$0xff]  ;;  %v5867_v40 = vld [vmem:[%s7212_s1 + $0x2c] sm:$0xff]  ;;  %s6040_s29 = smul.u32 288, %s7231_s10 }
  0x14   : > { %v1809_v33 = vsel %vm362_vm0, %v1749_v31, 0  ;;  %v5912_v41 = vld [vmem:[%s7212_s1 + $0x7c] sm:$0xff]  ;;  %v5911_v43 = vld [vmem:[%s7212_s1 + $0x74] sm:$0xff]  ;;  %v5843_v47 = vld [vmem:[%s6111_s30 + $0x88] sm:$0xff] }
  0x15   : > { %6027 = vmatpush.bf16.msra.mxu1 %v5847_v4  ;;  %6028 = vmatpush.bf16.msra.mxu2 %v5847_v4  ;;  %v5833_v44 = vld [vmem:[%s6111_s30 + $0x38] sm:$0xff]  ;;  %v5838_v45 = vld [vmem:[%s6111_s30 + $0x60] sm:$0xff]  ;;  %v5828_v46 = vld [vmem:[%s6111_s30 + $0x10] sm:$0xff]  ;;  %s6980_s5 = scalar_lea.vmem %s7213_s2, %s6040_s29 }
  0x16   : > { %370 = vmatpush.bf16.msra.mxu0 %v5847_v4  ;;  %6029 = vmatpush.bf16.msra.mxu3 %v5847_v4  ;;  %v5888_v48 = vld [vmem:[%s7212_s1 + $0x48] sm:$0xff]  ;;  %v5932_v51 = vld [vmem:[%s7212_s1 + $0x90] sm:$0xff]  ;;  %v5834_v56 = vld [vmem:[%s6111_s30 + $0x40] sm:$0xff] }
  0x17   : > { %v5866_v49 = vld [vmem:[%s7212_s1 + $0x24] sm:$0xff]  ;;  %v5910_v50 = vld [vmem:[%s7212_s1 + $0x6c] sm:$0xff]  ;;  %v5829_v58 = vld [vmem:[%s6111_s30 + $0x18] sm:$0xff] }
  0x18   : > { %v5145_v52 = vld [vmem:[%s6111_s30 + $0x8] sm:$0xe]  ;;  %v5892_v53 = vld [vmem:[%s6111_s30 + $0x8] sm:$0xf0]  ;;  %v5893_v54 = vld [vmem:[%s6111_s30 + $0x10] sm:$0xff] }
  0x19   : > { %6030 = vmatpush.bf16.msra.mxu1 %v5846_v6  ;;  %6031 = vmatpush.bf16.msra.mxu2 %v5846_v6  ;;  %v5146_v55 = vor.u32 %v5892_v53, %v5145_v52  ;;  %v5839_v57 = vld [vmem:[%s6111_s30 + $0x68] sm:$0xff]  ;;  %v1691_v60 = vrot.slane %v5893_v54, 1  ;;  %v5487_v61 = vld [vmem:[%s7212_s1 + $0xf8] sm:$0xf]  ;;  %v5602_v0 = vld [vmem:[%s7212_s1 + $0x11c] sm:$0xf] }
  0x1a   : > { %371 = vmatpush.bf16.msra.mxu0 %v5846_v6  ;;  %6032 = vmatpush.bf16.msra.mxu3 %v5846_v6  ;;  %v3283_v63 = vunpack.c.l.b16 %v5487_v61  ;;  %v5372_v1 = vld [vmem:[%s7212_s1 + $0xd4] sm:$0xf]  ;;  %v3885_v2 = vunpack.c.l.b16 %v5602_v0  ;;  %v5717_v4 = vld [vmem:[%s7212_s1 + $0x140] sm:$0xf]  ;;  %v5894_v14 = vld [vmem:[%s6111_s30 + $0x18] sm:$0xff] }
  0x1b   : > { %v1690_v59 = vrot.slane %v5146_v55, 1  ;;  %v2815_v3 = vunpack.c.l.b16 %v5372_v1  ;;  %v4354_v6 = vunpack.c.l.b16 %v5717_v4  ;;  %v5260_v15 = vld [vmem:[%s6111_s30 + $0x8] sm:$0xe]  ;;  %v5916_v53 = vld [vmem:[%s6111_s30 + $0x18] sm:$0xff]  ;;  %v5850_v54 = vld [vmem:[%s6111_s30 + $0x10] sm:$0xff] }
  0x1c   : > { %v3288_v5 = vpack.c.b16 %v3283_v63, %v3283_v63  ;;  %v3890_v7 = vpack.c.b16 %v3885_v2, %v3885_v2  ;;  %v5896_v2 = vld [vmem:[%s6111_s30 + $0x28] sm:$0xff] }
  0x1d   : > { %6033 = vmatpush.bf16.msra.mxu1 %v5845_v12  ;;  %6034 = vmatpush.bf16.msra.mxu2 %v5845_v12  ;;  %v1692_v62 = vsel %vm1221_vm2, %v1690_v59, %v1691_v60  ;;  %v2820_v8 = vpack.c.b16 %v2815_v3, %v2815_v3  ;;  %v4359_v10 = vpack.c.b16 %v4354_v6, %v4354_v6  ;;  %v658_v59 = vshll.u32 %v5850_v54, 16 }
  0x1e   : > { %372 = vmatpush.bf16.msra.mxu0 %v5845_v12  ;;  %6035 = vmatpush.bf16.msra.mxu3 %v5845_v12  ;;  %v3348_v9 = vsel %vm362_vm0, %v3288_v5, 0  ;;  %v3950_v11 = vsel %vm362_vm0, %v3890_v7, 0  ;;  %v1697_v6 = vrot.slane %v5896_v2, 1 }
  0x1f   : > { %v2880_v12 = vsel %vm362_vm0, %v2820_v8, 0  ;;  %v4419_v13 = vsel %vm362_vm0, %v4359_v10, 0  ;;  %v660_v0 = vrot.slane %v658_v59, 1  ;;  %v5917_v8 = vld [vmem:[%s6111_s30 + $0x20] sm:$0xff] }
  0x21   : > { %6036 = vmatpush.bf16.msra.mxu1 %v5844_v16  ;;  %6037 = vmatpush.bf16.msra.mxu2 %v5844_v16 }
  0x22   : > { %373 = vmatpush.bf16.msra.mxu0 %v5844_v16  ;;  %6038 = vmatpush.bf16.msra.mxu3 %v5844_v16  ;;  %v5914_v16 = vld [vmem:[%s6111_s30 + $0x8] sm:$0xf0] }
  0x24   : > { %4891 = vmatmul.msk.bf16.vlgmr.msra.gmra.mxu1 %vm307_vm1, %v5831_v18  ;;  %4896 = vmatmul.msk.bf16.vlgmr.msra.gmra.mxu2 %vm307_vm1, %v5836_v19  ;;  %v5840_v18 = vld [vmem:[%s6111_s30 + $0x70] sm:$0xff]  ;;  %v5830_v19 = vld [vmem:[%s6111_s30 + $0x20] sm:$0xff] }
  0x25   : > { %1346 = vmatpush.bf16.msrb.mxu2 %v1341_v17  ;;  %877 = vmatpush.bf16.msrb.mxu1 %v872_v20  ;;  %v5835_v17 = vld [vmem:[%s6111_s30 + $0x48] sm:$0xff]  ;;  %v5848_v20 = vld [vmem:[%s6111_s30] sm:$0xff] }
  0x26   : > { %2416 = vmatpush.bf16.msrb.mxu0 %v2411_v21  ;;  %4901 = vmatmul.msk.bf16.vlgmr.msra.gmra.mxu3 %vm307_vm1, %v5841_v26  ;;  %v1693_v21 = vrot.slane %v5894_v14, 1  ;;  %v5030_v26 = vld [vmem:[%s6111_s30] sm:$0xe] }
  0x27   : > { %4886 = vmatmul.msk.bf16.vlgmr.msra.gmra.mxu0 %vm307_vm1, %v5826_v22  ;;  %1814 = vmatpush.bf16.msrb.mxu3 %v1809_v33  ;;  %v5915_v22 = vld [vmem:[%s6111_s30 + $0x10] sm:$0xff]  ;;  %v643_v33 = vshrl.u32 %v5848_v20, 16 }
  0x28   : > { %v1694_v27 = vsel %vm1221_vm2, %v1691_v60, %v1693_v21  ;;  %v2168_v31 = vshrl.u32 %v5915_v22, 16  ;;  %v5872_v60 = vld [vmem:[%s6111_s30 + $0x10] sm:$0xff] }
  0x29   : > { %1347 = vmatpush.bf16.msrb.mxu2 %v5891_v23  ;;  %878 = vmatpush.bf16.msrb.mxu1 %v5869_v24  ;;  %v5261_v23 = vor.u32 %v5914_v16, %v5260_v15  ;;  %v5849_v24 = vld [vmem:[%s6111_s30 + $0x8] sm:$0xff]  ;;  %v1225_v1 = vrot.slane %v5872_v60, 1  ;;  %v5873_v15 = vld [vmem:[%s6111_s30 + $0x18] sm:$0xff] }
  0x2a   : > { %2417 = vmatpush.bf16.msrb.mxu0 %v5935_v25  ;;  %v645_v25 = vshll.u32 %v5848_v20, 16 }
  0x2b   : > { %1815 = vmatpush.bf16.msrb.mxu3 %v5913_v34  ;;  %v2160_v29 = vshrl.u32 %v5261_v23, 16 }
  0x2c   : > { %v647_v34 = vrot.slane %v645_v25, 1 }
  0x2d   : > { %1348 = vmatpush.bf16.msrb.mxu2 %v5890_v28  ;;  %879 = vmatpush.bf16.msrb.mxu1 %v5868_v30  ;;  %v5870_v28 = vld [vmem:[%s6111_s30] sm:$0xf0]  ;;  %v2163_v30 = vshll.u32 %v5261_v23, 16 }
  0x2e   : > { %2418 = vmatpush.bf16.msrb.mxu0 %v5934_v32  ;;  %v2171_v32 = vshll.u32 %v5915_v22, 16  ;;  %v5897_v22 = vld [vmem:[%s6111_s30 + $0x30] sm:$0xff] }
  0x2f   : > { %1816 = vmatpush.bf16.msrb.mxu3 %v5912_v41 }
  0x30   : > { %v2173_v41 = vrot.slane %v2171_v32, 2 }
  0x31   : > { %1349 = vmatpush.bf16.msrb.mxu2 %v5889_v39  ;;  %880 = vmatpush.bf16.msrb.mxu1 %v5867_v40  ;;  %v2165_v39 = vrot.slane %v2163_v30, 2  ;;  %v2170_v40 = vrot.slane %v2168_v31, 1  ;;  %v5918_v30 = vld [vmem:[%s6111_s30 + $0x28] sm:$0xff]  ;;  %v5852_v31 = vld [vmem:[%s6111_s30 + $0x20] sm:$0xff] }
  0x32   : > { %2419 = vmatpush.bf16.msrb.mxu0 %v5933_v42  ;;  %v648_v42 = vor.u32 %v647_v34, %v643_v33  ;;  %v2195_v33 = vshrl.u32 %v5918_v30, 16  ;;  %v2198_v34 = vshll.u32 %v5918_v30, 16  ;;  %v678_v59 = vshrl.u32 %v5852_v31, 16 }
  0x33   : > { %1817 = vmatpush.bf16.msrb.mxu3 %v5911_v43 }
  0x34   : > { %4892 = vmatmul.msk.bf16.gmra.mxu1 %vm307_vm1, %v5832_v35  ;;  %4897 = vmatmul.msk.bf16.gmra.mxu2 %vm307_vm1, %v5837_v36  ;;  %v650_v35 = vshll.u32 %v5849_v24, 16  ;;  %v5871_v36 = vld [vmem:[%s6111_s30 + $0x8] sm:$0xff] }
  0x35   : > { %1350 = vmatpush.bf16.msrb.mxu2 %v5888_v48  ;;  %881 = vmatpush.bf16.msrb.mxu1 %v5866_v49  ;;  %v2174_v48 = vor.u32 %v2173_v41, %v2170_v40  ;;  %v2200_v40 = vrot.slane %v2198_v34, 2 }
  0x36   : > { %4902 = vmatmul.msk.bf16.gmra.mxu3 %vm307_vm1, %v5842_v38  ;;  %2420 = vmatpush.bf16.msrb.mxu0 %v5932_v51  ;;  %v2162_v38 = vrot.slane %v2160_v29, 1  ;;  %v652_v43 = vrot.slane %v650_v35, 1  ;;  %v6023_v35 = vld [vmem:[%s7212_s1 + $0x138] sm:$0xff] }
  0x37   : > { %4887 = vmatmul.msk.bf16.gmra.mxu0 %vm307_vm1, %v5827_v37  ;;  %1818 = vmatpush.bf16.msrb.mxu3 %v5910_v50  ;;  %v5031_v37 = vor.u32 %v5870_v28, %v5030_v26  ;;  %v5957_v28 = vld [vmem:[%s7212_s1 + $0xcc] sm:$0xff] }
  0x38   : > { %v653_v49 = vsel %vm641_vm3, %v648_v42, %v652_v43 }
  0x39   : > { %3353 = vmatpush.bf16.msra.mxu2 %v3348_v9  ;;  %2885 = vmatpush.bf16.msra.mxu1 %v2880_v12  ;;  %v5851_v9 = vld [vmem:[%s6111_s30 + $0x18] sm:$0xff]  ;;  %v2189_v12 = vshll.u32 %v5917_v8, 16 }
  0x3a   : > { %4424 = vmatpush.bf16.msra.mxu0 %v4419_v13  ;;  %v662_v13 = vshrl.u32 %v5850_v54, 16  ;;  %v666_v14 = vshll.u32 %v5851_v9, 16 }
  0x3b   : > { %3955 = vmatpush.bf16.msra.mxu3 %v3950_v11  ;;  %v2186_v11 = vshrl.u32 %v5917_v8, 16 }
  0x3c   : > { %v668_v20 = vrot.slane %v666_v14, 1  ;;  %v5920_v14 = vld [vmem:[%s6111_s30 + $0x38] sm:$0xff] }
  0x3d   : > { %v2188_v16 = vrot.slane %v2186_v11, 1  ;;  %2886 = vmatpush.bf16.msra.mxu1 %v5957_v28 }
  0x3e   : > { %4425 = vmatpush.bf16.msra.mxu0 %v6023_v35 }
  0x44   : > { %4893 = vmatmul.msk.bf16.gmra.mxu1 %vm307_vm1, %v5833_v44  ;;  %4898 = vmatmul.msk.bf16.gmra.mxu2 %vm307_vm1, %v5838_v45  ;;  %v1222_v44 = vrot.slane %v5031_v37, 1  ;;  %v1223_v45 = vrot.slane %v5871_v36, 1  ;;  %v670_v36 = vshrl.u32 %v5851_v9, 16  ;;  %v674_v37 = vshll.u32 %v5852_v31, 16 }
  0x46   : > { %4903 = vmatmul.msk.bf16.gmra.mxu3 %vm307_vm1, %v5843_v47  ;;  %v2166_v47 = vor.u32 %v2165_v39, %v2162_v38  ;;  %v1224_v50 = vsel %vm1221_vm2, %v1222_v44, %v1223_v45  ;;  %v1226_v5 = vsel %vm1221_vm2, %v1223_v45, %v1225_v1  ;;  %v5874_v38 = vld [vmem:[%s6111_s30 + $0x20] sm:$0xff]  ;;  %v2197_v39 = vrot.slane %v2195_v33, 1  ;;  %v5898_v44 = vld [vmem:[%s6111_s30 + $0x38] sm:$0xff] }
  0x47   : > { %4888 = vmatmul.msk.bf16.gmra.mxu0 %vm307_vm1, %v5828_v46  ;;  %v5895_v46 = vld [vmem:[%s6111_s30 + $0x20] sm:$0xff]  ;;  %v672_v41 = vor.u32 %v670_v36, %v668_v20  ;;  %v676_v42 = vrot.slane %v674_v37, 1 }
  0x48   : > { %v1695_v51 = vrot.slane %v5895_v46, 1  ;;  %v2175_v52 = vsel %vm2158_vm4, %v2166_v47, %v2174_v48  ;;  %v2201_v45 = vor.u32 %v2200_v40, %v2197_v39 }
  0x49   : > { %v677_v47 = vsel %vm641_vm3, %v672_v41, %v676_v42  ;;  %v680_v2 = vor.u32 %v678_v59, %v676_v42  ;;  %v5921_v41 = vld [vmem:[%s6111_s30 + $0x40] sm:$0xff] }
  0x4a   : > { %v1696_v55 = vsel %vm1221_vm2, %v1693_v21, %v1695_v51  ;;  %v1698_v10 = vsel %vm1221_vm2, %v1695_v51, %v1697_v6  ;;  %v1227_v21 = vrot.slane %v5873_v15, 1 }
  0x4c   : > { %v1228_v26 = vsel %vm1221_vm2, %v1225_v1, %v1227_v21 }
  0x54   : > { %4894 = vmatmul.msk.bf16.gmra.mxu1 %vm307_vm1, %v5834_v56  ;;  %4899 = vmatmul.msk.bf16.gmra.mxu2 %vm307_vm1, %v5839_v57  ;;  %v2177_v56 = vshrl.u32 %v5916_v53, 16  ;;  %v2180_v57 = vshll.u32 %v5916_v53, 16  ;;  %v5853_v53 = vld [vmem:[%s6111_s30 + $0x28] sm:$0xff] }
  0x55   : > { %v682_v60 = vshll.u32 %v5853_v53, 16 }
  0x56   : > { %5231 = vmatmul.msk.bf16.vlgmr.msrb.gmra.mxu3 %vm307_vm1, %v1692_v62  ;;  %v2179_v61 = vrot.slane %v2177_v56, 1  ;;  %v2182_v62 = vrot.slane %v2180_v57, 2 }
  0x57   : > { %4889 = vmatmul.msk.bf16.gmra.mxu0 %vm307_vm1, %v5829_v58  ;;  %v654_v58 = vshrl.u32 %v5849_v24, 16  ;;  %v6001_v24 = vld [vmem:[%s7212_s1 + $0x114] sm:$0xff] }
  0x58   : > { %v2183_v3 = vor.u32 %v2182_v62, %v2179_v61  ;;  %3956 = vmatpush.bf16.msra.mxu3 %v6001_v24  ;;  %v5875_v61 = vld [vmem:[%s6111_s30 + $0x28] sm:$0xff]  ;;  %v5876_v24 = vld [vmem:[%s6111_s30 + $0x30] sm:$0xff] }
  0x59   : > { %v656_v63 = vor.u32 %v654_v58, %v652_v43  ;;  %v1229_v43 = vrot.slane %v5874_v38, 1  ;;  %v1233_v31 = vrot.slane %v5876_v24, 1 }
  0x5a   : > { %v2184_v7 = vsel %vm2158_vm4, %v2174_v48, %v2183_v3 }
  0x5b   : > { %v661_v4 = vsel %vm641_vm3, %v656_v63, %v660_v0  ;;  %v1230_v48 = vsel %vm1221_vm2, %v1227_v21, %v1229_v43 }
  0x64   : > { %4895 = vmatmul.msk.bf16.gmra.mxu1 %vm307_vm1, %v5835_v17  ;;  %4900 = vmatmul.msk.bf16.gmra.mxu2 %vm307_vm1, %v5840_v18  ;;  %v2191_v17 = vrot.slane %v2189_v12, 2  ;;  %v5979_v18 = vld [vmem:[%s7212_s1 + $0xf0] sm:$0xff] }
  0x65   : > { %3354 = vmatpush.bf16.msra.mxu2 %v5979_v18  ;;  %v2213_v18 = vshrl.u32 %v5920_v14, 16 }
  0x66   : > { %5232 = vmatmul.msk.bf16.gmra.mxu3 %vm307_vm1, %v1694_v27  ;;  %v2192_v23 = vor.u32 %v2191_v17, %v2188_v16  ;;  %v1699_v27 = vrot.slane %v5897_v22, 1  ;;  %v5854_v16 = vld [vmem:[%s6111_s30 + $0x30] sm:$0xff]  ;;  %v686_v22 = vshrl.u32 %v5853_v53, 16 }
  0x67   : > { %4890 = vmatmul.msk.bf16.gmra.mxu0 %vm307_vm1, %v5830_v19  ;;  %v664_v19 = vor.u32 %v662_v13, %v660_v0 }
  0x68   : > { %v2193_v29 = vsel %vm2158_vm4, %v2183_v3, %v2192_v23  ;;  %v1700_v32 = vsel %vm1221_vm2, %v1697_v6, %v1699_v27  ;;  %v2202_v51 = vsel %vm2158_vm4, %v2192_v23, %v2201_v45  ;;  %v684_v3 = vrot.slane %v682_v60, 1 }
  0x69   : > { %v669_v25 = vsel %vm641_vm3, %v664_v19, %v668_v20  ;;  %v2216_v19 = vshll.u32 %v5920_v14, 16  ;;  %v690_v23 = vshll.u32 %v5854_v16, 16 }
  0x6a   : > { %v685_v9 = vsel %vm641_vm3, %v680_v2, %v684_v3 }
  0x6b   : > { %v692_v30 = vrot.slane %v690_v23, 1 }
  0x74   : > { %5001 = vmatmul.msk.bf16.vlgmr.msrb.gmra.mxu1 %vm307_vm1, %v653_v49  ;;  %5116 = vmatmul.msk.bf16.vlgmr.msrb.gmra.mxu2 %vm307_vm1, %v1224_v50  ;;  %v1701_v49 = vrot.slane %v5898_v44, 1 }
  0x76   : > { %5233 = vmatmul.msk.bf16.gmra.mxu3 %vm307_vm1, %v1696_v55  ;;  %v1702_v54 = vsel %vm1221_vm2, %v1699_v27, %v1701_v49  ;;  %v2218_v27 = vrot.slane %v2216_v19, 2 }
  0x77   : > { %5346 = vmatmul.msk.bf16.vlgmr.msrb.gmra.mxu0 %vm307_vm1, %v2175_v52  ;;  %v5919_v52 = vld [vmem:[%s6111_s30 + $0x30] sm:$0xff] }
  0x78   : > { %v2204_v55 = vshrl.u32 %v5919_v52, 16  ;;  %v2207_v56 = vshll.u32 %v5919_v52, 16  ;;  %v694_v52 = vshrl.u32 %v5854_v16, 16 }
  0x7a   : > { %v2206_v63 = vrot.slane %v2204_v55, 1  ;;  %v2209_v0 = vrot.slane %v2207_v56, 2  ;;  %v6000_v55 = vld [vmem:[%s7212_s1 + $0x10c] sm:$0xff] }
  0x7b   : > { %3957 = vmatpush.bf16.msra.mxu3 %v6000_v55 }
  0x7c   : > { %v2210_v6 = vor.u32 %v2209_v0, %v2206_v63  ;;  %v696_v0 = vor.u32 %v694_v52, %v692_v30 }
  0x7e   : > { %v2211_v13 = vsel %vm2158_vm4, %v2201_v45, %v2210_v6  ;;  %v2222_v45 = vshrl.u32 %v5921_v41, 16 }
  0x80   : > { %v2224_v59 = vrot.slane %v2222_v45, 1  ;;  %v5902_v45 = vld [vmem:[%s6111_s30 + $0x58] sm:$0xff] }
  0x84   : > { %5002 = vmatmul.msk.bf16.gmra.mxu1 %vm307_vm1, %v661_v4  ;;  %5117 = vmatmul.msk.bf16.gmra.mxu2 %vm307_vm1, %v1226_v5  ;;  %v1231_v4 = vrot.slane %v5875_v61, 1  ;;  %v5899_v5 = vld [vmem:[%s6111_s30 + $0x40] sm:$0xff] }
  0x85   : > { %v1703_v11 = vrot.slane %v5899_v5, 1  ;;  %v5956_v61 = vld [vmem:[%s7212_s1 + $0xc4] sm:$0xff] }
  0x86   : > { %5234 = vmatmul.msk.bf16.gmra.mxu3 %vm307_vm1, %v1698_v10  ;;  %v1232_v10 = vsel %vm1221_vm2, %v1229_v43, %v1231_v4  ;;  %v1234_v37 = vsel %vm1221_vm2, %v1231_v4, %v1233_v31  ;;  %v5855_v43 = vld [vmem:[%s6111_s30 + $0x38] sm:$0xff]  ;;  %2887 = vmatpush.bf16.msra.mxu1 %v5956_v61  ;;  %v5901_v4 = vld [vmem:[%s6111_s30 + $0x50] sm:$0xff] }
  0x87   : > { %5347 = vmatmul.msk.bf16.gmra.mxu0 %vm307_vm1, %v2184_v7  ;;  %v1704_v17 = vsel %vm1221_vm2, %v1701_v49, %v1703_v11  ;;  %v5978_v49 = vld [vmem:[%s7212_s1 + $0xe8] sm:$0xff]  ;;  %v698_v53 = vshll.u32 %v5855_v43, 16 }
  0x88   : > { %3355 = vmatpush.bf16.msra.mxu2 %v5978_v49 }
  0x89   : > { %v700_v2 = vrot.slane %v698_v53, 1 }
  0x94   : > { %5003 = vmatmul.msk.bf16.gmra.mxu1 %vm307_vm1, %v669_v25  ;;  %5118 = vmatmul.msk.bf16.gmra.mxu2 %vm307_vm1, %v1228_v26  ;;  %v2215_v26 = vrot.slane %v2213_v18, 1  ;;  %v6022_v18 = vld [vmem:[%s7212_s1 + $0x130] sm:$0xff] }
  0x95   : > { %4426 = vmatpush.bf16.msra.mxu0 %v6022_v18 }
  0x96   : > { %5235 = vmatmul.msk.bf16.gmra.mxu3 %vm307_vm1, %v1700_v32  ;;  %v5900_v32 = vld [vmem:[%s6111_s30 + $0x48] sm:$0xff]  ;;  %v2219_v33 = vor.u32 %v2218_v27, %v2215_v26 }
  0x97   : > { %5348 = vmatmul.msk.bf16.gmra.mxu0 %vm307_vm1, %v2193_v29  ;;  %v688_v29 = vor.u32 %v686_v22, %v684_v3  ;;  %v1705_v38 = vrot.slane %v5900_v32, 1  ;;  %v5856_v22 = vld [vmem:[%s6111_s30 + $0x40] sm:$0xff] }
  0x98   : > { %v2220_v40 = vsel %vm2158_vm4, %v2210_v6, %v2219_v33  ;;  %v5878_v32 = vld [vmem:[%s6111_s30 + $0x40] sm:$0xff] }
  0x99   : > { %v693_v36 = vsel %vm641_vm3, %v688_v29, %v692_v30  ;;  %v1706_v44 = vsel %vm1221_vm2, %v1703_v11, %v1705_v38  ;;  %v702_v30 = vshrl.u32 %v5855_v43, 16 }
  0xa1   : > { %v6285_v46 = vpop.f32.mrf.mxu1 }
  0xa4   : > { %v6289_v50 = vpop.f32.mrf.mxu0  ;;  %5004 = vmatmul.msk.bf16.gmra.mxu1 %vm307_vm1, %v677_v47  ;;  %5119 = vmatmul.msk.bf16.gmra.mxu2 %vm307_vm1, %v1230_v48  ;;  %v2225_v47 = vshll.u32 %v5921_v41, 16 }
  0xa6   : > { %5236 = vmatmul.msk.bf16.gmra.mxu3 %vm307_vm1, %v1702_v54  ;;  %v5877_v54 = vld [vmem:[%s6111_s30 + $0x38] sm:$0xff]  ;;  %v2227_v60 = vrot.slane %v2225_v47, 2 }
  0xa7   : > { %5349 = vmatmul.msk.bf16.gmra.mxu0 %vm307_vm1, %v2202_v51  ;;  %v6298_v57 = vpop.f32.mrf.mxu2  ;;  %v1235_v3 = vrot.slane %v5877_v54, 1  ;;  %v1709_v54 = vrot.slane %v5902_v45, 1 }
  0xa8   : > { %v2228_v5 = vor.u32 %v2227_v60, %v2224_v59  ;;  %v5923_v60 = vld [vmem:[%s6111_s30 + $0x50] sm:$0xff] }
  0xa9   : > { %v6301_v58 = vpop.f32.mrf.mxu1  ;;  %v6306_v1 = vpop.f32.mrf.mxu3  ;;  %v1236_v11 = vsel %vm1221_vm2, %v1233_v31, %v1235_v3  ;;  %v706_v31 = vshll.u32 %v5856_v22, 16 }
  0xaa   : > { %v2229_v16 = vsel %vm2158_vm4, %v2219_v33, %v2228_v5 }
  0xab   : > { %v708_v41 = vrot.slane %v706_v31, 1 }
  0xac   : > { %v6304_v62 = vpop.f32.mrf.mxu0 }
  0xaf   : > { %v6309_v7 = vpop.f32.mrf.mxu2 }
  0xb1   : > { %v6311_v8 = vpop.f32.mrf.mxu1  ;;  %v6319_v15 = vpop.f32.mrf.mxu3 }
  0xb4   : > { %v6315_v12 = vpop.f32.mrf.mxu0  ;;  %5005 = vmatmul.msk.bf16.gmra.mxu1 %vm307_vm1, %v685_v9  ;;  %5120 = vmatmul.msk.bf16.gmra.mxu2 %vm307_vm1, %v1232_v10  ;;  %v701_v10 = vsel %vm641_vm3, %v696_v0, %v700_v2  ;;  %v5857_v0 = vld [vmem:[%s6111_s30 + $0x48] sm:$0xff] }
  0xb6   : > { %5237 = vmatmul.msk.bf16.gmra.mxu3 %vm307_vm1, %v1704_v17  ;;  %v5922_v17 = vld [vmem:[%s6111_s30 + $0x48] sm:$0xff] }
  0xb7   : > { %5350 = vmatmul.msk.bf16.gmra.mxu0 %vm307_vm1, %v2211_v13  ;;  %v6326_v20 = vpop.f32.mrf.mxu2  ;;  %v1707_v13 = vrot.slane %v5901_v4, 1  ;;  %v2231_v24 = vshrl.u32 %v5922_v17, 16  ;;  %v2234_v26 = vshll.u32 %v5922_v17, 16  ;;  %v2243_v4 = vshll.u32 %v5923_v60, 16  ;;  %v5879_v17 = vld [vmem:[%s6111_s30 + $0x48] sm:$0xff] }
  0xb8   : > { %v1239_v31 = vrot.slane %v5879_v17, 1 }
  0xb9   : > { %v6329_v21 = vpop.f32.mrf.mxu1  ;;  %v6334_v28 = vpop.f32.mrf.mxu3  ;;  %v1708_v23 = vsel %vm1221_vm2, %v1705_v38, %v1707_v13  ;;  %v704_v38 = vor.u32 %v702_v30, %v700_v2  ;;  %v1710_v2 = vsel %vm1221_vm2, %v1707_v13, %v1709_v54 }
  0xbb   : > { %v709_v43 = vsel %vm641_vm3, %v704_v38, %v708_v41 }
  0xbc   : > { %v6332_v25 = vpop.f32.mrf.mxu0 }
  0xbf   : > { %v6337_v34 = vpop.f32.mrf.mxu2 }
  0xc1   : > { %v6339_v35 = vpop.f32.mrf.mxu1  ;;  %v6347_v42 = vpop.f32.mrf.mxu3 }
  0xc4   : > { %v6343_v39 = vpop.f32.mrf.mxu0  ;;  %5006 = vmatmul.msk.bf16.gmra.mxu1 %vm307_vm1, %v693_v36  ;;  %5121 = vmatmul.msk.bf16.gmra.mxu2 %vm307_vm1, %v1234_v37  ;;  %v2233_v36 = vrot.slane %v2231_v24, 1  ;;  %v2236_v37 = vrot.slane %v2234_v26, 2  ;;  %v2245_v24 = vrot.slane %v2243_v4, 2 }
  0xc6   : > { %5238 = vmatmul.msk.bf16.gmra.mxu3 %vm307_vm1, %v1706_v44  ;;  %v1237_v44 = vrot.slane %v5878_v32, 1  ;;  %v2237_v47 = vor.u32 %v2236_v37, %v2233_v36  ;;  %v5903_v32 = vld [vmem:[%s6111_s30 + $0x60] sm:$0xff] }
  0xc7   : > { %5351 = vmatmul.msk.bf16.gmra.mxu0 %vm307_vm1, %v2220_v40  ;;  %v6354_v48 = vpop.f32.mrf.mxu2 }
  0xc8   : > { %v1238_v53 = vsel %vm1221_vm2, %v1235_v3, %v1237_v44  ;;  %v2238_v59 = vsel %vm2158_vm4, %v2228_v5, %v2237_v47  ;;  %v2240_v3 = vshrl.u32 %v5923_v60, 16  ;;  %v1240_v45 = vsel %vm1221_vm2, %v1237_v44, %v1239_v31  ;;  %v5924_v60 = vld [vmem:[%s6111_s30 + $0x58] sm:$0xff] }
  0xc9   : > { %v6360_v51 = vpop.f32.mrf.mxu1  ;;  %v6371_v63 = vpop.f32.mrf.mxu3  ;;  %v2249_v4 = vshrl.u32 %v5924_v60, 16 }
  0xca   : > { %7214 = vst [vmem:[#allocation3_spill] sm:$0xff] %v6371_v63 }
  0xcc   : > { %v6366_v56 = vpop.f32.mrf.mxu0 }
  0xcf   : > { %v6374_v6 = vpop.f32.mrf.mxu2 }
  0xd1   : > { %v6376_v9 = vpop.f32.mrf.mxu1  ;;  %v6387_v19 = vpop.f32.mrf.mxu3 }
  0xd2   : > { %7215 = vst [vmem:[#allocation4_spill] sm:$0xff] %v6387_v19 }
  0xd4   : > { %v6380_v14 = vpop.f32.mrf.mxu0  ;;  %5007 = vmatmul.msk.bf16.gmra.mxu1 %vm307_vm1, %v701_v10  ;;  %5122 = vmatmul.msk.bf16.gmra.mxu2 %vm307_vm1, %v1236_v11  ;;  %v710_v11 = vshrl.u32 %v5856_v22, 16 }
  0xd6   : > { %5239 = vmatmul.msk.bf16.gmra.mxu3 %vm307_vm1, %v1708_v23  ;;  %v2242_v23 = vrot.slane %v2240_v3, 1  ;;  %v712_v13 = vor.u32 %v710_v11, %v708_v41  ;;  %v6443_v41 = vld [vmem:[%s6111_s30 + $0x50] sm:$0xff]  ;;  %v2252_v11 = vshll.u32 %v5924_v60, 16 }
  0xd7   : > { %5352 = vmatmul.msk.bf16.gmra.mxu0 %vm307_vm1, %v2229_v16  ;;  %v6394_v27 = vpop.f32.mrf.mxu2  ;;  %v714_v16 = vshll.u32 %v5857_v0, 16 }
  0xd8   : > { %v2246_v36 = vor.u32 %v2245_v24, %v2242_v23  ;;  %v718_v23 = vshrl.u32 %v5857_v0, 16  ;;  %v722_v24 = vshll.u32 %v6443_v41, 16 }
  0xd9   : > { %v6397_v29 = vpop.f32.mrf.mxu1  ;;  %v1820_v40 = vpop.f32.mrf.mxu3  ;;  %v716_v30 = vrot.slane %v714_v16, 1 }
  0xda   : > { %v724_v60 = vrot.slane %v722_v24, 1  ;;  %v5925_v24 = vld [vmem:[%s6111_s30 + $0x60] sm:$0xff] }
  0xdb   : > { %v717_v22 = vsel %vm641_vm3, %v712_v13, %v716_v30  ;;  %v6450_v13 = vld [vmem:[%s6111_s30 + $0x50] sm:$0xff] }
  0xdc   : > { %v6400_v33 = vpop.f32.mrf.mxu0 }
  0xdf   : > { %v6403_v49 = vpop.f32.mrf.mxu2 }
  0xe1   : > { %v6405_v52 = vpop.f32.mrf.mxu1  ;;  %v6413_v61 = vpop.f32.mrf.mxu3 }
  0xe4   : > { %v6409_v55 = vpop.f32.mrf.mxu0  ;;  %5008 = vmatmul.msk.bf16.gmra.mxu1 %vm307_vm1, %v709_v43  ;;  %5123 = vmatmul.msk.bf16.gmra.mxu2 %vm307_vm1, %v1238_v53  ;;  %v1711_v43 = vrot.slane %v5903_v32, 1 }
  0xe6   : > { %5240 = vmatmul.msk.bf16.gmra.mxu3 %vm307_vm1, %v1710_v2  ;;  %v1712_v3 = vsel %vm1221_vm2, %v1709_v54, %v1711_v43 }
  0xe7   : > { %5353 = vmatmul.msk.bf16.gmra.mxu0 %vm307_vm1, %v2238_v59  ;;  %v6420_v10 = vpop.f32.mrf.mxu2  ;;  %v2247_v59 = vsel %vm2158_vm4, %v2237_v47, %v2246_v36 }
  0xe9   : > { %v6423_v5 = vpop.f32.mrf.mxu1  ;;  %v6428_v26 = vpop.f32.mrf.mxu3 }
  0xec   : > { %v6426_v18 = vpop.f32.mrf.mxu0 }
  0xef   : > { %v6431_v37 = vpop.f32.mrf.mxu2 }
  0xf1   : > { %v883_v38 = vpop.f32.mrf.mxu1  ;;  %v6437_v2 = vpop.f32.mrf.mxu3 }
  0xf2   : > { %v1009_v44 = vadd.f32 %v883_v38, %v6289_v50  ;;  %v720_v38 = vor.u32 %v718_v23, %v716_v30 }
  0xf4   : > { %v2422_v53 = vpop.f32.mrf.mxu0  ;;  %5009 = vmatmul.msk.bf16.gmra.mxu1 %vm307_vm1, %v717_v22  ;;  %5124 = vmatmul.msk.bf16.gmra.mxu2 %vm307_vm1, %v1240_v45  ;;  %v2251_v45 = vrot.slane %v2249_v4, 1  ;;  %v725_v4 = vsel %vm641_vm3, %v720_v38, %v724_v60 }
  0xf6   : > { %5241 = vmatmul.msk.bf16.gmra.mxu3 %vm307_vm1, %v1712_v3  ;;  %v6458_v3 = vld [vmem:[%s6111_s30 + $0x68] sm:$0xff] }
  0xf7   : > { %5354 = vmatmul.msk.bf16.gmra.mxu0 %vm307_vm1, %v2247_v59  ;;  %v1352_v16 = vpop.f32.mrf.mxu2  ;;  %v2254_v59 = vrot.slane %v2252_v11, 2 }
  0xf8   : > { %v1478_v47 = vadd.f32 %v1352_v16, %v1009_v44  ;;  %v1241_v44 = vrot.slane %v6450_v13, 1 }
  0xf9   : > { %v885_v17 = vpop.f32.mrf.mxu1  ;;  %v6452_v54 = vpop.f32.mrf.mxu3  ;;  %v2255_v16 = vor.u32 %v2254_v59, %v2251_v45  ;;  %v2261_v45 = vshll.u32 %v5925_v24, 16 }
  0xfa   : > { %v1946_v32 = vadd.f32 %v1820_v40, %v1478_v47  ;;  %v1010_v0 = vadd.f32 %v885_v17, %v6304_v62  ;;  %v1242_v11 = vsel %vm1221_vm2, %v1239_v31, %v1241_v44  ;;  %v5977_v62 = vld [vmem:[%s7212_s1 + $0xe0] sm:$0xff]  ;;  %v6484_v31 = vld [vmem:[%s6111_s30 + $0x58] sm:$0xff] }
  0xfb   : > { %v2256_v23 = vsel %vm2158_vm4, %v2246_v36, %v2255_v16  ;;  %3356 = vmatpush.bf16.msra.mxu2 %v5977_v62 }
  0xfc   : > { %v2424_v22 = vpop.f32.mrf.mxu0  ;;  %v6454_v50 = vadd.f32 %v2422_v53, %v1946_v32  ;;  %v1713_v53 = vrot.slane %v6458_v3, 1  ;;  %v2258_v32 = vshrl.u32 %v5925_v24, 16  ;;  %v726_v3 = vshrl.u32 %v6443_v41, 16 }
  0xfe   : > { %v1714_v36 = vsel %vm1221_vm2, %v1711_v43, %v1713_v53  ;;  %v728_v62 = vor.u32 %v726_v3, %v724_v60  ;;  %v5926_v3 = vld [vmem:[%s6111_s30 + $0x68] sm:$0xff] }
  0xff   : > { %v1354_v19 = vpop.f32.mrf.mxu2 }
 0x100   : > { %v1479_v63 = vadd.f32 %v1354_v19, %v1010_v0  ;;  %v5999_v19 = vld [vmem:[%s7212_s1 + $0x104] sm:$0xff]  ;;  %v730_v0 = vshll.u32 %v6484_v31, 16 }
 0x101   : > { %v888_v40 = vpop.f32.mrf.mxu1  ;;  %v6473_v17 = vpop.f32.mrf.mxu3  ;;  %3958 = vmatpush.bf16.msra.mxu3 %v5999_v19 }
 0x102   : > { %v1947_v30 = vadd.f32 %v6413_v61, %v1479_v63  ;;  %v5955_v63 = vld [vmem:[%s7212_s1 + $0xbc] sm:$0xff]  ;;  %v1011_v13 = vadd.f32 %v888_v40, %v6315_v12  ;;  %v2263_v12 = vrot.slane %v2261_v45, 2  ;;  %v6021_v40 = vld [vmem:[%s7212_s1 + $0x128] sm:$0xff]  ;;  %v732_v41 = vrot.slane %v730_v0, 1 }
 0x103   : > { %2888 = vmatpush.bf16.msra.mxu1 %v5955_v63  ;;  %4427 = vmatpush.bf16.msra.mxu0 %v6021_v40  ;;  %v5905_v63 = vld [vmem:[%s6111_s30 + $0x70] sm:$0xff] }
 0x104   : > { %v2427_v47 = vpop.f32.mrf.mxu0  ;;  %5010 = vmatmul.msk.bf16.gmra.mxu1 %vm307_vm1, %v725_v4  ;;  %5125 = vmatmul.msk.bf16.gmra.mxu2 %vm307_vm1, %v1242_v11  ;;  %v6480_v61 = vadd.f32 %v2424_v22, %v1947_v30  ;;  %v5881_v4 = vld [vmem:[%s6111_s30 + $0x58] sm:$0xff]  ;;  %v2260_v30 = vrot.slane %v2258_v32, 1 }
 0x105   : > { %v1243_v19 = vrot.slane %v5881_v4, 1  ;;  %v2267_v4 = vshrl.u32 %v5926_v3, 16 }
 0x106   : > { %7216 = vst [vmem:[#allocation5_spill] sm:$0xff] %v6480_v61  ;;  %5242 = vmatmul.msk.bf16.gmra.mxu3 %vm307_vm1, %v1714_v36  ;;  %v1715_v61 = vrot.slane %v5905_v63, 1 }
 0x107   : > { %5355 = vmatmul.msk.bf16.gmra.mxu0 %vm307_vm1, %v2256_v23  ;;  %v1357_v59 = vpop.f32.mrf.mxu2 }
 0x108   : > { %v1480_v38 = vadd.f32 %v1357_v59, %v1011_v13  ;;  %v733_v59 = vsel %vm641_vm3, %v728_v62, %v732_v41  ;;  %v734_v62 = vshrl.u32 %v6484_v31, 16 }
 0x109   : > { %v890_v22 = vpop.f32.mrf.mxu1  ;;  %v6496_v23 = vpop.f32.mrf.mxu3 }
 0x10a   : > { %v1948_v43 = vadd.f32 %v6428_v26, %v1480_v38  ;;  %v1012_v36 = vadd.f32 %v890_v22, %v6332_v25  ;;  %v2264_v26 = vor.u32 %v2263_v12, %v2260_v30  ;;  %v1244_v38 = vsel %vm1221_vm2, %v1241_v44, %v1243_v19  ;;  %v5860_v22 = vld [vmem:[%s6111_s30 + $0x60] sm:$0xff] }
 0x10b   : > { %v1716_v44 = vsel %vm1221_vm2, %v1713_v53, %v1715_v61  ;;  %v2270_v30 = vshll.u32 %v5926_v3, 16  ;;  %v738_v63 = vshll.u32 %v5860_v22, 16 }
 0x10c   : > { %v2429_v11 = vpop.f32.mrf.mxu0  ;;  %v6498_v24 = vadd.f32 %v2427_v47, %v1948_v43  ;;  %v2265_v60 = vsel %vm2158_vm4, %v2255_v16, %v2264_v26 }
 0x10f   : > { %v1359_v13 = vpop.f32.mrf.mxu2 }
 0x110   : > { %v1481_v32 = vadd.f32 %v1359_v13, %v1012_v36 }
 0x111   : > { %v893_v45 = vpop.f32.mrf.mxu1  ;;  %v6507_v0 = vpop.f32.mrf.mxu3 }
 0x112   : > { %v1949_v47 = vadd.f32 %v6437_v2, %v1481_v32  ;;  %v1013_v2 = vadd.f32 %v893_v45, %v6343_v39  ;;  %v2269_v32 = vrot.slane %v2267_v4, 1  ;;  %v736_v45 = vor.u32 %v734_v62, %v732_v41  ;;  %v5927_v62 = vld [vmem:[%s6111_s30 + $0x70] sm:$0xff] }
 0x114   : > { %v2432_v43 = vpop.f32.mrf.mxu0  ;;  %5011 = vmatmul.msk.bf16.gmra.mxu1 %vm307_vm1, %v733_v59  ;;  %5126 = vmatmul.msk.bf16.gmra.mxu2 %vm307_vm1, %v1244_v38  ;;  %v6511_v25 = vadd.f32 %v2429_v11, %v1949_v47  ;;  %v5882_v11 = vld [vmem:[%s6111_s30 + $0x60] sm:$0xff]  ;;  %v2272_v59 = vrot.slane %v2270_v30, 2  ;;  %v740_v38 = vrot.slane %v738_v63, 1 }
 0x115   : > { %v1245_v47 = vrot.slane %v5882_v11, 1  ;;  %v2276_v11 = vshrl.u32 %v5927_v62, 16 }
 0x116   : > { %5243 = vmatmul.msk.bf16.gmra.mxu3 %vm307_vm1, %v1716_v44  ;;  %v2273_v44 = vor.u32 %v2272_v59, %v2269_v32 }
 0x117   : > { %5356 = vmatmul.msk.bf16.gmra.mxu0 %vm307_vm1, %v2265_v60  ;;  %v1362_v16 = vpop.f32.mrf.mxu2  ;;  %v5906_v60 = vld [vmem:[%s6111_s30 + $0x78] sm:$0xff]  ;;  %v1246_v4 = vsel %vm1221_vm2, %v1243_v19, %v1245_v47 }
 0x118   : > { %v1482_v12 = vadd.f32 %v1362_v16, %v1013_v2  ;;  %v1717_v30 = vrot.slane %v5906_v60, 1  ;;  %v2274_v41 = vsel %vm2158_vm4, %v2264_v26, %v2273_v44 }
 0x119   : > { %v895_v40 = vpop.f32.mrf.mxu1  ;;  %v6521_v53 = vpop.f32.mrf.mxu3 }
 0x11a   : > { %v1950_v36 = vadd.f32 %v6452_v54, %v1482_v12  ;;  %v1014_v3 = vadd.f32 %v895_v40, %v6366_v56  ;;  %v741_v54 = vsel %vm641_vm3, %v736_v45, %v740_v38  ;;  %v5861_v40 = vld [vmem:[%s6111_s30 + $0x68] sm:$0xff]  ;;  %v1718_v19 = vsel %vm1221_vm2, %v1715_v61, %v1717_v30 }
 0x11b   : > { %v742_v45 = vshrl.u32 %v5860_v22, 16  ;;  %v746_v60 = vshll.u32 %v5861_v40, 16 }
 0x11c   : > { %v2434_v13 = vpop.f32.mrf.mxu0  ;;  %v6523_v39 = vadd.f32 %v2432_v43, %v1950_v36  ;;  %v2279_v36 = vshll.u32 %v5927_v62, 16 }
 0x11f   : > { %v1364_v31 = vpop.f32.mrf.mxu2 }
 0x120   : > { %v1483_v2 = vadd.f32 %v1364_v31, %v1014_v3  ;;  %v5883_v3 = vld [vmem:[%s6111_s30 + $0x68] sm:$0xff] }
 0x121   : > { %v898_v16 = vpop.f32.mrf.mxu1  ;;  %v6532_v63 = vpop.f32.mrf.mxu3 }
 0x122   : > { %v1951_v43 = vadd.f32 %v6473_v17, %v1483_v2  ;;  %v1015_v17 = vadd.f32 %v898_v16, %v6380_v14  ;;  %v2278_v2 = vrot.slane %v2276_v11, 1  ;;  %v744_v14 = vor.u32 %v742_v45, %v740_v38  ;;  %v5928_v45 = vld [vmem:[%s6111_s30 + $0x78] sm:$0xff] }
 0x123   : > { %v748_v16 = vrot.slane %v746_v60, 1 }
 0x124   : > { %v2437_v12 = vpop.f32.mrf.mxu0  ;;  %5012 = vmatmul.msk.bf16.gmra.mxu1 %vm307_vm1, %v741_v54  ;;  %5127 = vmatmul.msk.bf16.gmra.mxu2 %vm307_vm1, %v1246_v4  ;;  %v6536_v56 = vadd.f32 %v2434_v13, %v1951_v43  ;;  %v2281_v54 = vrot.slane %v2279_v36, 2  ;;  %v1247_v43 = vrot.slane %v5883_v3, 1  ;;  %v2285_v3 = vshrl.u32 %v5928_v45, 16 }
 0x125   : > { %v749_v11 = vsel %vm641_vm3, %v744_v14, %v748_v16  ;;  %v750_v14 = vshrl.u32 %v5861_v40, 16 }
 0x126   : > { %5244 = vmatmul.msk.bf16.gmra.mxu3 %vm307_vm1, %v1718_v19  ;;  %v2282_v22 = vor.u32 %v2281_v54, %v2278_v2  ;;  %v1248_v36 = vsel %vm1221_vm2, %v1245_v47, %v1247_v43  ;;  %v6567_v47 = vld [vmem:[%s6111_s30 + $0x70] sm:$0xff] }
 0x127   : > { %5357 = vmatmul.msk.bf16.gmra.mxu0 %vm307_vm1, %v2274_v41  ;;  %v1367_v26 = vpop.f32.mrf.mxu2  ;;  %v6550_v41 = vld [vmem:[%s6111_s30 + $0x80] sm:$0xff] }
 0x128   : > { %v1484_v32 = vadd.f32 %v1367_v26, %v1015_v17 }
 0x129   : > { %v900_v59 = vpop.f32.mrf.mxu1  ;;  %v6545_v4 = vpop.f32.mrf.mxu3 }
 0x12a   : > { %v1952_v13 = vadd.f32 %v6496_v23, %v1484_v32  ;;  %v1016_v62 = vadd.f32 %v900_v59, %v6400_v33  ;;  %v2283_v32 = vsel %vm2158_vm4, %v2273_v44, %v2282_v22  ;;  %v2288_v44 = vshll.u32 %v5928_v45, 16 }
 0x12c   : > { %v2439_v31 = vpop.f32.mrf.mxu0  ;;  %v6547_v61 = vadd.f32 %v2437_v12, %v1952_v13  ;;  %v1719_v12 = vrot.slane %v6550_v41, 1  ;;  %v6574_v41 = vld [vmem:[%s6111_s30 + $0x70] sm:$0xff] }
 0x12e   : > { %v1720_v59 = vsel %vm1221_vm2, %v1717_v30, %v1719_v12  ;;  %v2290_v30 = vrot.slane %v2288_v44, 2 }
 0x12f   : > { %v1369_v19 = vpop.f32.mrf.mxu2 }
 0x130   : > { %v1485_v17 = vadd.f32 %v1369_v19, %v1016_v62 }
 0x131   : > { %v903_v23 = vpop.f32.mrf.mxu1  ;;  %v6559_v60 = vpop.f32.mrf.mxu3 }
 0x132   : > { %v1953_v26 = vadd.f32 %v6507_v0, %v1485_v17  ;;  %v1017_v0 = vadd.f32 %v903_v23, %v6409_v55  ;;  %v2287_v17 = vrot.slane %v2285_v3, 1  ;;  %v5976_v55 = vld [vmem:[%s7212_s1 + $0xd8] sm:$0xff] }
 0x133   : > { %v5998_v23 = vld [vmem:[%s7212_s1 + $0xfc] sm:$0xff]  ;;  %3357 = vmatpush.bf16.msra.mxu2 %v5976_v55 }
 0x134   : > { %v2442_v38 = vpop.f32.mrf.mxu0  ;;  %5013 = vmatmul.msk.bf16.gmra.mxu1 %vm307_vm1, %v749_v11  ;;  %5128 = vmatmul.msk.bf16.gmra.mxu2 %vm307_vm1, %v1248_v36  ;;  %v6563_v33 = vadd.f32 %v2439_v31, %v1953_v26  ;;  %v754_v31 = vshll.u32 %v6567_v47, 16  ;;  %v752_v36 = vor.u32 %v750_v14, %v748_v16  ;;  %v1249_v26 = vrot.slane %v6574_v41, 1  ;;  %v5929_v41 = vld [vmem:[%s6111_s30 + $0x80] sm:$0xff] }
 0x135   : > { %3959 = vmatpush.bf16.msra.mxu3 %v5998_v23  ;;  %v2297_v55 = vshll.u32 %v5929_v41, 16 }
 0x136   : > { %5245 = vmatmul.msk.bf16.gmra.mxu3 %vm307_vm1, %v1720_v59  ;;  %v2291_v59 = vor.u32 %v2290_v30, %v2287_v17  ;;  %v2294_v30 = vshrl.u32 %v5929_v41, 16 }
 0x137   : > { %5358 = vmatmul.msk.bf16.gmra.mxu0 %vm307_vm1, %v2283_v32  ;;  %v1372_v13 = vpop.f32.mrf.mxu2  ;;  %v6589_v32 = vld [vmem:[%s6111_s30 + $0x88] sm:$0xff] }
 0x138   : > { %v1486_v2 = vadd.f32 %v1372_v13, %v1017_v0 }
 0x139   : > { %v905_v54 = vpop.f32.mrf.mxu1  ;;  %v6583_v11 = vpop.f32.mrf.mxu3 }
 0x13a   : > { %v1954_v62 = vadd.f32 %v6521_v53, %v1486_v2  ;;  %v756_v53 = vrot.slane %v754_v31, 1  ;;  %v1018_v45 = vadd.f32 %v905_v54, %v6426_v18  ;;  %v1250_v2 = vsel %vm1221_vm2, %v1247_v43, %v1249_v26  ;;  %v5954_v18 = vld [vmem:[%s7212_s1 + $0xb4] sm:$0xff]  ;;  %v6020_v43 = vld [vmem:[%s7212_s1 + $0x120] sm:$0xff] }
 0x13b   : > { %v2292_v31 = vsel %vm2158_vm4, %v2282_v22, %v2291_v59  ;;  %v5863_v22 = vld [vmem:[%s6111_s30 + $0x78] sm:$0xff]  ;;  %2889 = vmatpush.bf16.msra.mxu1 %v5954_v18  ;;  %4428 = vmatpush.bf16.msra.mxu0 %v6020_v43  ;;  %v6623_v18 = vld [vmem:[%s6111_s30 + $0x90] sm:$0xff] }
 0x13c   : > { %v2444_v19 = vpop.f32.mrf.mxu0  ;;  %v6585_v40 = vadd.f32 %v2442_v38, %v1954_v62  ;;  %v757_v13 = vsel %vm641_vm3, %v752_v36, %v756_v53  ;;  %v1721_v38 = vrot.slane %v6589_v32, 1 }
 0x13e   : > { %v1722_v62 = vsel %vm1221_vm2, %v1719_v12, %v1721_v38  ;;  %v2296_v12 = vrot.slane %v2294_v30, 1 }
 0x13f   : > { %v1374_v0 = vpop.f32.mrf.mxu2 }
 0x140   : > { %v1487_v3 = vadd.f32 %v1374_v0, %v1018_v45  ;;  %v762_v45 = vshll.u32 %v5863_v22, 16  ;;  %v5885_v0 = vld [vmem:[%s6111_s30 + $0x78] sm:$0xff] }
 0x141   : > { %v908_v44 = vpop.f32.mrf.mxu1  ;;  %v6601_v54 = vpop.f32.mrf.mxu3  ;;  %v1251_v41 = vrot.slane %v5885_v0, 1 }
 0x142   : > { %v1955_v16 = vadd.f32 %v6532_v63, %v1487_v3  ;;  %v1019_v17 = vadd.f32 %v908_v44, %v6285_v46 }
 0x144   : > { %v2447_v14 = vpop.f32.mrf.mxu0  ;;  %5014 = vmatmul.msk.bf16.gmra.mxu1 %vm307_vm1, %v757_v13  ;;  %5129 = vmatmul.msk.bf16.gmra.mxu2 %vm307_vm1, %v1250_v2  ;;  %v6608_v63 = vadd.f32 %v2444_v19, %v1955_v16  ;;  %v758_v19 = vshrl.u32 %v6567_v47, 16  ;;  %v2299_v2 = vrot.slane %v2297_v55, 2  ;;  %v1252_v55 = vsel %vm1221_vm2, %v1249_v26, %v1251_v41  ;;  %v6640_v26 = vld [vmem:[%s6111_s30 + $0x80] sm:$0xff] }
 0x146   : > { %7217 = vst [vmem:[#allocation6_spill] sm:$0xff] %v6608_v63  ;;  %5246 = vmatmul.msk.bf16.gmra.mxu3 %vm307_vm1, %v1722_v62  ;;  %v760_v44 = vor.u32 %v758_v19, %v756_v53  ;;  %v2300_v47 = vor.u32 %v2299_v2, %v2296_v12  ;;  %v5930_v19 = vld [vmem:[%s6111_s30 + $0x88] sm:$0xff] }
 0x147   : > { %5359 = vmatmul.msk.bf16.gmra.mxu0 %vm307_vm1, %v2292_v31  ;;  %v1377_v23 = vpop.f32.mrf.mxu2  ;;  %v764_v31 = vrot.slane %v762_v45, 1  ;;  %v2303_v0 = vshrl.u32 %v5930_v19, 16 }
 0x148   : > { %v1488_v36 = vadd.f32 %v1377_v23, %v1019_v17 }
 0x149   : > { %v910_v32 = vpop.f32.mrf.mxu1  ;;  %v6618_v16 = vpop.f32.mrf.mxu3  ;;  %v765_v30 = vsel %vm641_vm3, %v760_v44, %v764_v31 }
 0x14a   : > { %v1956_v3 = vadd.f32 %v6545_v4, %v1488_v36  ;;  %v1020_v43 = vadd.f32 %v910_v32, %v6301_v58  ;;  %v2301_v36 = vsel %vm2158_vm4, %v2291_v59, %v2300_v47  ;;  %v2306_v59 = vshll.u32 %v5930_v19, 16 }
 0x14c   : > { %v2449_v13 = vpop.f32.mrf.mxu0  ;;  %v6620_v46 = vadd.f32 %v2447_v14, %v1956_v3  ;;  %v1723_v14 = vrot.slane %v6623_v18, 1  ;;  %v1586_v3 = vld [vmem:[%s6111_s30 + $0x98] sm:$0x1]  ;;  %v766_v18 = vshrl.u32 %v5863_v22, 16 }
 0x14e   : > { %7218 = vst [vmem:[#allocation7_spill] sm:$0xff] %v6620_v46  ;;  %v1724_v32 = vsel %vm1221_vm2, %v1721_v38, %v1723_v14  ;;  %v2305_v38 = vrot.slane %v2303_v0, 1 }
 0x14f   : > { %v1379_v62 = vpop.f32.mrf.mxu2 }
 0x150   : > { %v1489_v17 = vadd.f32 %v1379_v62, %v1020_v43  ;;  %v6648_v43 = vld [vmem:[%s6111_s30 + $0x80] sm:$0xff]  ;;  %v1670_v62 = vunpack.c.l.b16 %v1586_v3 }
 0x151   : > { %v913_v4 = vpop.f32.mrf.mxu1  ;;  %v6632_v45 = vpop.f32.mrf.mxu3  ;;  %v1253_v19 = vrot.slane %v6648_v43, 1  ;;  %v5605_v43 = vld [vmem:[%s6111_s30 + $0x10] sm:$0xc] }
 0x152   : > { %v1957_v53 = vadd.f32 %v6559_v60, %v1489_v17  ;;  %v1021_v60 = vadd.f32 %v913_v4, %v6311_v8  ;;  %v1689_v22 = vpack.c.b16 %v1670_v62, %v1670_v62  ;;  %v5980_v62 = vld [vmem:[%s6111_s30 + $0x10] sm:$0xf0] }
 0x154   : > { %v2452_v23 = vpop.f32.mrf.mxu0  ;;  %5015 = vmatmul.msk.bf16.gmra.mxu1 %vm307_vm1, %v765_v30  ;;  %5130 = vmatmul.msk.bf16.gmra.mxu2 %vm307_vm1, %v1252_v55  ;;  %v6636_v58 = vadd.f32 %v2449_v13, %v1957_v53  ;;  %v770_v13 = vshll.u32 %v6640_v26, 16  ;;  %v2308_v55 = vrot.slane %v2306_v59, 2  ;;  %v768_v53 = vor.u32 %v766_v18, %v764_v31 }
 0x155   : > { %v1725_v31 = vrot.slane %v1689_v22, 1 }
 0x156   : > { %7219 = vst [vmem:[#allocation8_spill] sm:$0xff] %v6636_v58  ;;  %5247 = vmatmul.msk.bf16.gmra.mxu3 %vm307_vm1, %v1724_v32 }
 0x157   : > { %5360 = vmatmul.msk.bf16.gmra.mxu0 %vm307_vm1, %v2301_v36  ;;  %v1382_v12 = vpop.f32.mrf.mxu2  ;;  %v772_v36 = vrot.slane %v770_v13, 1  ;;  %v6670_v13 = vld [vmem:[%s6111_s30 + $0x88] sm:$0xff] }
 0x158   : > { %v1490_v2 = vadd.f32 %v1382_v12, %v1021_v60  ;;  %v6657_v60 = vor.u32 %v2308_v55, %v2305_v38 }
 0x159   : > { %v915_v44 = vpop.f32.mrf.mxu1  ;;  %v6651_v8 = vpop.f32.mrf.mxu3  ;;  %v773_v3 = vsel %vm641_vm3, %v768_v53, %v772_v36 }
 0x15a   : > { %v1958_v17 = vadd.f32 %v6583_v11, %v1490_v2  ;;  %v1022_v32 = vadd.f32 %v915_v44, %v6329_v21  ;;  %v2310_v18 = vsel %vm2158_vm4, %v2300_v47, %v6657_v60  ;;  %v5931_v21 = vld [vmem:[%s6111_s30 + $0x90] sm:$0xff]  ;;  %v5606_v47 = vor.u32 %v5980_v62, %v5605_v43 }
 0x15b   : > { %v2312_v55 = vshrl.u32 %v5931_v21, 16  ;;  %v2315_v53 = vshll.u32 %v5931_v21, 16 }
 0x15c   : > { %v2454_v30 = vpop.f32.mrf.mxu0  ;;  %v6653_v4 = vadd.f32 %v2452_v23, %v1958_v17  ;;  %v1254_v23 = vsel %vm1221_vm2, %v1251_v41, %v1253_v19  ;;  %v5981_v17 = vld [vmem:[%s6111_s30 + $0x18] sm:$0xff] }
 0x15d   : > { %v2317_v21 = vrot.slane %v2315_v53, 2 }
 0x15e   : > { %7220 = vst [vmem:[#allocation9_spill] sm:$0xff] %v6653_v4 }
 0x15f   : > { %v1384_v11 = vpop.f32.mrf.mxu2 }
 0x160   : > { %v1491_v0 = vadd.f32 %v1384_v11, %v1022_v32  ;;  %v774_v11 = vshrl.u32 %v6640_v26, 16  ;;  %v2054_v26 = vld [vmem:[%s6111_s30 + $0x98] sm:$0x3] }
 0x161   : > { %v918_v59 = vpop.f32.mrf.mxu1  ;;  %v6665_v44 = vpop.f32.mrf.mxu3 }
 0x162   : > { %v1959_v12 = vadd.f32 %v6601_v54, %v1491_v0  ;;  %v1726_v54 = vsel %vm1221_vm2, %v1723_v14, %v1725_v31  ;;  %v1023_v38 = vadd.f32 %v918_v59, %v6339_v35  ;;  %v778_v0 = vshll.u32 %v6670_v13, 16 }
 0x163   : > { %v3702_v14 = vshll.u32 %v5606_v47, 16  ;;  %v3707_v31 = vshrl.u32 %v5981_v17, 16  ;;  %v776_v62 = vor.u32 %v774_v11, %v772_v36 }
 0x164   : > { %v2457_v2 = vpop.f32.mrf.mxu0  ;;  %5016 = vmatmul.msk.bf16.gmra.mxu1 %vm307_vm1, %v773_v3  ;;  %5131 = vmatmul.msk.bf16.gmra.mxu2 %vm307_vm1, %v1254_v23  ;;  %v6674_v41 = vadd.f32 %v2454_v30, %v1959_v12  ;;  %v6683_v3 = vld [vmem:[%s6111_s30 + $0x88] sm:$0xff]  ;;  %v3699_v23 = vshrl.u32 %v5606_v47, 16  ;;  %v3710_v12 = vshll.u32 %v5981_v17, 16 }
 0x165   : > { %v3704_v4 = vrot.slane %v3702_v14, 3  ;;  %v3709_v47 = vrot.slane %v3707_v31, 2 }
 0x166   : > { %7221 = vst [vmem:[#allocation10_spill] sm:$0xff] %v6674_v41  ;;  %5248 = vmatmul.msk.bf16.gmra.mxu3 %vm307_vm1, %v1726_v54  ;;  %v3701_v54 = vrot.slane %v3699_v23, 2  ;;  %v3712_v58 = vrot.slane %v3710_v12, 3 }
 0x167   : > { %5361 = vmatmul.msk.bf16.gmra.mxu0 %vm307_vm1, %v2310_v18  ;;  %v1387_v22 = vpop.f32.mrf.mxu2  ;;  %v2314_v18 = vrot.slane %v2312_v55, 1  ;;  %v2138_v55 = vunpack.c.l.b16 %v2054_v26 }
 0x168   : > { %v1492_v32 = vadd.f32 %v1387_v22, %v1023_v38  ;;  %v780_v38 = vrot.slane %v778_v0, 1  ;;  %v1255_v22 = vrot.slane %v6683_v3, 1  ;;  %v3705_v0 = vor.u32 %v3704_v4, %v3701_v54 }
 0x169   : > { %v920_v30 = vpop.f32.mrf.mxu1  ;;  %v6687_v43 = vpop.f32.mrf.mxu3  ;;  %v2318_v17 = vor.u32 %v2317_v21, %v2314_v18  ;;  %v3713_v23 = vor.u32 %v3712_v58, %v3709_v47  ;;  %v2157_v12 = vpack.c.b16 %v2138_v55, %v2138_v55  ;;  %v782_v54 = vshrl.u32 %v6670_v13, 16 }
 0x16a   : > { %v1960_v35 = vadd.f32 %v6618_v16, %v1492_v32  ;;  %v1024_v16 = vadd.f32 %v920_v30, %v6360_v51  ;;  %v537_v32 = vld [vmem:[%s6111_s30 + $0x90] sm:$0x1]  ;;  %v781_v63 = vsel %vm641_vm3, %v776_v62, %v780_v38 }
 0x16b   : > { %v621_v11 = vunpack.c.l.b16 %v537_v32  ;;  %v2319_v51 = vsel %vm2158_vm4, %v6657_v60, %v2318_v17  ;;  %v1117_v30 = vld [vmem:[%s6111_s30 + $0x90] sm:$0x1]  ;;  %v2321_v18 = vshrl.u32 %v2157_v12, 16  ;;  %v2324_v21 = vshll.u32 %v2157_v12, 16 }
 0x16c   : > { %v2459_v59 = vpop.f32.mrf.mxu0  ;;  %v6691_v41 = vadd.f32 %v2457_v2, %v1960_v35  ;;  %v1256_v2 = vsel %vm1221_vm2, %v1253_v19, %v1255_v22  ;;  %v1201_v4 = vunpack.c.l.b16 %v1117_v30 }
 0x16d   : > { %v640_v58 = vpack.c.b16 %v621_v11, %v621_v11  ;;  %v2326_v11 = vrot.slane %v2324_v21, 2 }
 0x16e   : > { %v1220_v47 = vpack.c.b16 %v1201_v4, %v1201_v4 }
 0x16f   : > { %v1389_v53 = vpop.f32.mrf.mxu2 }
 0x170   : > { %v1493_v46 = vadd.f32 %v1389_v53, %v1024_v16 }
 0x171   : > { %v923_v36 = vpop.f32.mrf.mxu1  ;;  %v6703_v35 = vpop.f32.mrf.mxu3 }
 0x172   : > { %v1961_v14 = vadd.f32 %v6632_v45, %v1493_v46  ;;  %v3714_v46 = vsel %vm3697_vm5, %v3705_v0, %v3713_v23  ;;  %v5982_v45 = vld [vmem:[%s6111_s30 + $0x20] sm:$0xff]  ;;  %v1025_v60 = vadd.f32 %v923_v36, %v6376_v9  ;;  %v784_v9 = vor.u32 %v782_v54, %v780_v38 }
 0x173   : > { %v3716_v16 = vshrl.u32 %v5982_v45, 16  ;;  %v3719_v32 = vshll.u32 %v5982_v45, 16 }
 0x174   : > { %v2462_v31 = vpop.f32.mrf.mxu0  ;;  %5017 = vmatmul.msk.bf16.gmra.mxu1 %vm307_vm1, %v781_v63  ;;  %5132 = vmatmul.msk.bf16.gmra.mxu2 %vm307_vm1, %v1256_v2  ;;  %v6707_v19 = vadd.f32 %v2459_v59, %v1961_v14  ;;  %v786_v59 = vshll.u32 %v640_v58, 16  ;;  %v2323_v2 = vrot.slane %v2321_v18, 1 }
 0x175   : > { %v3718_v13 = vrot.slane %v3716_v16, 2  ;;  %v3721_v30 = vrot.slane %v3719_v32, 3  ;;  %v6002_v16 = vld [vmem:[%s6111_s30 + $0x10] sm:$0xf0] }
 0x176   : > { %5691 = vmatmul.msk.bf16.vlgmr.msra.gmra.mxu3 %vm307_vm1, %v3714_v46  ;;  %v788_v14 = vrot.slane %v786_v59, 1  ;;  %v2327_v58 = vor.u32 %v2326_v11, %v2323_v2  ;;  %v6748_v11 = vld [vmem:[%s6111_s30 + $0x18] sm:$0xff] }
 0x177   : > { %5362 = vmatmul.msk.bf16.gmra.mxu0 %vm307_vm1, %v2319_v51  ;;  %v1392_v26 = vpop.f32.mrf.mxu2  ;;  %v1257_v51 = vrot.slane %v1220_v47, 1  ;;  %v5720_v47 = vld [vmem:[%s6111_s30 + $0x10] sm:$0x8] }
 0x178   : > { %v1494_v62 = vadd.f32 %v1392_v26, %v1025_v60  ;;  %v789_v45 = vsel %vm641_vm3, %v784_v9, %v788_v14  ;;  %v2328_v18 = vsel %vm2158_vm4, %v2318_v17, %v2327_v58  ;;  %v5936_v26 = vld [vmem:[%s6111_s30 + $0x8] sm:$0xf0]  ;;  %v5490_v17 = vld [vmem:[%s6111_s30 + $0x10] sm:$0xc] }
 0x179   : > { %v925_v63 = vpop.f32.mrf.mxu1  ;;  %v6716_v0 = vpop.f32.mrf.mxu3  ;;  %v1258_v38 = vsel %vm1221_vm2, %v1255_v22, %v1257_v51  ;;  %v5375_v22 = vld [vmem:[%s6111_s30 + $0x8] sm:$0xc] }
 0x17a   : > { %v1962_v55 = vadd.f32 %v6651_v8, %v1494_v62  ;;  %v1026_v12 = vadd.f32 %v925_v63, %v6397_v29  ;;  %v5983_v62 = vld [vmem:[%s6111_s30 + $0x28] sm:$0xff]  ;;  %v5958_v63 = vld [vmem:[%s6111_s30 + $0x10] sm:$0xf0] }
 0x17b   : > { %v5491_v9 = vor.u32 %v5958_v63, %v5490_v17  ;;  %v3728_v14 = vshll.u32 %v5983_v62, 16 }
 0x17c   : > { %v2464_v53 = vpop.f32.mrf.mxu0  ;;  %v6718_v36 = vadd.f32 %v2462_v31, %v1962_v55  ;;  %v3722_v31 = vor.u32 %v3721_v30, %v3718_v13  ;;  %v6744_v55 = vld [vmem:[%s6111_s30 + $0x10] sm:$0xff]  ;;  %v6003_v13 = vld [vmem:[%s6111_s30 + $0x18] sm:$0xff]  ;;  %v5721_v30 = vor.u32 %v6002_v16, %v5720_v47 }
 0x17f   : > { %v1394_v4 = vpop.f32.mrf.mxu2 }
 0x180   : > { %v1495_v46 = vadd.f32 %v1394_v4, %v1026_v12  ;;  %v2762_v4 = vrot.slane %v6744_v55, 2  ;;  %v5984_v55 = vld [vmem:[%s6111_s30 + $0x30] sm:$0xff] }
 0x181   : > { %v928_v8 = vpop.f32.mrf.mxu1  ;;  %v6727_v21 = vpop.f32.mrf.mxu3 }
 0x182   : > { %v1963_v60 = vadd.f32 %v6665_v44, %v1495_v46  ;;  %v3723_v44 = vsel %vm3697_vm5, %v3713_v23, %v3722_v31  ;;  %v1027_v54 = vadd.f32 %v928_v8, %v6405_v52  ;;  %v3725_v23 = vshrl.u32 %v5983_v62, 16 }
 0x183   : > { %v3229_v8 = vrot.slane %v5491_v9, 2  ;;  %v5938_v9 = vld [vmem:[%s6111_s30 + $0x18] sm:$0xff] }
 0x184   : > { %v2467_v29 = vpop.f32.mrf.mxu0  ;;  %5018 = vmatmul.msk.bf16.gmra.mxu1 %vm307_vm1, %v789_v45  ;;  %5133 = vmatmul.msk.bf16.gmra.mxu2 %vm307_vm1, %v1258_v38  ;;  %v6731_v3 = vadd.f32 %v2464_v53, %v1963_v60  ;;  %v5376_v53 = vor.u32 %v5936_v26, %v5375_v22  ;;  %v3230_v45 = vrot.slane %v6748_v11, 2  ;;  %v3727_v38 = vrot.slane %v3725_v23, 2  ;;  %v5960_v23 = vld [vmem:[%s6111_s30 + $0x20] sm:$0xff] }
 0x185   : > { %v3730_v60 = vrot.slane %v3728_v14, 3  ;;  %v4300_v22 = vrot.slane %v5721_v30, 3  ;;  %v3734_v14 = vshrl.u32 %v5984_v55, 16  ;;  %v6004_v30 = vld [vmem:[%s6111_s30 + $0x20] sm:$0xff] }
 0x186   : > { %5692 = vmatmul.msk.bf16.gmra.mxu3 %vm307_vm1, %v3723_v44  ;;  %v2761_v58 = vrot.slane %v5376_v53, 2 }
 0x187   : > { %5363 = vmatmul.msk.bf16.gmra.mxu0 %vm307_vm1, %v2328_v18  ;;  %v1397_v59 = vpop.f32.mrf.mxu2  ;;  %v3731_v17 = vor.u32 %v3730_v60, %v3727_v38  ;;  %v3232_v38 = vrot.slane %v5960_v23, 2 }
 0x188   : > { %v1496_v32 = vadd.f32 %v1397_v59, %v1027_v54  ;;  %v2763_v54 = vsel %vm2760_vm6, %v2761_v58, %v2762_v4 }
 0x189   : > { %v930_v2 = vpop.f32.mrf.mxu1  ;;  %v6752_v12 = vpop.f32.mrf.mxu3 }
 0x18a   : > { %v1964_v52 = vadd.f32 %v6687_v43, %v1496_v32  ;;  %v1028_v18 = vadd.f32 %v930_v2, %v6423_v5  ;;  %v4301_v43 = vrot.slane %v6003_v13, 3  ;;  %v3732_v32 = vsel %vm3697_vm5, %v3722_v31, %v3731_v17 }
 0x18b   : > { %v2764_v31 = vrot.slane %v5938_v9, 2 }
 0x18c   : > { %v2469_v51 = vpop.f32.mrf.mxu0  ;;  %v6755_v46 = vadd.f32 %v2467_v29, %v1964_v52  ;;  %v3231_v29 = vsel %vm2760_vm6, %v3229_v8, %v3230_v45  ;;  %v4302_v5 = vsel %vm4299_vm7, %v4300_v22, %v4301_v43  ;;  %v3737_v52 = vshll.u32 %v5984_v55, 16 }
 0x18d   : > { %v4303_v22 = vrot.slane %v6004_v30, 3 }
 0x18e   : > { %v3739_v60 = vrot.slane %v3737_v52, 3  ;;  %v6005_v52 = vld [vmem:[%s6111_s30 + $0x28] sm:$0xff] }
 0x18f   : > { %v1399_v26 = vpop.f32.mrf.mxu2 }
 0x190   : > { %v1497_v44 = vadd.f32 %v1399_v26, %v1028_v18 }
 0x191   : > { %v933_v62 = vpop.f32.mrf.mxu1  ;;  %v6763_v47 = vpop.f32.mrf.mxu3 }
 0x192   : > { %v1965_v63 = vadd.f32 %v6703_v35, %v1497_v44  ;;  %v1029_v35 = vadd.f32 %v933_v62, %v6298_v57  ;;  %v3736_v57 = vrot.slane %v3734_v14, 2 }
 0x194   : > { %v2472_v59 = vpop.f32.mrf.mxu0  ;;  %5461 = vmatmul.msk.bf16.vlgmr.msra.gmra.mxu1 %vm307_vm1, %v2763_v54  ;;  %5576 = vmatmul.msk.bf16.vlgmr.msra.gmra.mxu2 %vm307_vm1, %v3231_v29  ;;  %v6767_v16 = vadd.f32 %v2469_v51, %v1965_v63  ;;  %v2765_v54 = vsel %vm2760_vm6, %v2762_v4, %v2764_v31  ;;  %v3740_v29 = vor.u32 %v3739_v60, %v3736_v57 }
 0x196   : > { %5693 = vmatmul.msk.bf16.gmra.mxu3 %vm307_vm1, %v3732_v32  ;;  %v3741_v4 = vsel %vm3697_vm5, %v3731_v17, %v3740_v29 }
 0x197   : > { %5806 = vmatmul.msk.bf16.vlgmr.msra.gmra.mxu0 %vm307_vm1, %v4302_v5  ;;  %v1402_v53 = vpop.f32.mrf.mxu2  ;;  %v4304_v5 = vsel %vm4299_vm7, %v4301_v43, %v4303_v22 }
 0x198   : > { %v1498_v2 = vadd.f32 %v1402_v53, %v1029_v35  ;;  %v5939_v53 = vld [vmem:[%s6111_s30 + $0x20] sm:$0xff] }
 0x199   : > { %v935_v11 = vpop.f32.mrf.mxu1  ;;  %v6778_v58 = vpop.f32.mrf.mxu3  ;;  %v2766_v17 = vrot.slane %v5939_v53, 2 }
 0x19a   : > { %v1966_v13 = vadd.f32 %v6716_v0, %v1498_v2  ;;  %v1030_v18 = vadd.f32 %v935_v11, %v6309_v7  ;;  %v3233_v0 = vsel %vm2760_vm6, %v3230_v45, %v3232_v38  ;;  %v5985_v45 = vld [vmem:[%s6111_s30 + $0x38] sm:$0xff]  ;;  %v5961_v2 = vld [vmem:[%s6111_s30 + $0x28] sm:$0xff] }
 0x19b   : > { %v3743_v11 = vshrl.u32 %v5985_v45, 16  ;;  %v3746_v9 = vshll.u32 %v5985_v45, 16  ;;  %v3234_v30 = vrot.slane %v5961_v2, 2 }
 0x19c   : > { %v2474_v51 = vpop.f32.mrf.mxu0  ;;  %v6780_v8 = vadd.f32 %v2472_v59, %v1966_v13 }
 0x19d   : > { %v3748_v57 = vrot.slane %v3746_v9, 3  ;;  %v6006_v9 = vld [vmem:[%s6111_s30 + $0x30] sm:$0xff] }
 0x19f   : > { %v1404_v26 = vpop.f32.mrf.mxu2 }
 0x1a0   : > { %v1499_v44 = vadd.f32 %v1404_v26, %v1030_v18  ;;  %v4305_v18 = vrot.slane %v6005_v52, 3 }
 0x1a1   : > { %v938_v62 = vpop.f32.mrf.mxu1  ;;  %v6787_v32 = vpop.f32.mrf.mxu3 }
 0x1a2   : > { %v1967_v63 = vadd.f32 %v6727_v21, %v1499_v44  ;;  %v1031_v21 = vadd.f32 %v938_v62, %v6326_v20  ;;  %v3745_v20 = vrot.slane %v3743_v11, 2 }
 0x1a4   : > { %v2477_v59 = vpop.f32.mrf.mxu0  ;;  %5462 = vmatmul.msk.bf16.gmra.mxu1 %vm307_vm1, %v2765_v54  ;;  %5577 = vmatmul.msk.bf16.gmra.mxu2 %vm307_vm1, %v3233_v0  ;;  %v6791_v7 = vadd.f32 %v2474_v51, %v1967_v63  ;;  %v2767_v54 = vsel %vm2760_vm6, %v2764_v31, %v2766_v17  ;;  %v3749_v0 = vor.u32 %v3748_v57, %v3745_v20 }
 0x1a6   : > { %5694 = vmatmul.msk.bf16.gmra.mxu3 %vm307_vm1, %v3741_v4  ;;  %v3750_v31 = vsel %vm3697_vm5, %v3740_v29, %v3749_v0 }
 0x1a7   : > { %5807 = vmatmul.msk.bf16.gmra.mxu0 %vm307_vm1, %v4304_v5  ;;  %v1407_v55 = vpop.f32.mrf.mxu2  ;;  %v4306_v5 = vsel %vm4299_vm7, %v4303_v22, %v4305_v18 }
 0x1a8   : > { %v1500_v35 = vadd.f32 %v1407_v55, %v1031_v21  ;;  %v5940_v55 = vld [vmem:[%s6111_s30 + $0x28] sm:$0xff] }
 0x1a9   : > { %v940_v43 = vpop.f32.mrf.mxu1  ;;  %v6802_v13 = vpop.f32.mrf.mxu3  ;;  %v2768_v29 = vrot.slane %v5940_v55, 2 }
 0x1aa   : > { %v1968_v23 = vadd.f32 %v6752_v12, %v1500_v35  ;;  %v1032_v60 = vadd.f32 %v940_v43, %v6337_v34  ;;  %v3235_v12 = vsel %vm2760_vm6, %v3232_v38, %v3234_v30  ;;  %v5986_v38 = vld [vmem:[%s6111_s30 + $0x40] sm:$0xff]  ;;  %v5962_v35 = vld [vmem:[%s6111_s30 + $0x30] sm:$0xff] }
 0x1ab   : > { %v3752_v43 = vshrl.u32 %v5986_v38, 16  ;;  %v3755_v53 = vshll.u32 %v5986_v38, 16  ;;  %v3236_v52 = vrot.slane %v5962_v35, 2 }
 0x1ac   : > { %v2479_v14 = vpop.f32.mrf.mxu0  ;;  %v6804_v51 = vadd.f32 %v2477_v59, %v1968_v23 }
 0x1ad   : > { %v3757_v20 = vrot.slane %v3755_v53, 3  ;;  %v6007_v53 = vld [vmem:[%s6111_s30 + $0x38] sm:$0xff] }
 0x1af   : > { %v1409_v26 = vpop.f32.mrf.mxu2 }
 0x1b0   : > { %v1501_v44 = vadd.f32 %v1409_v26, %v1032_v60  ;;  %v4307_v60 = vrot.slane %v6006_v9, 3 }
 0x1b1   : > { %v943_v62 = vpop.f32.mrf.mxu1  ;;  %v6811_v4 = vpop.f32.mrf.mxu3 }
 0x1b2   : > { %v1969_v63 = vadd.f32 %v6763_v47, %v1501_v44  ;;  %v1033_v47 = vadd.f32 %v943_v62, %v6354_v48  ;;  %v3754_v48 = vrot.slane %v3752_v43, 2 }
 0x1b4   : > { %v2482_v59 = vpop.f32.mrf.mxu0  ;;  %5463 = vmatmul.msk.bf16.gmra.mxu1 %vm307_vm1, %v2767_v54  ;;  %5578 = vmatmul.msk.bf16.gmra.mxu2 %vm307_vm1, %v3235_v12  ;;  %v6815_v34 = vadd.f32 %v2479_v14, %v1969_v63  ;;  %v2769_v54 = vsel %vm2760_vm6, %v2766_v17, %v2768_v29  ;;  %v3758_v12 = vor.u32 %v3757_v20, %v3754_v48 }
 0x1b6   : > { %5695 = vmatmul.msk.bf16.gmra.mxu3 %vm307_vm1, %v3750_v31  ;;  %v3759_v17 = vsel %vm3697_vm5, %v3749_v0, %v3758_v12 }
 0x1b7   : > { %5808 = vmatmul.msk.bf16.gmra.mxu0 %vm307_vm1, %v4306_v5  ;;  %v1412_v45 = vpop.f32.mrf.mxu2  ;;  %v4308_v5 = vsel %vm4299_vm7, %v4305_v18, %v4307_v60 }
 0x1b8   : > { %v1502_v21 = vadd.f32 %v1412_v45, %v1033_v47  ;;  %v5941_v45 = vld [vmem:[%s6111_s30 + $0x30] sm:$0xff] }
 0x1b9   : > { %v945_v22 = vpop.f32.mrf.mxu1  ;;  %v6826_v23 = vpop.f32.mrf.mxu3  ;;  %v2770_v0 = vrot.slane %v5941_v45, 2 }
 0x1ba   : > { %v1970_v2 = vadd.f32 %v6778_v58, %v1502_v21  ;;  %v1034_v57 = vadd.f32 %v945_v22, %v6374_v6  ;;  %v3237_v58 = vsel %vm2760_vm6, %v3234_v30, %v3236_v52  ;;  %v5987_v30 = vld [vmem:[%s6111_s30 + $0x48] sm:$0xff]  ;;  %v5963_v21 = vld [vmem:[%s6111_s30 + $0x38] sm:$0xff] }
 0x1bb   : > { %v3761_v22 = vshrl.u32 %v5987_v30, 16  ;;  %v3764_v55 = vshll.u32 %v5987_v30, 16  ;;  %v3238_v9 = vrot.slane %v5963_v21, 2 }
 0x1bc   : > { %v2484_v11 = vpop.f32.mrf.mxu0  ;;  %v6828_v14 = vadd.f32 %v2482_v59, %v1970_v2 }
 0x1bd   : > { %v3766_v48 = vrot.slane %v3764_v55, 3  ;;  %v6008_v55 = vld [vmem:[%s6111_s30 + $0x40] sm:$0xff] }
 0x1bf   : > { %v1414_v26 = vpop.f32.mrf.mxu2 }
 0x1c0   : > { %v1503_v44 = vadd.f32 %v1414_v26, %v1034_v57  ;;  %v4309_v57 = vrot.slane %v6007_v53, 3 }
 0x1c1   : > { %v948_v62 = vpop.f32.mrf.mxu1  ;;  %v6835_v31 = vpop.f32.mrf.mxu3 }
 0x1c2   : > { %v1971_v63 = vadd.f32 %v6787_v32, %v1503_v44  ;;  %v1035_v32 = vadd.f32 %v948_v62, %v6394_v27  ;;  %v3763_v27 = vrot.slane %v3761_v22, 2 }
 0x1c4   : > { %v2487_v59 = vpop.f32.mrf.mxu0  ;;  %5464 = vmatmul.msk.bf16.gmra.mxu1 %vm307_vm1, %v2769_v54  ;;  %5579 = vmatmul.msk.bf16.gmra.mxu2 %vm307_vm1, %v3237_v58  ;;  %v6839_v6 = vadd.f32 %v2484_v11, %v1971_v63  ;;  %v2771_v54 = vsel %vm2760_vm6, %v2768_v29, %v2770_v0  ;;  %v3767_v58 = vor.u32 %v3766_v48, %v3763_v27 }
 0x1c6   : > { %5696 = vmatmul.msk.bf16.gmra.mxu3 %vm307_vm1, %v3759_v17  ;;  %v3768_v29 = vsel %vm3697_vm5, %v3758_v12, %v3767_v58 }
 0x1c7   : > { %5809 = vmatmul.msk.bf16.gmra.mxu0 %vm307_vm1, %v4308_v5  ;;  %v1417_v38 = vpop.f32.mrf.mxu2  ;;  %v4310_v5 = vsel %vm4299_vm7, %v4307_v60, %v4309_v57 }
 0x1c8   : > { %v1504_v47 = vadd.f32 %v1417_v38, %v1035_v32  ;;  %v5942_v38 = vld [vmem:[%s6111_s30 + $0x38] sm:$0xff] }
 0x1c9   : > { %v950_v18 = vpop.f32.mrf.mxu1  ;;  %v6850_v2 = vpop.f32.mrf.mxu3  ;;  %v2772_v12 = vrot.slane %v5942_v38, 2 }
 0x1ca   : > { %v1972_v35 = vadd.f32 %v6802_v13, %v1504_v47  ;;  %v1036_v20 = vadd.f32 %v950_v18, %v6403_v49  ;;  %v3239_v13 = vsel %vm2760_vm6, %v3236_v52, %v3238_v9  ;;  %v5988_v52 = vld [vmem:[%s6111_s30 + $0x50] sm:$0xff]  ;;  %v5964_v47 = vld [vmem:[%s6111_s30 + $0x40] sm:$0xff] }
 0x1cb   : > { %v3770_v18 = vshrl.u32 %v5988_v52, 16  ;;  %v3773_v45 = vshll.u32 %v5988_v52, 16  ;;  %v3240_v53 = vrot.slane %v5964_v47, 2 }
 0x1cc   : > { %v2489_v43 = vpop.f32.mrf.mxu0  ;;  %v6852_v11 = vadd.f32 %v2487_v59, %v1972_v35 }
 0x1cd   : > { %v3775_v27 = vrot.slane %v3773_v45, 3  ;;  %v6009_v45 = vld [vmem:[%s6111_s30 + $0x48] sm:$0xff] }
 0x1cf   : > { %v1419_v26 = vpop.f32.mrf.mxu2 }
 0x1d0   : > { %v1505_v44 = vadd.f32 %v1419_v26, %v1036_v20  ;;  %v4311_v20 = vrot.slane %v6008_v55, 3 }
 0x1d1   : > { %v953_v62 = vpop.f32.mrf.mxu1  ;;  %v6859_v17 = vpop.f32.mrf.mxu3 }
 0x1d2   : > { %v1973_v63 = vadd.f32 %v6811_v4, %v1505_v44  ;;  %v1037_v4 = vadd.f32 %v953_v62, %v6420_v10  ;;  %v3772_v10 = vrot.slane %v3770_v18, 2 }
 0x1d4   : > { %v2492_v59 = vpop.f32.mrf.mxu0  ;;  %5465 = vmatmul.msk.bf16.gmra.mxu1 %vm307_vm1, %v2771_v54  ;;  %5580 = vmatmul.msk.bf16.gmra.mxu2 %vm307_vm1, %v3239_v13  ;;  %v6863_v49 = vadd.f32 %v2489_v43, %v1973_v63  ;;  %v2773_v54 = vsel %vm2760_vm6, %v2770_v0, %v2772_v12  ;;  %v3776_v13 = vor.u32 %v3775_v27, %v3772_v10 }
 0x1d6   : > { %5697 = vmatmul.msk.bf16.gmra.mxu3 %vm307_vm1, %v3768_v29  ;;  %v3777_v0 = vsel %vm3697_vm5, %v3767_v58, %v3776_v13 }
 0x1d7   : > { %5810 = vmatmul.msk.bf16.gmra.mxu0 %vm307_vm1, %v4310_v5  ;;  %v1422_v30 = vpop.f32.mrf.mxu2  ;;  %v4312_v5 = vsel %vm4299_vm7, %v4309_v57, %v4311_v20 }
 0x1d8   : > { %v1506_v32 = vadd.f32 %v1422_v30, %v1037_v4  ;;  %v5943_v30 = vld [vmem:[%s6111_s30 + $0x40] sm:$0xff] }
 0x1d9   : > { %v955_v60 = vpop.f32.mrf.mxu1  ;;  %v6874_v35 = vpop.f32.mrf.mxu3  ;;  %v2774_v58 = vrot.slane %v5943_v30, 2 }
 0x1da   : > { %v1974_v21 = vadd.f32 %v6826_v23, %v1506_v32  ;;  %v1038_v48 = vadd.f32 %v955_v60, %v6431_v37  ;;  %v3241_v23 = vsel %vm2760_vm6, %v3238_v9, %v3240_v53  ;;  %v5989_v9 = vld [vmem:[%s6111_s30 + $0x58] sm:$0xff]  ;;  %v5965_v32 = vld [vmem:[%s6111_s30 + $0x48] sm:$0xff] }
 0x1db   : > { %v3779_v60 = vshrl.u32 %v5989_v9, 16  ;;  %v3782_v38 = vshll.u32 %v5989_v9, 16  ;;  %v3242_v55 = vrot.slane %v5965_v32, 2 }
 0x1dc   : > { %v2494_v22 = vpop.f32.mrf.mxu0  ;;  %v6876_v43 = vadd.f32 %v2492_v59, %v1974_v21 }
 0x1dd   : > { %v3784_v10 = vrot.slane %v3782_v38, 3  ;;  %v6010_v38 = vld [vmem:[%s6111_s30 + $0x50] sm:$0xff] }
 0x1df   : > { %v1424_v26 = vpop.f32.mrf.mxu2 }
 0x1e0   : > { %v1507_v44 = vadd.f32 %v1424_v26, %v1038_v48  ;;  %v4313_v48 = vrot.slane %v6009_v45, 3 }
 0x1e1   : > { %v958_v62 = vpop.f32.mrf.mxu1  ;;  %v6883_v29 = vpop.f32.mrf.mxu3 }
 0x1e2   : > { %v1975_v63 = vadd.f32 %v6835_v31, %v1507_v44  ;;  %v1039_v31 = vadd.f32 %v958_v62, %v6306_v1  ;;  %v3781_v1 = vrot.slane %v3779_v60, 2 }
 0x1e4   : > { %v2497_v59 = vpop.f32.mrf.mxu0  ;;  %5466 = vmatmul.msk.bf16.gmra.mxu1 %vm307_vm1, %v2773_v54  ;;  %5581 = vmatmul.msk.bf16.gmra.mxu2 %vm307_vm1, %v3241_v23  ;;  %v6887_v37 = vadd.f32 %v2494_v22, %v1975_v63  ;;  %v2775_v54 = vsel %vm2760_vm6, %v2772_v12, %v2774_v58  ;;  %v3785_v23 = vor.u32 %v3784_v10, %v3781_v1 }
 0x1e6   : > { %5698 = vmatmul.msk.bf16.gmra.mxu3 %vm307_vm1, %v3777_v0  ;;  %v3786_v12 = vsel %vm3697_vm5, %v3776_v13, %v3785_v23 }
 0x1e7   : > { %5811 = vmatmul.msk.bf16.gmra.mxu0 %vm307_vm1, %v4312_v5  ;;  %v1427_v52 = vpop.f32.mrf.mxu2  ;;  %v4314_v5 = vsel %vm4299_vm7, %v4311_v20, %v4313_v48 }
 0x1e8   : > { %v1508_v4 = vadd.f32 %v1427_v52, %v1039_v31  ;;  %v5944_v52 = vld [vmem:[%s6111_s30 + $0x48] sm:$0xff] }
 0x1e9   : > { %v960_v57 = vpop.f32.mrf.mxu1  ;;  %v6898_v21 = vpop.f32.mrf.mxu3  ;;  %v2776_v13 = vrot.slane %v5944_v52, 2 }
 0x1ea   : > { %v1976_v47 = vadd.f32 %v6850_v2, %v1508_v4  ;;  %v1040_v27 = vadd.f32 %v960_v57, %v6319_v15  ;;  %v3243_v2 = vsel %vm2760_vm6, %v3240_v53, %v3242_v55  ;;  %v5990_v53 = vld [vmem:[%s6111_s30 + $0x60] sm:$0xff]  ;;  %v5966_v4 = vld [vmem:[%s6111_s30 + $0x50] sm:$0xff] }
 0x1eb   : > { %v3788_v57 = vshrl.u32 %v5990_v53, 16  ;;  %v3791_v30 = vshll.u32 %v5990_v53, 16  ;;  %v3244_v45 = vrot.slane %v5966_v4, 2  ;;  %v7222_v53 = vld [vmem:[#allocation3_spill] sm:$0xff] }
 0x1ec   : > { %v2499_v18 = vpop.f32.mrf.mxu0  ;;  %v6900_v22 = vadd.f32 %v2497_v59, %v1976_v47 }
 0x1ed   : > { %v3793_v1 = vrot.slane %v3791_v30, 3 }
 0x1ef   : > { %v1429_v26 = vpop.f32.mrf.mxu2 }
 0x1f0   : > { %v1509_v44 = vadd.f32 %v1429_v26, %v1040_v27  ;;  %v4315_v27 = vrot.slane %v6010_v38, 3 }
 0x1f1   : > { %v963_v62 = vpop.f32.mrf.mxu1  ;;  %v6907_v0 = vpop.f32.mrf.mxu3 }
 0x1f2   : > { %v1977_v63 = vadd.f32 %v6859_v17, %v1509_v44  ;;  %v1041_v17 = vadd.f32 %v963_v62, %v6334_v28  ;;  %v3790_v28 = vrot.slane %v3788_v57, 2 }
 0x1f4   : > { %v2502_v59 = vpop.f32.mrf.mxu0  ;;  %5467 = vmatmul.msk.bf16.gmra.mxu1 %vm307_vm1, %v2775_v54  ;;  %5582 = vmatmul.msk.bf16.gmra.mxu2 %vm307_vm1, %v3243_v2  ;;  %v6911_v15 = vadd.f32 %v2499_v18, %v1977_v63  ;;  %v2777_v54 = vsel %vm2760_vm6, %v2774_v58, %v2776_v13  ;;  %v3794_v2 = vor.u32 %v3793_v1, %v3790_v28 }
 0x1f6   : > { %5699 = vmatmul.msk.bf16.gmra.mxu3 %vm307_vm1, %v3786_v12  ;;  %v3795_v58 = vsel %vm3697_vm5, %v3785_v23, %v3794_v2 }
 0x1f7   : > { %5812 = vmatmul.msk.bf16.gmra.mxu0 %vm307_vm1, %v4314_v5  ;;  %v1432_v9 = vpop.f32.mrf.mxu2  ;;  %v4316_v5 = vsel %vm4299_vm7, %v4313_v48, %v4315_v27 }
 0x1f8   : > { %v1510_v31 = vadd.f32 %v1432_v9, %v1041_v17 }
 0x1f9   : > { %v965_v20 = vpop.f32.mrf.mxu1  ;;  %v6922_v47 = vpop.f32.mrf.mxu3 }
 0x1fa   : > { %v1978_v32 = vadd.f32 %v6874_v35, %v1510_v31  ;;  %v1042_v10 = vadd.f32 %v965_v20, %v6347_v42  ;;  %v3245_v35 = vsel %vm2760_vm6, %v3242_v55, %v3244_v45  ;;  %v5991_v55 = vld [vmem:[%s6111_s30 + $0x68] sm:$0xff]  ;;  %v5945_v31 = vld [vmem:[%s6111_s30 + $0x50] sm:$0xff]  ;;  %v5967_v20 = vld [vmem:[%s6111_s30 + $0x58] sm:$0xff] }
 0x1fb   : > { %v3797_v52 = vshrl.u32 %v5991_v55, 16  ;;  %v3800_v4 = vshll.u32 %v5991_v55, 16  ;;  %v2778_v23 = vrot.slane %v5945_v31, 2  ;;  %v3246_v28 = vrot.slane %v5967_v20, 2  ;;  %v6968_v31 = vld [vmem:[%s6111_s30 + $0x58] sm:$0xff]  ;;  %v6971_v20 = vld [vmem:[%s6111_s30 + $0x60] sm:$0xff] }
 0x1fc   : > { %v2504_v60 = vpop.f32.mrf.mxu0  ;;  %v6924_v18 = vadd.f32 %v2502_v59, %v1978_v32  ;;  %v6011_v32 = vld [vmem:[%s6111_s30 + $0x58] sm:$0xff] }
 0x1fd   : > { %v3799_v1 = vrot.slane %v3797_v52, 2 }
 0x1ff   : > { %v1434_v26 = vpop.f32.mrf.mxu2 }
 0x200   : > { %v1511_v44 = vadd.f32 %v1434_v26, %v1042_v10  ;;  %v3802_v10 = vrot.slane %v3800_v4, 3  ;;  %v7223_v26 = vld [vmem:[#allocation4_spill] sm:$0xff] }
 0x201   : > { %v968_v62 = vpop.f32.mrf.mxu1  ;;  %v6931_v12 = vpop.f32.mrf.mxu3 }
 0x202   : > { %v1979_v63 = vadd.f32 %v6883_v29, %v1511_v44  ;;  %v1043_v29 = vadd.f32 %v968_v62, %v7222_v53  ;;  %v4317_v62 = vrot.slane %v6011_v32, 3  ;;  %v6012_v32 = vld [vmem:[%s6111_s30 + $0x60] sm:$0xff] }
 0x204   : > { %v2507_v59 = vpop.f32.mrf.mxu0  ;;  %5468 = vmatmul.msk.bf16.gmra.mxu1 %vm307_vm1, %v2777_v54  ;;  %5583 = vmatmul.msk.bf16.gmra.mxu2 %vm307_vm1, %v3245_v35  ;;  %v6935_v42 = vadd.f32 %v2504_v60, %v1979_v63  ;;  %v4318_v53 = vsel %vm4299_vm7, %v4315_v27, %v4317_v62 }
 0x206   : > { %5700 = vmatmul.msk.bf16.gmra.mxu3 %vm307_vm1, %v3795_v58  ;;  %v3803_v58 = vor.u32 %v3802_v10, %v3799_v1  ;;  %v3248_v10 = vrot.slane %v6971_v20, 2 }
 0x207   : > { %5813 = vmatmul.msk.bf16.gmra.mxu0 %vm307_vm1, %v4316_v5  ;;  %v1437_v17 = vpop.f32.mrf.mxu2  ;;  %v2779_v5 = vsel %vm2760_vm6, %v2776_v13, %v2778_v23 }
 0x208   : > { %v1512_v9 = vadd.f32 %v1437_v17, %v1043_v29  ;;  %v3804_v13 = vsel %vm3697_vm5, %v3794_v2, %v3803_v58 }
 0x209   : > { %v970_v48 = vpop.f32.mrf.mxu1  ;;  %v6946_v60 = vpop.f32.mrf.mxu3 }
 0x20a   : > { %v1980_v57 = vadd.f32 %v6898_v21, %v1512_v9  ;;  %v1044_v44 = vadd.f32 %v970_v48, %v7223_v26  ;;  %v3247_v21 = vsel %vm2760_vm6, %v3244_v45, %v3246_v28  ;;  %v5992_v45 = vld [vmem:[%s6111_s30 + $0x70] sm:$0xff] }
 0x20b   : > { %v3806_v52 = vshrl.u32 %v5992_v45, 16  ;;  %v3809_v4 = vshll.u32 %v5992_v45, 16 }
 0x20c   : > { %v2509_v30 = vpop.f32.mrf.mxu0  ;;  %v6948_v38 = vadd.f32 %v2507_v59, %v1980_v57 }
 0x20d   : > { %v3808_v26 = vrot.slane %v3806_v52, 2 }
 0x20f   : > { %v1439_v54 = vpop.f32.mrf.mxu2 }
 0x210   : > { %v1513_v35 = vadd.f32 %v1439_v54, %v1044_v44  ;;  %v3811_v44 = vrot.slane %v3809_v4, 3  ;;  %v5947_v4 = vld [vmem:[%s6111_s30 + $0x60] sm:$0xff] }
 0x211   : > { %v2891_v63 = vpop.f32.mrf.mxu1  ;;  %v6955_v29 = vpop.f32.mrf.mxu3 }
 0x212   : > { %v1981_v59 = vadd.f32 %v6907_v0, %v1513_v35  ;;  %v3017_v0 = vadd.f32 %v2891_v63, %v6454_v50  ;;  %v2780_v50 = vrot.slane %v6968_v31, 2  ;;  %v7224_v35 = vld [vmem:[#allocation5_spill] sm:$0xff]  ;;  %v4319_v63 = vrot.slane %v6012_v32, 3 }
 0x214   : > { %v4430_v55 = vpop.f32.mrf.mxu0  ;;  %5469 = vmatmul.msk.bf16.gmra.mxu1 %vm307_vm1, %v2779_v5  ;;  %5584 = vmatmul.msk.bf16.gmra.mxu2 %vm307_vm1, %v3247_v21  ;;  %v6959_v17 = vadd.f32 %v2509_v30, %v1981_v59 }
 0x216   : > { %5701 = vmatmul.msk.bf16.gmra.mxu3 %vm307_vm1, %v3804_v13  ;;  %v3812_v13 = vor.u32 %v3811_v44, %v3808_v26  ;;  %v6013_v44 = vld [vmem:[%s6111_s30 + $0x68] sm:$0xff] }
 0x217   : > { %5814 = vmatmul.msk.bf16.gmra.mxu0 %vm307_vm1, %v4318_v53  ;;  %v3359_v9 = vpop.f32.mrf.mxu2  ;;  %v3249_v53 = vsel %vm2760_vm6, %v3246_v28, %v3248_v10  ;;  %v5993_v28 = vld [vmem:[%s6111_s30 + $0x78] sm:$0xff] }
 0x218   : > { %v3485_v48 = vadd.f32 %v3359_v9, %v3017_v0  ;;  %v4320_v9 = vsel %vm4299_vm7, %v4317_v62, %v4319_v63  ;;  %v3818_v32 = vshll.u32 %v5993_v28, 16 }
 0x219   : > { %v2893_v27 = vpop.f32.mrf.mxu1  ;;  %v6975_v2 = vpop.f32.mrf.mxu3 }
 0x21a   : > { %v4087_v57 = vadd.f32 %v6922_v47, %v3485_v48  ;;  %v3018_v47 = vadd.f32 %v2893_v27, %v7224_v35  ;;  %v2782_v35 = vrot.slane %v5947_v4, 2  ;;  %v5948_v4 = vld [vmem:[%s6111_s30 + $0x68] sm:$0xff] }
 0x21c   : > { %v4432_v30 = vpop.f32.mrf.mxu0  ;;  %v4556_v1 = vadd.f32 %v4430_v55, %v4087_v57  ;;  %v2781_v55 = vsel %vm2760_vm6, %v2778_v23, %v2780_v50  ;;  %v3813_v23 = vsel %vm3697_vm5, %v3803_v58, %v3812_v13  ;;  %v5969_v57 = vld [vmem:[%s6111_s30 + $0x68] sm:$0xff] }
 0x21e   : > { %v4664_v54 = vmax.f32 %v4556_v1, 0.0 }
 0x21f   : > { %v3361_v5 = vpop.f32.mrf.mxu2 }
 0x220   : > { %4700 = vst [vmem:[%s6980_s5] sm:$0xff] %v4664_v54  ;;  %v3486_v21 = vadd.f32 %v3361_v5, %v3018_v47  ;;  %v3820_v5 = vrot.slane %v3818_v32, 3 }
 0x221   : > { %v2896_v59 = vpop.f32.mrf.mxu1  ;;  %v6990_v48 = vpop.f32.mrf.mxu3 }
 0x222   : > { %v4088_v45 = vadd.f32 %v6931_v12, %v3486_v21  ;;  %v3019_v12 = vadd.f32 %v2896_v59, %v6498_v24  ;;  %v3250_v24 = vrot.slane %v5969_v57, 2  ;;  %v5970_v57 = vld [vmem:[%s6111_s30 + $0x70] sm:$0xff] }
 0x224   : > { %v4435_v0 = vpop.f32.mrf.mxu0  ;;  %v4557_v27 = vadd.f32 %v4432_v30, %v4088_v45  ;;  %5470 = vmatmul.msk.bf16.gmra.mxu1 %vm307_vm1, %v2781_v55  ;;  %5585 = vmatmul.msk.bf16.gmra.mxu2 %vm307_vm1, %v3249_v53  ;;  %v3815_v30 = vshrl.u32 %v5993_v28, 16  ;;  %v4321_v55 = vrot.slane %v6013_v44, 3  ;;  %v6014_v44 = vld [vmem:[%s6111_s30 + $0x70] sm:$0xff] }
 0x226   : > { %v4665_v31 = vmax.f32 %v4557_v27, 0.0  ;;  %5702 = vmatmul.msk.bf16.gmra.mxu3 %vm307_vm1, %v3813_v23  ;;  %v3817_v47 = vrot.slane %v3815_v30, 2  ;;  %v3251_v27 = vsel %vm2760_vm6, %v3248_v10, %v3250_v24  ;;  %v5994_v10 = vld [vmem:[%s6111_s30 + $0x80] sm:$0xff] }
 0x227   : > { %5815 = vmatmul.msk.bf16.gmra.mxu0 %vm307_vm1, %v4320_v9  ;;  %v3364_v20 = vpop.f32.mrf.mxu2  ;;  %v3824_v30 = vshrl.u32 %v5994_v10, 16  ;;  %v3827_v32 = vshll.u32 %v5994_v10, 16 }
 0x228   : > { %4701 = vst [vmem:[%s6980_s5 + $0x8] sm:$0xff] %v4665_v31  ;;  %v3487_v62 = vadd.f32 %v3364_v20, %v3019_v12  ;;  %v3821_v23 = vor.u32 %v3820_v5, %v3817_v47  ;;  %v4322_v31 = vsel %vm4299_vm7, %v4319_v63, %v4321_v55  ;;  %v2784_v47 = vrot.slane %v5948_v4, 2 }
 0x229   : > { %v2898_v52 = vpop.f32.mrf.mxu1  ;;  %v7004_v58 = vpop.f32.mrf.mxu3  ;;  %v3826_v5 = vrot.slane %v3824_v30, 2 }
 0x22a   : > { %v4089_v1 = vadd.f32 %v6946_v60, %v3487_v62  ;;  %v3020_v59 = vadd.f32 %v2898_v52, %v6511_v25  ;;  %v2783_v60 = vsel %vm2760_vm6, %v2780_v50, %v2782_v35  ;;  %v3822_v50 = vsel %vm3697_vm5, %v3812_v13, %v3821_v23 }
 0x22c   : > { %v4437_v26 = vpop.f32.mrf.mxu0  ;;  %v4558_v54 = vadd.f32 %v4435_v0, %v4089_v1 }
 0x22e   : > { %v4666_v21 = vmax.f32 %v4558_v54, 0.0 }
 0x22f   : > { %v3366_v53 = vpop.f32.mrf.mxu2 }
 0x230   : > { %4702 = vst [vmem:[%s6980_s5 + $0x10] sm:$0xff] %v4666_v21  ;;  %v3488_v45 = vadd.f32 %v3366_v53, %v3020_v59  ;;  %v3829_v21 = vrot.slane %v3827_v32, 3 }
 0x231   : > { %v2901_v9 = vpop.f32.mrf.mxu1  ;;  %v7012_v25 = vpop.f32.mrf.mxu3 }
 0x232   : > { %v4090_v0 = vadd.f32 %v6955_v29, %v3488_v45  ;;  %v3021_v29 = vadd.f32 %v2901_v9, %v6523_v39  ;;  %v3252_v39 = vrot.slane %v5970_v57, 2  ;;  %v4323_v45 = vrot.slane %v6014_v44, 3 }
 0x234   : > { %v4440_v28 = vpop.f32.mrf.mxu0  ;;  %v4559_v12 = vadd.f32 %v4437_v26, %v4090_v0  ;;  %5471 = vmatmul.msk.bf16.gmra.mxu1 %vm307_vm1, %v2783_v60  ;;  %5586 = vmatmul.msk.bf16.gmra.mxu2 %vm307_vm1, %v3251_v27  ;;  %v3253_v0 = vsel %vm2760_vm6, %v3250_v24, %v3252_v39  ;;  %v5995_v24 = vld [vmem:[%s6111_s30 + $0x88] sm:$0xff] }
 0x235   : > { %v3833_v4 = vshrl.u32 %v5995_v24, 16  ;;  %v3836_v57 = vshll.u32 %v5995_v24, 16 }
 0x236   : > { %v4667_v20 = vmax.f32 %v4559_v12, 0.0  ;;  %5703 = vmatmul.msk.bf16.gmra.mxu3 %vm307_vm1, %v3822_v50  ;;  %v4324_v50 = vsel %vm4299_vm7, %v4321_v55, %v4323_v45 }
 0x237   : > { %5816 = vmatmul.msk.bf16.gmra.mxu0 %vm307_vm1, %v4322_v31  ;;  %v3369_v62 = vpop.f32.mrf.mxu2  ;;  %v3830_v31 = vor.u32 %v3829_v21, %v3826_v5  ;;  %v3838_v5 = vrot.slane %v3836_v57, 3 }
 0x238   : > { %4703 = vst [vmem:[%s6980_s5 + $0x18] sm:$0xff] %v4667_v20  ;;  %v3489_v63 = vadd.f32 %v3369_v62, %v3021_v29 }
 0x239   : > { %v2903_v52 = vpop.f32.mrf.mxu1  ;;  %v7026_v13 = vpop.f32.mrf.mxu3 }
 0x23a   : > { %v4091_v1 = vadd.f32 %v6975_v2, %v3489_v63  ;;  %v3022_v53 = vadd.f32 %v2903_v52, %v6536_v56  ;;  %v2785_v2 = vsel %vm2760_vm6, %v2782_v35, %v2784_v47  ;;  %v3831_v35 = vsel %vm3697_vm5, %v3821_v23, %v3830_v31  ;;  %v5949_v63 = vld [vmem:[%s6111_s30 + $0x70] sm:$0xff]  ;;  %v5971_v52 = vld [vmem:[%s6111_s30 + $0x78] sm:$0xff] }
 0x23b   : > { %v2786_v44 = vrot.slane %v5949_v63, 2 }
 0x23c   : > { %v4442_v26 = vpop.f32.mrf.mxu0  ;;  %v4560_v54 = vadd.f32 %v4440_v28, %v4091_v1  ;;  %v6015_v1 = vld [vmem:[%s6111_s30 + $0x78] sm:$0xff] }
 0x23e   : > { %v4668_v59 = vmax.f32 %v4560_v54, 0.0  ;;  %v3835_v54 = vrot.slane %v3833_v4, 2  ;;  %v6016_v4 = vld [vmem:[%s6111_s30 + $0x80] sm:$0xff] }
 0x23f   : > { %v3371_v9 = vpop.f32.mrf.mxu2 }
 0x240   : > { %4704 = vst [vmem:[%s6980_s5 + $0x20] sm:$0xff] %v4668_v59  ;;  %v3490_v60 = vadd.f32 %v3371_v9, %v3022_v53  ;;  %v4325_v53 = vrot.slane %v6015_v1, 3 }
 0x241   : > { %v2906_v27 = vpop.f32.mrf.mxu1  ;;  %v7034_v56 = vpop.f32.mrf.mxu3 }
 0x242   : > { %v4092_v28 = vadd.f32 %v6990_v48, %v3490_v60  ;;  %v3023_v48 = vadd.f32 %v2906_v27, %v6547_v61  ;;  %v3254_v61 = vrot.slane %v5971_v52, 2 }
 0x244   : > { %v4445_v12 = vpop.f32.mrf.mxu0  ;;  %v4561_v10 = vadd.f32 %v4442_v26, %v4092_v28  ;;  %5472 = vmatmul.msk.bf16.gmra.mxu1 %vm307_vm1, %v2785_v2  ;;  %5587 = vmatmul.msk.bf16.gmra.mxu2 %vm307_vm1, %v3253_v0  ;;  %v3255_v2 = vsel %vm2760_vm6, %v3252_v39, %v3254_v61  ;;  %v3839_v0 = vor.u32 %v3838_v5, %v3835_v54  ;;  %v5996_v39 = vld [vmem:[%s6111_s30 + $0x90] sm:$0xff]  ;;  %v7225_v54 = vld [vmem:[#allocation6_spill] sm:$0xff] }
 0x246   : > { %v4669_v20 = vmax.f32 %v4561_v10, 0.0  ;;  %5704 = vmatmul.msk.bf16.gmra.mxu3 %vm307_vm1, %v3831_v35 }
 0x247   : > { %5817 = vmatmul.msk.bf16.gmra.mxu0 %vm307_vm1, %v4324_v50  ;;  %v3374_v29 = vpop.f32.mrf.mxu2  ;;  %v4326_v50 = vsel %vm4299_vm7, %v4323_v45, %v4325_v53 }
 0x248   : > { %4705 = vst [vmem:[%s6980_s5 + $0x28] sm:$0xff] %v4669_v20  ;;  %v3491_v55 = vadd.f32 %v3374_v29, %v3023_v48  ;;  %v5950_v48 = vld [vmem:[%s6111_s30 + $0x78] sm:$0xff]  ;;  %v5972_v29 = vld [vmem:[%s6111_s30 + $0x80] sm:$0xff] }
 0x249   : > { %v2908_v62 = vpop.f32.mrf.mxu1  ;;  %v7048_v23 = vpop.f32.mrf.mxu3 }
 0x24a   : > { %v4093_v30 = vadd.f32 %v7004_v58, %v3491_v55  ;;  %v3024_v59 = vadd.f32 %v2908_v62, %v6563_v33  ;;  %v2787_v58 = vsel %vm2760_vm6, %v2784_v47, %v2786_v44  ;;  %v3840_v47 = vsel %vm3697_vm5, %v3830_v31, %v3839_v0 }
 0x24b   : > { %v3842_v55 = vshrl.u32 %v5996_v39, 16  ;;  %v3845_v62 = vshll.u32 %v5996_v39, 16 }
 0x24c   : > { %v4447_v32 = vpop.f32.mrf.mxu0  ;;  %v4562_v26 = vadd.f32 %v4445_v12, %v4093_v30  ;;  %v2788_v30 = vrot.slane %v5950_v48, 2 }
 0x24d   : > { %v3847_v1 = vrot.slane %v3845_v62, 3 }
 0x24e   : > { %v4670_v21 = vmax.f32 %v4562_v26, 0.0 }
 0x24f   : > { %v3376_v9 = vpop.f32.mrf.mxu2 }
 0x250   : > { %4706 = vst [vmem:[%s6980_s5 + $0x30] sm:$0xff] %v4670_v21  ;;  %v3492_v60 = vadd.f32 %v3376_v9, %v3024_v59  ;;  %v4327_v21 = vrot.slane %v6016_v4, 3 }
 0x251   : > { %v2911_v27 = vpop.f32.mrf.mxu1  ;;  %v7056_v33 = vpop.f32.mrf.mxu3 }
 0x252   : > { %v4094_v28 = vadd.f32 %v7012_v25, %v3492_v60  ;;  %v3025_v25 = vadd.f32 %v2911_v27, %v6585_v40  ;;  %v3256_v40 = vrot.slane %v5972_v29, 2 }
 0x254   : > { %v4450_v12 = vpop.f32.mrf.mxu0  ;;  %v4563_v10 = vadd.f32 %v4447_v32, %v4094_v28  ;;  %5473 = vmatmul.msk.bf16.gmra.mxu1 %vm307_vm1, %v2787_v58  ;;  %5588 = vmatmul.msk.bf16.gmra.mxu2 %vm307_vm1, %v3255_v2  ;;  %v3844_v32 = vrot.slane %v3842_v55, 2  ;;  %v3257_v27 = vsel %vm2760_vm6, %v3254_v61, %v3256_v40  ;;  %v5997_v61 = vld [vmem:[%s6111_s30 + $0x98] sm:$0xff]  ;;  %v7096_v55 = vld [vmem:[%s6111_s30 + $0x88] sm:$0xff] }
 0x255   : > { %v3854_v48 = vshll.u32 %v5997_v61, 16 }
 0x256   : > { %v4671_v35 = vmax.f32 %v4563_v10, 0.0  ;;  %5705 = vmatmul.msk.bf16.gmra.mxu3 %vm307_vm1, %v3840_v47  ;;  %v3848_v58 = vor.u32 %v3847_v1, %v3844_v32 }
 0x257   : > { %5818 = vmatmul.msk.bf16.gmra.mxu0 %vm307_vm1, %v4326_v50  ;;  %v3379_v24 = vpop.f32.mrf.mxu2  ;;  %v3856_v32 = vrot.slane %v3854_v48, 3 }
 0x258   : > { %4707 = vst [vmem:[%s6980_s5 + $0x38] sm:$0xff] %v4671_v35  ;;  %v3493_v45 = vadd.f32 %v3379_v24, %v3025_v25  ;;  %v7089_v24 = vld [vmem:[%s6111_s30 + $0x80] sm:$0xff] }
 0x259   : > { %v2913_v20 = vpop.f32.mrf.mxu1  ;;  %v7070_v31 = vpop.f32.mrf.mxu3 }
 0x25a   : > { %v4095_v63 = vadd.f32 %v7026_v13, %v3493_v45  ;;  %v3026_v5 = vadd.f32 %v2913_v20, %v7225_v54  ;;  %v2789_v13 = vsel %vm2760_vm6, %v2786_v44, %v2788_v30  ;;  %v3849_v44 = vsel %vm3697_vm5, %v3839_v0, %v3848_v58  ;;  %v7092_v45 = vld [vmem:[%s6111_s30 + $0x88] sm:$0xff] }
 0x25b   : > { %v3851_v20 = vshrl.u32 %v5997_v61, 16  ;;  %v3258_v4 = vrot.slane %v7092_v45, 2 }
 0x25c   : > { %v4452_v52 = vpop.f32.mrf.mxu0  ;;  %v4564_v57 = vadd.f32 %v4450_v12, %v4095_v63  ;;  %v4328_v12 = vsel %vm4299_vm7, %v4325_v53, %v4327_v21 }
 0x25e   : > { %v4672_v26 = vmax.f32 %v4564_v57, 0.0  ;;  %v3853_v57 = vrot.slane %v3851_v20, 2 }
 0x25f   : > { %v3381_v59 = vpop.f32.mrf.mxu2 }
 0x260   : > { %4708 = vst [vmem:[%s6980_s5 + $0x40] sm:$0xff] %v4672_v26  ;;  %v3494_v9 = vadd.f32 %v3381_v59, %v3026_v5  ;;  %v7227_v26 = vld [vmem:[#allocation8_spill] sm:$0xff]  ;;  %v4329_v5 = vrot.slane %v7096_v55, 3 }
 0x261   : > { %v2916_v60 = vpop.f32.mrf.mxu1  ;;  %v7078_v50 = vpop.f32.mrf.mxu3 }
 0x262   : > { %v4096_v2 = vadd.f32 %v7034_v56, %v3494_v9  ;;  %v7226_v56 = vld [vmem:[#allocation7_spill] sm:$0xff] }
 0x263   : > { %v3027_v39 = vadd.f32 %v2916_v60, %v7226_v56  ;;  %v7228_v56 = vld [vmem:[#allocation9_spill] sm:$0xff] }
 0x264   : > { %v4455_v28 = vpop.f32.mrf.mxu0  ;;  %v4565_v10 = vadd.f32 %v4452_v52, %v4096_v2  ;;  %5474 = vmatmul.msk.bf16.gmra.mxu1 %vm307_vm1, %v2789_v13  ;;  %5589 = vmatmul.msk.bf16.gmra.mxu2 %vm307_vm1, %v3257_v27  ;;  %v2790_v52 = vrot.slane %v7089_v24, 2  ;;  %v3259_v13 = vsel %vm2760_vm6, %v3256_v40, %v3258_v4  ;;  %v3857_v27 = vor.u32 %v3856_v32, %v3853_v57  ;;  %v5974_v24 = vld [vmem:[%s6111_s30 + $0x90] sm:$0xff] }
 0x265   : > { %v3260_v57 = vrot.slane %v5974_v24, 2 }
 0x266   : > { %v4673_v47 = vmax.f32 %v4565_v10, 0.0  ;;  %5706 = vmatmul.msk.bf16.gmra.mxu3 %vm307_vm1, %v3849_v44  ;;  %v2791_v60 = vsel %vm2760_vm6, %v2788_v30, %v2790_v52  ;;  %v3593_v10 = vld [vmem:[%s6111_s30 + $0xa0] sm:$0x7]  ;;  %v3858_v30 = vsel %vm3697_vm5, %v3848_v58, %v3857_v27 }
 0x267   : > { %5819 = vmatmul.msk.bf16.gmra.mxu0 %vm307_vm1, %v4328_v12  ;;  %v3384_v35 = vpop.f32.mrf.mxu2  ;;  %v4330_v12 = vsel %vm4299_vm7, %v4327_v21, %v4329_v5  ;;  %v3677_v61 = vunpack.c.l.b16 %v3593_v10 }
 0x268   : > { %4709 = vst [vmem:[%s6980_s5 + $0x48] sm:$0xff] %v4673_v47  ;;  %v3495_v53 = vadd.f32 %v3384_v35, %v3027_v39 }
 0x269   : > { %v2918_v25 = vpop.f32.mrf.mxu1  ;;  %v7098_v62 = vpop.f32.mrf.mxu3 }
 0x26a   : > { %v4097_v29 = vadd.f32 %v7048_v23, %v3495_v53  ;;  %v3028_v54 = vadd.f32 %v2918_v25, %v7227_v26  ;;  %v5952_v25 = vld [vmem:[%s6111_s30 + $0x88] sm:$0xff] }
 0x26c   : > { %v4457_v0 = vpop.f32.mrf.mxu0  ;;  %v4566_v63 = vadd.f32 %v4455_v28, %v4097_v29 }
 0x26e   : > { %v4674_v1 = vmax.f32 %v4566_v63, 0.0  ;;  %v2792_v63 = vrot.slane %v5952_v25, 2 }
 0x26f   : > { %v3386_v59 = vpop.f32.mrf.mxu2 }
 0x270   : > { %4710 = vst [vmem:[%s6980_s5 + $0x50] sm:$0xff] %v4674_v1  ;;  %v3496_v23 = vadd.f32 %v3386_v59, %v3028_v54  ;;  %v7229_v54 = vld [vmem:[#allocation10_spill] sm:$0xff] }
 0x271   : > { %v2921_v9 = vpop.f32.mrf.mxu1  ;;  %v7110_v44 = vpop.f32.mrf.mxu3 }
 0x272   : > { %v4098_v2 = vadd.f32 %v7056_v33, %v3496_v23  ;;  %v3696_v33 = vpack.c.b16 %v3677_v61, %v3677_v61  ;;  %v3029_v21 = vadd.f32 %v2921_v9, %v7228_v56  ;;  %v5953_v56 = vld [vmem:[%s6111_s30 + $0x90] sm:$0xff] }
 0x273   : > { %v2794_v24 = vrot.slane %v5953_v56, 2 }
 0x274   : > { %v4460_v28 = vpop.f32.mrf.mxu0  ;;  %v4567_v47 = vadd.f32 %v4457_v0, %v4098_v2  ;;  %5475 = vmatmul.msk.bf16.gmra.mxu1 %vm307_vm1, %v2791_v60  ;;  %5590 = vmatmul.msk.bf16.gmra.mxu2 %vm307_vm1, %v3259_v13  ;;  %v3860_v45 = vshrl.u32 %v3696_v33, 16  ;;  %v3863_v20 = vshll.u32 %v3696_v33, 16  ;;  %v6018_v0 = vld [vmem:[%s6111_s30 + $0x90] sm:$0xff]  ;;  %v3261_v2 = vsel %vm2760_vm6, %v3258_v4, %v3260_v57 }
 0x275   : > { %v4331_v23 = vrot.slane %v6018_v0, 3 }
 0x276   : > { %v4675_v40 = vmax.f32 %v4567_v47, 0.0  ;;  %5707 = vmatmul.msk.bf16.gmra.mxu3 %vm307_vm1, %v3858_v30  ;;  %v3862_v32 = vrot.slane %v3860_v45, 2  ;;  %v3865_v1 = vrot.slane %v3863_v20, 3 }
 0x277   : > { %5820 = vmatmul.msk.bf16.gmra.mxu0 %vm307_vm1, %v4330_v12  ;;  %v3389_v39 = vpop.f32.mrf.mxu2  ;;  %v4332_v61 = vsel %vm4299_vm7, %v4329_v5, %v4331_v23 }
 0x278   : > { %4711 = vst [vmem:[%s6980_s5 + $0x58] sm:$0xff] %v4675_v40  ;;  %v3497_v35 = vadd.f32 %v3389_v39, %v3029_v21  ;;  %v3866_v12 = vor.u32 %v3865_v1, %v3862_v32  ;;  %v5975_v21 = vld [vmem:[%s6111_s30 + $0x98] sm:$0xff] }
 0x279   : > { %v2923_v53 = vpop.f32.mrf.mxu1  ;;  %v7123_v58 = vpop.f32.mrf.mxu3 }
 0x27a   : > { %v4099_v48 = vadd.f32 %v7070_v31, %v3497_v35  ;;  %v3030_v59 = vadd.f32 %v2923_v53, %v7229_v54  ;;  %v2793_v31 = vsel %vm2760_vm6, %v2790_v52, %v2792_v63  ;;  %v3867_v52 = vsel %vm3697_vm5, %v3857_v27, %v3866_v12  ;;  %v6019_v53 = vld [vmem:[%s6111_s30 + $0x98] sm:$0xff] }
 0x27c   : > { %v4462_v29 = vpop.f32.mrf.mxu0  ;;  %v4568_v55 = vadd.f32 %v4460_v28, %v4099_v48  ;;  %v4333_v48 = vrot.slane %v6019_v53, 3 }
 0x27e   : > { %v4676_v26 = vmax.f32 %v4568_v55, 0.0  ;;  %v4334_v54 = vsel %vm4299_vm7, %v4331_v23, %v4333_v48 }
 0x27f   : > { %v3391_v9 = vpop.f32.mrf.mxu2 }
 0x280   : > { %4712 = vst [vmem:[%s6980_s5 + $0x60] sm:$0xff] %v4676_v26  ;;  %v3498_v60 = vadd.f32 %v3391_v9, %v3030_v59  ;;  %v2656_v59 = vld [vmem:[%s6111_s30 + $0x98] sm:$0x3]  ;;  %v3125_v9 = vld [vmem:[%s6111_s30 + $0xa0] sm:$0x3] }
 0x281   : > { %v2926_v13 = vpop.f32.mrf.mxu1  ;;  %v7131_v47 = vpop.f32.mrf.mxu3 }
 0x282   : > { %v4100_v28 = vadd.f32 %v7078_v50, %v3498_v60  ;;  %v3031_v50 = vadd.f32 %v2926_v13, %v6691_v41  ;;  %v3262_v41 = vrot.slane %v5975_v21, 2  ;;  %v4195_v60 = vld [vmem:[%s6111_s30 + $0xa0] sm:$0x7] }
 0x284   : > { %v4465_v10 = vpop.f32.mrf.mxu0  ;;  %v4569_v30 = vadd.f32 %v4462_v29, %v4100_v28  ;;  %5476 = vmatmul.msk.bf16.gmra.mxu1 %vm307_vm1, %v2793_v31  ;;  %5591 = vmatmul.msk.bf16.gmra.mxu2 %vm307_vm1, %v3261_v2  ;;  %v3263_v32 = vsel %vm2760_vm6, %v3260_v57, %v3262_v41  ;;  %v3209_v31 = vunpack.c.l.b16 %v3125_v9  ;;  %v4279_v2 = vunpack.c.l.b16 %v4195_v60 }
 0x286   : > { %v4677_v4 = vmax.f32 %v4569_v30, 0.0  ;;  %5708 = vmatmul.msk.bf16.gmra.mxu3 %vm307_vm1, %v3867_v52 }
 0x287   : > { %5821 = vmatmul.msk.bf16.gmra.mxu0 %vm307_vm1, %v4332_v61  ;;  %v3394_v33 = vpop.f32.mrf.mxu2  ;;  %v3228_v61 = vpack.c.b16 %v3209_v31, %v3209_v31 }
 0x288   : > { %4713 = vst [vmem:[%s6980_s5 + $0x68] sm:$0xff] %v4677_v4  ;;  %v3499_v40 = vadd.f32 %v3394_v33, %v3031_v50  ;;  %v4298_v4 = vpack.c.b16 %v4279_v2, %v4279_v2 }
 0x289   : > { %v2928_v5 = vpop.f32.mrf.mxu1  ;;  %v7144_v25 = vpop.f32.mrf.mxu3 }
 0x28a   : > { %v4101_v39 = vadd.f32 %v7098_v62, %v3499_v40  ;;  %v3032_v20 = vadd.f32 %v2928_v5, %v6707_v19  ;;  %v2795_v62 = vsel %vm2760_vm6, %v2792_v63, %v2794_v24  ;;  %v2740_v63 = vunpack.c.l.b16 %v2656_v59 }
 0x28b   : > { %v3264_v5 = vrot.slane %v3228_v61, 2 }
 0x28c   : > { %v4467_v35 = vpop.f32.mrf.mxu0  ;;  %v4570_v27 = vadd.f32 %v4465_v10, %v4101_v39  ;;  %v2759_v10 = vpack.c.b16 %v2740_v63, %v2740_v63 }
 0x28e   : > { %v4678_v45 = vmax.f32 %v4570_v27, 0.0  ;;  %v2796_v40 = vrot.slane %v2759_v10, 2 }
 0x28f   : > { %v3396_v29 = vpop.f32.mrf.mxu2 }
 0x290   : > { %4714 = vst [vmem:[%s6980_s5 + $0x70] sm:$0xff] %v4678_v45  ;;  %v3500_v0 = vadd.f32 %v3396_v29, %v3032_v20  ;;  %v2797_v27 = vsel %vm2760_vm6, %v2794_v24, %v2796_v40  ;;  %v3265_v45 = vsel %vm2760_vm6, %v3262_v41, %v3264_v5 }
 0x291   : > { %v2931_v55 = vpop.f32.mrf.mxu1  ;;  %v4008_v13 = vpop.f32.mrf.mxu3 }
 0x292   : > { %v4102_v1 = vadd.f32 %v7110_v44, %v3500_v0  ;;  %v3033_v44 = vadd.f32 %v2931_v55, %v6718_v36  ;;  %v4335_v36 = vrot.slane %v4298_v4, 3 }
 0x294   : > { %v4470_v26 = vpop.f32.mrf.mxu0  ;;  %v4571_v19 = vadd.f32 %v4467_v35, %v4102_v1  ;;  %5477 = vmatmul.msk.bf16.gmra.mxu1 %vm307_vm1, %v2795_v62  ;;  %5592 = vmatmul.msk.bf16.gmra.mxu2 %vm307_vm1, %v3263_v32  ;;  %v4336_v29 = vsel %vm4299_vm7, %v4333_v48, %v4335_v36 }
 0x296   : > { %v4679_v57 = vmax.f32 %v4571_v19, 0.0 }
 0x297   : > { %5822 = vmatmul.msk.bf16.gmra.mxu0 %vm307_vm1, %v4334_v54  ;;  %v3399_v12 = vpop.f32.mrf.mxu2 }
 0x298   : > { %4715 = vst [vmem:[%s6980_s5 + $0x78] sm:$0xff] %v4679_v57  ;;  %v3501_v23 = vadd.f32 %v3399_v12, %v3033_v44 }
 0x299   : > { %v2933_v28 = vpop.f32.mrf.mxu1  ;;  %v4011_v50 = vpop.f32.mrf.mxu3 }
 0x29a   : > { %v4103_v30 = vadd.f32 %v7123_v58, %v3501_v23  ;;  %v3034_v21 = vadd.f32 %v2933_v28, %v6731_v3 }
 0x29c   : > { %v4472_v52 = vpop.f32.mrf.mxu0  ;;  %v4572_v33 = vadd.f32 %v4470_v26, %v4103_v30 }
 0x29e   : > { %v4680_v56 = vmax.f32 %v4572_v33, 0.0 }
 0x29f   : > { %v3401_v39 = vpop.f32.mrf.mxu2 }
 0x2a0   : > { %4716 = vst [vmem:[%s6980_s5 + $0x80] sm:$0xff] %v4680_v56  ;;  %v3502_v35 = vadd.f32 %v3401_v39, %v3034_v21 }
 0x2a1   : > { %v2936_v53 = vpop.f32.mrf.mxu1  ;;  %v4013_v3 = vpop.f32.mrf.mxu3 }
 0x2a2   : > { %v4104_v58 = vadd.f32 %v7131_v47, %v3502_v35  ;;  %v3035_v62 = vadd.f32 %v2936_v53, %v6755_v46 }
 0x2a4   : > { %v4475_v20 = vpop.f32.mrf.mxu0  ;;  %v4573_v0 = vadd.f32 %v4472_v52, %v4104_v58  ;;  %5478 = vmatmul.msk.bf16.gmra.mxu1 %vm307_vm1, %v2797_v27  ;;  %5593 = vmatmul.msk.bf16.gmra.mxu2 %vm307_vm1, %v3265_v45 }
 0x2a6   : > { %v4681_v55 = vmax.f32 %v4573_v0, 0.0 }
 0x2a7   : > { %5823 = vmatmul.msk.bf16.gmra.mxu0 %vm307_vm1, %v4336_v29  ;;  %v3404_v24 = vpop.f32.mrf.mxu2 }
 0x2a8   : > { %4717 = vst [vmem:[%s6980_s5 + $0x88] sm:$0xff] %v4681_v55  ;;  %v3503_v41 = vadd.f32 %v3404_v24, %v3035_v62 }
 0x2a9   : > { %v2938_v32 = vpop.f32.mrf.mxu1  ;;  %v4016_v9 = vpop.f32.mrf.mxu3 }
 0x2aa   : > { %v4105_v47 = vadd.f32 %v7144_v25, %v3503_v41  ;;  %v3036_v54 = vadd.f32 %v2938_v32, %v6767_v16 }
 0x2ac   : > { %v4477_v48 = vpop.f32.mrf.mxu0  ;;  %v4574_v1 = vadd.f32 %v4475_v20, %v4105_v47 }
 0x2ae   : > { %v4682_v26 = vmax.f32 %v4574_v1, 0.0 }
 0x2af   : > { %v3406_v59 = vpop.f32.mrf.mxu2 }
 0x2b0   : > { %4718 = vst [vmem:[%s6980_s5 + $0x90] sm:$0xff] %v4682_v26  ;;  %v3504_v60 = vadd.f32 %v3406_v59, %v3036_v54 }
 0x2b1   : > { %v2941_v19 = vpop.f32.mrf.mxu1  ;;  %v4018_v23 = vpop.f32.mrf.mxu3 }
 0x2b2   : > { %v4106_v63 = vadd.f32 %v4008_v13, %v3504_v60  ;;  %v3037_v44 = vadd.f32 %v2941_v19, %v6780_v8 }
 0x2b4   : > { %v4480_v46 = vpop.f32.mrf.mxu0  ;;  %v4575_v31 = vadd.f32 %v4477_v48, %v4106_v63 }
 0x2b6   : > { %v4683_v57 = vmax.f32 %v4575_v31, 0.0 }
 0x2b7   : > { %v3409_v2 = vpop.f32.mrf.mxu2 }
 0x2b8   : > { %4719 = vst [vmem:[%s6980_s5 + $0x98] sm:$0xff] %v4683_v57  ;;  %v3505_v25 = vadd.f32 %v3409_v2, %v3037_v44 }
 0x2b9   : > { %v2943_v12 = vpop.f32.mrf.mxu1  ;;  %v4021_v8 = vpop.f32.mrf.mxu3 }
 0x2ba   : > { %v4107_v28 = vadd.f32 %v4011_v50, %v3505_v25  ;;  %v3038_v30 = vadd.f32 %v2943_v12, %v6791_v7 }
 0x2bc   : > { %v4482_v16 = vpop.f32.mrf.mxu0  ;;  %v4576_v10 = vadd.f32 %v4480_v46, %v4107_v28 }
 0x2be   : > { %v4684_v61 = vmax.f32 %v4576_v10, 0.0 }
 0x2bf   : > { %v3411_v52 = vpop.f32.mrf.mxu2 }
 0x2c0   : > { %4720 = vst [vmem:[%s6980_s5 + $0xa0] sm:$0xff] %v4684_v61  ;;  %v3506_v13 = vadd.f32 %v3411_v52, %v3038_v30 }
 0x2c1   : > { %v2946_v4 = vpop.f32.mrf.mxu1  ;;  %v4023_v27 = vpop.f32.mrf.mxu3 }
 0x2c2   : > { %v4108_v33 = vadd.f32 %v4013_v3, %v3506_v13  ;;  %v3039_v21 = vadd.f32 %v2946_v4, %v6804_v51 }
 0x2c4   : > { %v4485_v40 = vpop.f32.mrf.mxu0  ;;  %v4577_v5 = vadd.f32 %v4482_v16, %v4108_v33 }
 0x2c6   : > { %v4685_v56 = vmax.f32 %v4577_v5, 0.0 }
 0x2c7   : > { %v3414_v36 = vpop.f32.mrf.mxu2 }
 0x2c8   : > { %4721 = vst [vmem:[%s6980_s5 + $0xa8] sm:$0xff] %v4685_v56  ;;  %v3507_v50 = vadd.f32 %v3414_v36, %v3039_v21 }
 0x2c9   : > { %v2948_v39 = vpop.f32.mrf.mxu1  ;;  %v4026_v32 = vpop.f32.mrf.mxu3 }
 0x2ca   : > { %v4109_v35 = vadd.f32 %v4016_v9, %v3507_v50  ;;  %v3040_v58 = vadd.f32 %v2948_v39, %v6815_v34 }
 0x2cc   : > { %v4487_v53 = vpop.f32.mrf.mxu0  ;;  %v4578_v7 = vadd.f32 %v4485_v40, %v4109_v35 }
 0x2ce   : > { %v4686_v45 = vmax.f32 %v4578_v7, 0.0 }
 0x2cf   : > { %v3416_v20 = vpop.f32.mrf.mxu2 }
 0x2d0   : > { %4722 = vst [vmem:[%s6980_s5 + $0xb0] sm:$0xff] %v4686_v45  ;;  %v3508_v29 = vadd.f32 %v3416_v20, %v3040_v58 }
 0x2d1   : > { %v2951_v0 = vpop.f32.mrf.mxu1  ;;  %v4028_v63 = vpop.f32.mrf.mxu3 }
 0x2d2   : > { %v4110_v3 = vadd.f32 %v4018_v23, %v3508_v29  ;;  %v3041_v24 = vadd.f32 %v2951_v0, %v6828_v14 }
 0x2d4   : > { %v4490_v55 = vpop.f32.mrf.mxu0  ;;  %v4579_v51 = vadd.f32 %v4487_v53, %v4110_v3 }
 0x2d6   : > { %v4687_v62 = vmax.f32 %v4579_v51, 0.0 }
 0x2d7   : > { %v3419_v41 = vpop.f32.mrf.mxu2 }
 0x2d8   : > { %4723 = vst [vmem:[%s6980_s5 + $0xb8] sm:$0xff] %v4687_v62  ;;  %v3509_v47 = vadd.f32 %v3419_v41, %v3041_v24 }
 0x2d9   : > { %v2953_v48 = vpop.f32.mrf.mxu1 }
 0x2da   : > { %v4111_v1 = vadd.f32 %v4021_v8, %v3509_v47  ;;  %v3042_v59 = vadd.f32 %v2953_v48, %v6839_v6  ;;  %v4031_v6 = vpop.f32.mrf.mxu3 }
 0x2dc   : > { %v4492_v26 = vpop.f32.mrf.mxu0  ;;  %v4580_v34 = vadd.f32 %v4490_v55, %v4111_v1 }
 0x2de   : > { %v4688_v54 = vmax.f32 %v4580_v34, 0.0 }
 0x2df   : > { %v3421_v9 = vpop.f32.mrf.mxu2 }
 0x2e0   : > { %4724 = vst [vmem:[%s6980_s5 + $0xc0] sm:$0xff] %v4688_v54  ;;  %v3510_v60 = vadd.f32 %v3421_v9, %v3042_v59 }
 0x2e1   : > { %v2956_v19 = vpop.f32.mrf.mxu1 }
 0x2e2   : > { %v4112_v46 = vadd.f32 %v4023_v27, %v3510_v60  ;;  %v3043_v44 = vadd.f32 %v2956_v19, %v6852_v11  ;;  %v4033_v40 = vpop.f32.mrf.mxu3 }
 0x2e4   : > { %v4495_v14 = vpop.f32.mrf.mxu0  ;;  %v4581_v31 = vadd.f32 %v4492_v26, %v4112_v46 }
 0x2e6   : > { %v4689_v57 = vmax.f32 %v4581_v31, 0.0 }
 0x2e7   : > { %v3424_v2 = vpop.f32.mrf.mxu2 }
 0x2e8   : > { %4725 = vst [vmem:[%s6980_s5 + $0xc8] sm:$0xff] %v4689_v57  ;;  %v3511_v25 = vadd.f32 %v3424_v2, %v3043_v44 }
 0x2e9   : > { %v2958_v12 = vpop.f32.mrf.mxu1 }
 0x2ea   : > { %v4113_v23 = vadd.f32 %v4026_v32, %v3511_v25  ;;  %v3044_v61 = vadd.f32 %v2958_v12, %v6863_v49  ;;  %v4036_v27 = vpop.f32.mrf.mxu3 }
 0x2ec   : > { %v4497_v28 = vpop.f32.mrf.mxu0  ;;  %v4582_v16 = vadd.f32 %v4495_v14, %v4113_v23 }
 0x2ee   : > { %v4690_v10 = vmax.f32 %v4582_v16, 0.0 }
 0x2ef   : > { %v3426_v30 = vpop.f32.mrf.mxu2 }
 0x2f0   : > { %4726 = vst [vmem:[%s6980_s5 + $0xd0] sm:$0xff] %v4690_v10  ;;  %v3512_v52 = vadd.f32 %v3426_v30, %v3044_v61 }
 0x2f1   : > { %v2961_v13 = vpop.f32.mrf.mxu1 }
 0x2f2   : > { %v4114_v4 = vadd.f32 %v4028_v63, %v3512_v52  ;;  %v3045_v5 = vadd.f32 %v2961_v13, %v6876_v43  ;;  %v4038_v24 = vpop.f32.mrf.mxu3 }
 0x2f4   : > { %v4500_v33 = vpop.f32.mrf.mxu0  ;;  %v4583_v11 = vadd.f32 %v4497_v28, %v4114_v4 }
 0x2f6   : > { %v4691_v8 = vmax.f32 %v4583_v11, 0.0 }
 0x2f7   : > { %v3429_v56 = vpop.f32.mrf.mxu2 }
 0x2f8   : > { %4727 = vst [vmem:[%s6980_s5 + $0xd8] sm:$0xff] %v4691_v8  ;;  %v3513_v21 = vadd.f32 %v3429_v56, %v3045_v5 }
 0x2f9   : > { %v2963_v36 = vpop.f32.mrf.mxu1 }
 0x2fa   : > { %v4115_v50 = vadd.f32 %v4031_v6, %v3513_v21  ;;  %v3046_v53 = vadd.f32 %v2963_v36, %v6887_v37  ;;  %v4041_v59 = vpop.f32.mrf.mxu3 }
 0x2fc   : > { %v4502_v39 = vpop.f32.mrf.mxu0  ;;  %v4584_v49 = vadd.f32 %v4500_v33, %v4115_v50 }
 0x2fe   : > { %v4692_v35 = vmax.f32 %v4584_v49, 0.0 }
 0x2ff   : > { %v3431_v7 = vpop.f32.mrf.mxu2 }
 0x300   : > { %4728 = vst [vmem:[%s6980_s5 + $0xe0] sm:$0xff] %v4692_v35  ;;  %v3514_v45 = vadd.f32 %v3431_v7, %v3046_v53 }
 0x301   : > { %v2966_v58 = vpop.f32.mrf.mxu1 }
 0x302   : > { %v4116_v20 = vadd.f32 %v4033_v40, %v3514_v45  ;;  %v3047_v3 = vadd.f32 %v2966_v58, %v6900_v22 }
 0x304   : > { %v4505_v29 = vpop.f32.mrf.mxu0  ;;  %v4585_v43 = vadd.f32 %v4502_v39, %v4116_v20 }
 0x306   : > { %v4693_v0 = vmax.f32 %v4585_v43, 0.0 }
 0x307   : > { %v3434_v55 = vpop.f32.mrf.mxu2 }
 0x308   : > { %4729 = vst [vmem:[%s6980_s5 + $0xe8] sm:$0xff] %v4693_v0  ;;  %v3515_v51 = vadd.f32 %v3434_v55, %v3047_v3 }
 0x309   : > { %v2968_v62 = vpop.f32.mrf.mxu1 }
 0x30a   : > { %v4117_v41 = vadd.f32 %v4036_v27, %v3515_v51  ;;  %v3048_v48 = vadd.f32 %v2968_v62, %v6911_v15  ;;  %v4043_v15 = vpop.f32.mrf.mxu3 }
 0x30c   : > { %v4507_v37 = vpop.f32.mrf.mxu0  ;;  %v4586_v32 = vadd.f32 %v4505_v29, %v4117_v41 }
 0x30e   : > { %v4694_v47 = vmax.f32 %v4586_v32, 0.0 }
 0x30f   : > { %v3436_v1 = vpop.f32.mrf.mxu2 }
 0x310   : > { %4730 = vst [vmem:[%s6980_s5 + $0xf0] sm:$0xff] %v4694_v47  ;;  %v3516_v26 = vadd.f32 %v3436_v1, %v3048_v48 }
 0x311   : > { %v2971_v34 = vpop.f32.mrf.mxu1 }
 0x312   : > { %v4118_v54 = vadd.f32 %v4038_v24, %v3516_v26  ;;  %v3049_v19 = vadd.f32 %v2971_v34, %v6924_v18  ;;  %v4046_v61 = vpop.f32.mrf.mxu3 }
 0x314   : > { %v4587_v22 = vadd.f32 %v4507_v37, %v4118_v54  ;;  %v4510_v9 = vpop.f32.mrf.mxu0 }
 0x316   : > { %v4695_v60 = vmax.f32 %v4587_v22, 0.0 }
 0x317   : > { %v3439_v63 = vpop.f32.mrf.mxu2 }
 0x318   : > { %4731 = vst [vmem:[%s6980_s5 + $0xf8] sm:$0xff] %v4695_v60  ;;  %v3517_v46 = vadd.f32 %v3439_v63, %v3049_v19 }
 0x319   : > { %v2973_v14 = vpop.f32.mrf.mxu1 }
 0x31a   : > { %v4119_v31 = vadd.f32 %v4041_v59, %v3517_v46  ;;  %v3050_v2 = vadd.f32 %v2973_v14, %v6935_v42  ;;  %v4048_v56 = vpop.f32.mrf.mxu3 }
 0x31c   : > { %v4588_v57 = vadd.f32 %v4510_v9, %v4119_v31  ;;  %v4512_v25 = vpop.f32.mrf.mxu0 }
 0x31e   : > { %v4696_v44 = vmax.f32 %v4588_v57, 0.0 }
 0x31f   : > { %v3441_v12 = vpop.f32.mrf.mxu2 }
 0x320   : > { %4732 = vst [vmem:[%s6980_s5 + $0x100] sm:$0xff] %v4696_v44  ;;  %v3518_v23 = vadd.f32 %v3441_v12, %v3050_v2 }
 0x321   : > { %v2976_v28 = vpop.f32.mrf.mxu1 }
 0x322   : > { %v4120_v6 = vadd.f32 %v4043_v15, %v3518_v23  ;;  %v3051_v10 = vadd.f32 %v2976_v28, %v6948_v38 }
 0x324   : > { %v4589_v16 = vadd.f32 %v4512_v25, %v4120_v6  ;;  %v4515_v13 = vpop.f32.mrf.mxu0 }
 0x326   : > { %v4697_v18 = vmax.f32 %v4589_v16, 0.0 }
 0x327   : > { %v3444_v30 = vpop.f32.mrf.mxu2 }
 0x328   : > { %4733 = vst [vmem:[%s6980_s5 + $0x108] sm:$0xff] %v4697_v18  ;;  %v3519_v52 = vadd.f32 %v3444_v30, %v3051_v10 }
 0x329   : > { %v2978_v33 = vpop.f32.mrf.mxu1 }
 0x32a   : > { %v4121_v4 = vadd.f32 %v4046_v61, %v3519_v52  ;;  %v3052_v40 = vadd.f32 %v2978_v33, %v6959_v17 }
 0x32c   : > { %v4590_v42 = vadd.f32 %v4515_v13, %v4121_v4  ;;  %v4517_v36 = vpop.f32.mrf.mxu0 }
 0x32e   : > { %v4698_v11 = vmax.f32 %v4590_v42, 0.0 }
 0x32f   : > { %v3446_v8 = vpop.f32.mrf.mxu2 }
 0x330   : > { %4734 = vst [vmem:[%s6980_s5 + $0x110] sm:$0xff] %v4698_v11  ;;  %v3520_v5 = vadd.f32 %v3446_v8, %v3052_v40 }
 0x332   : > { %v4122_v21 = vadd.f32 %v4048_v56, %v3520_v5 }
 0x334   : > { %v4591_v50 = vadd.f32 %v4517_v36, %v4122_v21 }
 0x336   : > { %v4699_v38 = vmax.f32 %v4591_v50, 0.0 }
 0x338   : > { %4735 = vst [vmem:[%s6980_s5 + $0x118] sm:$0xff] %v4699_v38 }
 0x339 PF: > { %s12_s9 = sadd.s32 1, %s6055_s9  }
 0x33a   : > { %p9_p4 = scmp.ge.s32.totalorder %s12_s9, 4  }
 0x33c   :  { %11 = sbr.rel (!%p9_p4) target bundleno = 1 (0x1), region = 66 }

</bundles_post_ra>
